<compile_context>
chip_gen: v7x
topology: tpu7x:2x2x1
jax: 0.10.0
libtpu: 0.0.40
codegen_flags: <defaults>
</compile_context>

<pallas_src>
import functools

import jax
import jax.numpy as jnp
from jax.experimental import pallas as pl
from jax.experimental.pallas import tpu as pltpu

CP = 128  # channel padding = lane width: lane-dense stores + 128-deep contraction


def _round_up(x, m):
    return (x + m - 1) // m * m


# ----------------------------------------------------------------------------
# Fused decoder kernel: one grid step == NB batch samples, whole layer chain.
# ----------------------------------------------------------------------------
def _decoder_kernel(x_ref, w_ref, b_ref, o_ref, s0_ref, s1_ref, *,
                    plan, L0, PADH, NB):
    f32 = jnp.float32
    bf16 = jnp.bfloat16
    zpad = jnp.zeros((PADH, CP), f32)

    # Leading halo rows [0, PADH) are never written by any layer; zero them once
    # per grid step (scratch persists across grid iterations).
    s0_ref[0:PADH, :] = zpad
    s1_ref[0:PADH, :] = zpad

    # Scatter the NB input samples into slab 0 at stride S0 = L0 + PADH and zero
    # the inter-sample gap / trailing-halo rows for the initial stride.
    S0 = L0 + PADH
    for s in range(NB):
        s0_ref[s * S0 + PADH: s * S0 + PADH + L0, :] = x_ref[s]
    for s in range(1, NB + 1):
        s0_ref[s * S0: s * S0 + PADH, :] = zpad

    slabs = (s0_ref, s1_ref)
    cur = 0          # slab currently holding the activation (static, Python)
    L = L0           # current per-sample sequence length (static, Python)

    def zero_gaps(dst, stride):
        # Re-establish the "gap rows are zero" invariant for the next reader.
        for s in range(1, NB + 1):
            dst[s * stride: s * stride + PADH, :] = zpad

    def load_window(src, m, dil, relu_in):
        # One fat window covering all NB samples (+dil halo each side).  The ReLU
        # and the bf16 cast are applied ONCE here (relu(0) == 0, so gap/halo rows
        # stay exactly zero and 'same' zero-padding remains free).
        win = src[PADH - dil: PADH + m + dil, :]
        if relu_in:
            win = jnp.maximum(win, 0.0)
        return win.astype(bf16)

    def conv3(win, m, idx, dil):
        # 'same' K=3 dilated conv as 3 lane-dense bf16 matmuls, f32 accumulation.
        acc = None
        for k in range(3):
            xk = win[k * dil: k * dil + m, :]
            t = jnp.dot(xk, w_ref[idx, k], preferred_element_type=f32)
            acc = t if acc is None else acc + t
        return acc + b_ref[idx]

    n_layers = len(plan)
    for li, layer in enumerate(plan):            # static unroll over the layer plan
        kind = layer[0]
        S = L + PADH                             # per-sample stride at this stage
        M = NB * S - PADH                        # fat rows: all samples + interior gaps

        if kind == "conv":                       # plain K=3, d=1 conv (+ optional ReLU)
            _, idx, relu_out = layer
            win = load_window(slabs[cur], M, 1, False)
            y = conv3(win, M, idx, 1)
            if relu_out:
                y = jnp.maximum(y, 0.0)
            if li == n_layers - 1:
                # Final conv: per-sample lane-dense stores straight to the HBM block.
                for s in range(NB):
                    o_ref[s] = y[s * S: s * S + L].astype(o_ref.dtype)
            else:
                dst = slabs[1 - cur]
                dst[PADH: PADH + M, :] = y       # fat write (gap rows get garbage)
                zero_gaps(dst, S)                # ... and are re-zeroed here
                cur = 1 - cur

        elif kind == "res":                      # relu -> conv3(dil) -> relu -> 1x1 -> +skip
            _, i1, i2, dil = layer
            src = slabs[cur]
            win = load_window(src, M, dil, True)
            h = jnp.maximum(conv3(win, M, i1, dil), 0.0).astype(bf16)
            y = jnp.dot(h, w_ref[i2, 1], preferred_element_type=f32) + b_ref[i2]
            # Skip connection reads the pre-activation slab.  The in-place write
            # below is ordered after all reads because y data-depends on them —
            # do not break that dependence when editing.
            y = y + src[PADH: PADH + M, :]
            src[PADH: PADH + M, :] = y
            zero_gaps(src, S)

        else:                                    # "up": nearest-x2 upsample fused with K=3 conv
            _, idx = layer
            src = slabs[cur]
            win = load_window(src, M, 1, False)
            xm1 = win[0:M]                       # x[t-1]  (gap/halo rows are 0)
            x0 = win[1:M + 1]                    # x[t]
            xp1 = win[2:M + 2]                   # x[t+1]
            w0 = w_ref[idx, 0]
            w1 = w_ref[idx, 1]
            w2 = w_ref[idx, 2]
            bb = b_ref[idx]
            # out[2t]   = w0.x[t-1] + (w1+w2).x[t]
            # out[2t+1] = (w0+w1).x[t] + w2.x[t+1]
            even = (jnp.dot(xm1, w0, preferred_element_type=f32)
                    + jnp.dot(x0, w1 + w2, preferred_element_type=f32) + bb)
            odd = (jnp.dot(x0, w0 + w1, preferred_element_type=f32)
                   + jnp.dot(xp1, w2, preferred_element_type=f32) + bb)
            dst = slabs[1 - cur]
            S2 = 2 * L + PADH                    # per-sample stride after upsampling
            for s in range(NB):
                ev = even[s * S: s * S + L]
                od = odd[s * S: s * S + L]
                base = s * S2 + PADH
                # Row interleave via sublane-strided stores (vst slot): no MXU
                # selection matmuls, no cross-lane shuffles, no reshape.
                dst[pl.ds(base, L, stride=2), :] = ev
                dst[pl.ds(base + 1, L, stride=2), :] = od
            zero_gaps(dst, S2)
            cur = 1 - cur
            L = 2 * L


# ----------------------------------------------------------------------------
# Host-side preparation: pad every conv to (3, CP, CP) bf16 (K=1 at the center
# tap, padded rows/cols zero), stack into one weight tensor, build a static plan.
# ----------------------------------------------------------------------------
def _pad_conv(w, b):
    K, cin, cout = w.shape
    assert cin <= CP and cout <= CP, "channel tiling for width>128 not implemented"
    k0 = (3 - K) // 2
    wp = jnp.zeros((3, CP, CP), jnp.bfloat16).at[k0:k0 + K, :cin, :cout].set(
        w.astype(jnp.bfloat16))
    bp = jnp.zeros((1, CP), jnp.float32).at[0, :cout].set(b.astype(jnp.float32))
    return wp, bp


def _build_plan(params):
    Ws, Bs, plan = [], [], []

    def add(w, b):
        wp, bp = _pad_conv(w, b)
        Ws.append(wp)
        Bs.append(bp)
        return len(Ws) - 1

    w, b = params["conv_in"]
    plan.append(("conv", add(w, b), True))                       # Conv1d + ReLU
    for blk in params["blocks"]:
        for rb in blk["res"]:                                    # Resnet1D (reverse dilation)
            plan.append(("res", add(*rb["conv1"]), add(*rb["conv2"]), rb["dil"]))
        plan.append(("up", add(*blk["conv_up"])))                # Upsample x2 + Conv1d
    w, b = params["conv_post"]
    plan.append(("conv", add(w, b), True))                       # Conv1d + ReLU
    w, b = params["conv_out"]
    plan.append(("conv", add(w, b), False))                      # Conv1d -> input_emb_width
    return jnp.stack(Ws), jnp.stack(Bs), tuple(plan)


def decoder_forward(x, params, *, nb=None):
    """x: (N, L, output_emb_width) channels-last -> (N, L * 2**down_t, input_emb_width)."""
    N, L0, cin = x.shape
    assert cin <= CP
    W, B, plan = _build_plan(params)
    c_out = params["conv_out"][0].shape[2]
    n_up = sum(1 for p in plan if p[0] == "up")
    Lmax = L0 * (2 ** n_up)
    max_dil = max([1] + [p[3] for p in plan if p[0] == "res"])
    PADH = _round_up(max_dil, 8)        # halo/gap width; multiple of 8 keeps stores aligned
    n_conv = W.shape[0]

    # Batch NB samples per grid step to fatten the MXU M dimension, but keep at
    # least 2 grid steps when N >= 2 so both v7x TensorCores get work.
    if nb is None:
        nb = max(1, N // 2)
        while nb > 1 and nb * (Lmax + PADH) + PADH > 2048:   # cap slab/vreg pressure
            nb //= 2
    NB = max(1, int(nb))
    Npad = _round_up(N, NB)
    grid = Npad // NB
    ROWS = _round_up(NB * (Lmax + PADH) + PADH, 8)

    # One channel/batch pad at the network boundary (not per conv).
    xp = jnp.zeros((Npad, L0, CP), jnp.float32).at[:N, :, :cin].set(x.astype(jnp.float32))

    # Generation-aware VMEM ceiling: ~108 MiB on v5e/v6e (128 MiB), ~54 MiB on v7x (64 MiB).
    try:
        info = pltpu.get_tpu_info()
        vmem_cap = int(getattr(info, "vmem_capacity_bytes", 64 << 20))
    except Exception:
        vmem_cap = 64 << 20
    vmem_limit = max(32 << 20, int(vmem_cap * 0.85))

    kernel = functools.partial(_decoder_kernel, plan=plan, L0=L0, PADH=PADH, NB=NB)
    out = pl.pallas_call(
        kernel,
        out_shape=jax.ShapeDtypeStruct((Npad, Lmax, CP), jnp.float32),
        grid=(grid,),
        in_specs=[
            pl.BlockSpec((NB, L0, CP), lambda n: (n, 0, 0)),
            # Grid-invariant, VMEM-resident weight stack: single-buffered.
            pl.BlockSpec((n_conv, 3, CP, CP), lambda n: (0, 0, 0, 0),
                         pipeline_mode=pl.Buffered(1)),
            pl.BlockSpec((n_conv, 1, CP), lambda n: (0, 0, 0),
                         pipeline_mode=pl.Buffered(1)),
        ],
        out_specs=pl.BlockSpec((NB, Lmax, CP), lambda n: (n, 0, 0)),
        scratch_shapes=[pltpu.VMEM((ROWS, CP), jnp.float32),     # ping-pong activation slabs
                        pltpu.VMEM((ROWS, CP), jnp.float32)],
        compiler_params=pltpu.CompilerParams(
            dimension_semantics=("parallel",),
            vmem_limit_bytes=vmem_limit),
    )(xp, W, B)
    # TODO(synk): consumers that can take the lane-padded (Npad, Lmax, 128) buffer
    # directly avoid this extra HBM pass.
    return out[:N, :, :c_out]


# ----------------------------------------------------------------------------
# Synthetic parameters (deterministic) + pure-JAX reference for validation.
# ----------------------------------------------------------------------------
def _conv_params(key, cin, cout, k):
    k1, k2 = jax.random.split(key)
    std = (2.0 / (k * cin)) ** 0.5
    w = jax.random.normal(k1, (k, cin, cout), jnp.float32) * std
    b = jax.random.normal(k2, (cout,), jnp.float32) * 0.01
    return w, b


def init_decoder_params(key, *, input_emb_width, output_emb_width, down_t,
                        width, depth, dilation_growth_rate):
    keys = iter(jax.random.split(key, 256))
    params = {"conv_in": _conv_params(next(keys), output_emb_width, width, 3),
              "blocks": []}
    for _ in range(down_t):
        res = []
        for d in range(depth):
            res.append({"dil": dilation_growth_rate ** d,
                        "conv1": _conv_params(next(keys), width, width, 3),
                        "conv2": _conv_params(next(keys), width, width, 1)})
        res = res[::-1]  # reverse_dilation=True
        params["blocks"].append({"res": res,
                                 "conv_up": _conv_params(next(keys), width, width, 3)})
    params["conv_post"] = _conv_params(next(keys), width, width, 3)
    params["conv_out"] = _conv_params(next(keys), width, input_emb_width, 3)
    return params


def _ref_conv(x, w, b, dil=1):
    # Plain-JAX 'same' conv (cross-correlation), channels-last. Validation only.
    K = w.shape[0]
    pad = dil * (K - 1) // 2
    L = x.shape[1]
    xpad = jnp.pad(x, ((0, 0), (pad, pad), (0, 0)))
    acc = None
    for k in range(K):
        t = jnp.einsum("nlc,cd->nld", xpad[:, k * dil:k * dil + L, :], w[k],
                       precision=jax.lax.Precision.HIGHEST)
        acc = t if acc is None else acc + t
    return acc + b


def decoder_reference(x, params):
    x = jax.nn.relu(_ref_conv(x, *params["conv_in"]))
    for blk in params["blocks"]:
        for rb in blk["res"]:
            h = jax.nn.relu(_ref_conv(jax.nn.relu(x), *rb["conv1"], dil=rb["dil"]))
            x = _ref_conv(h, *rb["conv2"]) + x
        x = jnp.repeat(x, 2, axis=1)                 # reference path only
        x = _ref_conv(x, *blk["conv_up"])
    x = jax.nn.relu(_ref_conv(x, *params["conv_post"]))
    return _ref_conv(x, *params["conv_out"])


# ----------------------------------------------------------------------------
if __name__ == "__main__":
    # Small config consistent with the module's constructor.
    input_emb_width = 3
    output_emb_width = 32
    down_t = 2
    width = 32
    depth = 2
    dilation_growth_rate = 3
    N, L = 4, 8   # PyTorch input would be (N, output_emb_width, L) = (4, 32, 8)

    key = jax.random.PRNGKey(0)
    k_param, k_x = jax.random.split(key)
    params = init_decoder_params(
        k_param,
        input_emb_width=input_emb_width,
        output_emb_width=output_emb_width,
        down_t=down_t,
        width=width,
        depth=depth,
        dilation_growth_rate=dilation_growth_rate,
    )
    # Round parameters to bf16 (and back) so kernel and reference share the exact
    # weight values; the kernel stores its weights in bf16 by design.
    params = jax.tree_util.tree_map(
        lambda a: a.astype(jnp.bfloat16).astype(jnp.float32)
        if isinstance(a, jnp.ndarray) else a, params)

    # (N, L, C) channels-last; equivalent PyTorch NCL tensor is x.transpose(1, 2)
    x = jax.random.normal(k_x, (N, L, output_emb_width), jnp.float32)

    y = jax.block_until_ready(decoder_forward(x, params))
    expected = (N, L * (2 ** down_t), input_emb_width)
    assert y.shape == expected, (y.shape, expected)
    assert bool(jnp.all(jnp.isfinite(y)))

    y_ref = jax.block_until_ready(decoder_reference(x, params))
    err = float(jnp.max(jnp.abs(y - y_ref)))
    scale = float(jnp.max(jnp.abs(y_ref)))
    assert err <= 2e-2 * scale + 1e-3, (err, scale)

    print("KERNEL_OK")
</pallas_src>

<mosaic_0001>
module attributes {stable_mosaic.version = 11 : i64} {
  func.func @_decoder_kernel(%arg0: i32, %arg1: memref<2x8x128xf32, #tpu.memory_space<vmem>>, %arg2: memref<13x3x128x128xbf16, #tpu.memory_space<vmem>>, %arg3: memref<13x1x128xf32, #tpu.memory_space<vmem>>, %arg4: memref<2x32x128xf32, #tpu.memory_space<vmem>>, %arg5: memref<88x128xf32, #tpu.memory_space<vmem>>, %arg6: memref<88x128xf32, #tpu.memory_space<vmem>>) attributes {dimension_semantics = [#tpu.dimension_semantics<parallel>], iteration_bounds = array<i64: 2>, scalar_prefetch = 0 : i64, scratch_operands = 2 : i64, tpu.core_type = #tpu.core_type<tc>, window_params = [{transform_indices = @transform_0, window_bounds = array<i64: 2, 8, 128>}, {pipeline_mode = #tpu.pipeline_mode<synchronous>, transform_indices = @transform_1, window_bounds = array<i64: 13, 3, 128, 128>}, {pipeline_mode = #tpu.pipeline_mode<synchronous>, transform_indices = @transform_2, window_bounds = array<i64: 13, 1, 128>}, {transform_indices = @transform_3, window_bounds = array<i64: 2, 32, 128>}]} {
    %cst = arith.constant 0.000000e+00 : f32
    %0 = vector.broadcast %cst : f32 to vector<8x128xf32>
    %c0 = arith.constant 0 : index
    %c0_0 = arith.constant 0 : index
    %1 = vector.load %arg5[%c0, %c0_0] : memref<88x128xf32, #tpu.memory_space<vmem>>, vector<8x128xf32>
    tpu.vector_store %arg5[%c0, %c0_0], %0 {strides = array<i32>} : memref<88x128xf32, #tpu.memory_space<vmem>>, vector<8x128xf32>,
    %c0_1 = arith.constant 0 : index
    %c0_2 = arith.constant 0 : index
    %2 = vector.load %arg6[%c0_1, %c0_2] : memref<88x128xf32, #tpu.memory_space<vmem>>, vector<8x128xf32>
    tpu.vector_store %arg6[%c0_1, %c0_2], %0 {strides = array<i32>} : memref<88x128xf32, #tpu.memory_space<vmem>>, vector<8x128xf32>,
    %c0_3 = arith.constant 0 : index
    %c0_4 = arith.constant 0 : index
    %c0_5 = arith.constant 0 : index
    %3 = vector.load %arg1[%c0_3, %c0_4, %c0_5] : memref<2x8x128xf32, #tpu.memory_space<vmem>>, vector<1x8x128xf32>
    %4 = vector.shape_cast %3 : vector<1x8x128xf32> to vector<8x128xf32>
    %c8 = arith.constant 8 : index
    %c0_6 = arith.constant 0 : index
    %5 = vector.load %arg5[%c8, %c0_6] : memref<88x128xf32, #tpu.memory_space<vmem>>, vector<8x128xf32>
    tpu.vector_store %arg5[%c8, %c0_6], %4 {strides = array<i32>} : memref<88x128xf32, #tpu.memory_space<vmem>>, vector<8x128xf32>,
    %c1 = arith.constant 1 : index
    %c0_7 = arith.constant 0 : index
    %c0_8 = arith.constant 0 : index
    %6 = vector.load %arg1[%c1, %c0_7, %c0_8] : memref<2x8x128xf32, #tpu.memory_space<vmem>>, vector<1x8x128xf32>
    %7 = vector.shape_cast %6 : vector<1x8x128xf32> to vector<8x128xf32>
    %c24 = arith.constant 24 : index
    %c0_9 = arith.constant 0 : index
    %8 = vector.load %arg5[%c24, %c0_9] : memref<88x128xf32, #tpu.memory_space<vmem>>, vector<8x128xf32>
    tpu.vector_store %arg5[%c24, %c0_9], %7 {strides = array<i32>} : memref<88x128xf32, #tpu.memory_space<vmem>>, vector<8x128xf32>,
    %c16 = arith.constant 16 : index
    %c0_10 = arith.constant 0 : index
    %9 = vector.load %arg5[%c16, %c0_10] : memref<88x128xf32, #tpu.memory_space<vmem>>, vector<8x128xf32>
    tpu.vector_store %arg5[%c16, %c0_10], %0 {strides = array<i32>} : memref<88x128xf32, #tpu.memory_space<vmem>>, vector<8x128xf32>,
    %c32 = arith.constant 32 : index
    %c0_11 = arith.constant 0 : index
    %10 = vector.load %arg5[%c32, %c0_11] : memref<88x128xf32, #tpu.memory_space<vmem>>, vector<8x128xf32>
    tpu.vector_store %arg5[%c32, %c0_11], %0 {strides = array<i32>} : memref<88x128xf32, #tpu.memory_space<vmem>>, vector<8x128xf32>,
    %c7 = arith.constant 7 : index
    %c0_12 = arith.constant 0 : index
    %11 = vector.load %arg5[%c7, %c0_12] : memref<88x128xf32, #tpu.memory_space<vmem>>, vector<26x128xf32>
    %12 = arith.truncf %11 : vector<26x128xf32> to vector<26x128xbf16>
    %13 = vector.extract_strided_slice %12 {offsets = [0, 0], sizes = [24, 128], strides = [1, 1]} : vector<26x128xbf16> to vector<24x128xbf16>
    %c0_13 = arith.constant 0 : index
    %c0_14 = arith.constant 0 : index
    %c0_15 = arith.constant 0 : index
    %c0_16 = arith.constant 0 : index
    %14 = vector.load %arg2[%c0_13, %c0_14, %c0_15, %c0_16] : memref<13x3x128x128xbf16, #tpu.memory_space<vmem>>, vector<1x1x128x128xbf16>
    %15 = vector.shape_cast %14 : vector<1x1x128x128xbf16> to vector<128x128xbf16>
    %cst_17 = arith.constant dense<0.000000e+00> : vector<24x128xf32>
    %16 = tpu.matmul %13, %15, %cst_17 {dimension_numbers = #tpu.dot_dimension_numbers<[1], [0], [0], [1], [0, 0, 1, 1], [], []>} : vector<24x128xbf16>, vector<128x128xbf16>, vector<24x128xf32> -> vector<24x128xf32>
    %17 = vector.extract_strided_slice %12 {offsets = [1, 0], sizes = [24, 128], strides = [1, 1]} : vector<26x128xbf16> to vector<24x128xbf16>
    %c0_18 = arith.constant 0 : index
    %c1_19 = arith.constant 1 : index
    %c0_20 = arith.constant 0 : index
    %c0_21 = arith.constant 0 : index
    %18 = vector.load %arg2[%c0_18, %c1_19, %c0_20, %c0_21] : memref<13x3x128x128xbf16, #tpu.memory_space<vmem>>, vector<1x1x128x128xbf16>
    %19 = vector.shape_cast %18 : vector<1x1x128x128xbf16> to vector<128x128xbf16>
    %cst_22 = arith.constant dense<0.000000e+00> : vector<24x128xf32>
    %20 = tpu.matmul %17, %19, %cst_22 {dimension_numbers = #tpu.dot_dimension_numbers<[1], [0], [0], [1], [0, 0, 1, 1], [], []>} : vector<24x128xbf16>, vector<128x128xbf16>, vector<24x128xf32> -> vector<24x128xf32>
    %21 = arith.addf %16, %20 : vector<24x128xf32>
    %22 = vector.extract_strided_slice %12 {offsets = [2, 0], sizes = [24, 128], strides = [1, 1]} : vector<26x128xbf16> to vector<24x128xbf16>
    %c0_23 = arith.constant 0 : index
    %c2 = arith.constant 2 : index
    %c0_24 = arith.constant 0 : index
    %c0_25 = arith.constant 0 : index
    %23 = vector.load %arg2[%c0_23, %c2, %c0_24, %c0_25] : memref<13x3x128x128xbf16, #tpu.memory_space<vmem>>, vector<1x1x128x128xbf16>
    %24 = vector.shape_cast %23 : vector<1x1x128x128xbf16> to vector<128x128xbf16>
    %cst_26 = arith.constant dense<0.000000e+00> : vector<24x128xf32>
    %25 = tpu.matmul %22, %24, %cst_26 {dimension_numbers = #tpu.dot_dimension_numbers<[1], [0], [0], [1], [0, 0, 1, 1], [], []>} : vector<24x128xbf16>, vector<128x128xbf16>, vector<24x128xf32> -> vector<24x128xf32>
    %26 = arith.addf %21, %25 : vector<24x128xf32>
    %c0_27 = arith.constant 0 : index
    %c0_28 = arith.constant 0 : index
    %c0_29 = arith.constant 0 : index
    %27 = vector.load %arg3[%c0_27, %c0_28, %c0_29] : memref<13x1x128xf32, #tpu.memory_space<vmem>>, vector<1x1x128xf32>
    %28 = vector.shape_cast %27 : vector<1x1x128xf32> to vector<1x128xf32>
    %29 = vector.broadcast %28 : vector<1x128xf32> to vector<24x128xf32>
    %30 = arith.addf %26, %29 : vector<24x128xf32>
    %cst_30 = arith.constant 0.000000e+00 : f32
    %31 = vector.broadcast %cst_30 : f32 to vector<24x128xf32>
    %32 = arith.maximumf %30, %31 : vector<24x128xf32>
    %c8_31 = arith.constant 8 : index
    %c0_32 = arith.constant 0 : index
    %33 = vector.load %arg6[%c8_31, %c0_32] : memref<88x128xf32, #tpu.memory_space<vmem>>, vector<24x128xf32>
    tpu.vector_store %arg6[%c8_31, %c0_32], %32 {strides = array<i32>} : memref<88x128xf32, #tpu.memory_space<vmem>>, vector<24x128xf32>,
    %c16_33 = arith.constant 16 : index
    %c0_34 = arith.constant 0 : index
    %34 = vector.load %arg6[%c16_33, %c0_34] : memref<88x128xf32, #tpu.memory_space<vmem>>, vector<8x128xf32>
    tpu.vector_store %arg6[%c16_33, %c0_34], %0 {strides = array<i32>} : memref<88x128xf32, #tpu.memory_space<vmem>>, vector<8x128xf32>,
    %c32_35 = arith.constant 32 : index
    %c0_36 = arith.constant 0 : index
    %35 = vector.load %arg6[%c32_35, %c0_36] : memref<88x128xf32, #tpu.memory_space<vmem>>, vector<8x128xf32>
    tpu.vector_store %arg6[%c32_35, %c0_36], %0 {strides = array<i32>} : memref<88x128xf32, #tpu.memory_space<vmem>>, vector<8x128xf32>,
    %c5 = arith.constant 5 : index
    %c0_37 = arith.constant 0 : index
    %36 = vector.load %arg6[%c5, %c0_37] : memref<88x128xf32, #tpu.memory_space<vmem>>, vector<30x128xf32>
    %cst_38 = arith.constant 0.000000e+00 : f32
    %37 = vector.broadcast %cst_38 : f32 to vector<30x128xf32>
    %38 = arith.maximumf %36, %37 : vector<30x128xf32>
    %39 = arith.truncf %38 : vector<30x128xf32> to vector<30x128xbf16>
    %40 = vector.extract_strided_slice %39 {offsets = [0, 0], sizes = [24, 128], strides = [1, 1]} : vector<30x128xbf16> to vector<24x128xbf16>
    %c1_39 = arith.constant 1 : index
    %c0_40 = arith.constant 0 : index
    %c0_41 = arith.constant 0 : index
    %c0_42 = arith.constant 0 : index
    %41 = vector.load %arg2[%c1_39, %c0_40, %c0_41, %c0_42] : memref<13x3x128x128xbf16, #tpu.memory_space<vmem>>, vector<1x1x128x128xbf16>
    %42 = vector.shape_cast %41 : vector<1x1x128x128xbf16> to vector<128x128xbf16>
    %cst_43 = arith.constant dense<0.000000e+00> : vector<24x128xf32>
    %43 = tpu.matmul %40, %42, %cst_43 {dimension_numbers = #tpu.dot_dimension_numbers<[1], [0], [0], [1], [0, 0, 1, 1], [], []>} : vector<24x128xbf16>, vector<128x128xbf16>, vector<24x128xf32> -> vector<24x128xf32>
    %44 = vector.extract_strided_slice %39 {offsets = [3, 0], sizes = [24, 128], strides = [1, 1]} : vector<30x128xbf16> to vector<24x128xbf16>
    %c1_44 = arith.constant 1 : index
    %c1_45 = arith.constant 1 : index
    %c0_46 = arith.constant 0 : index
    %c0_47 = arith.constant 0 : index
    %45 = vector.load %arg2[%c1_44, %c1_45, %c0_46, %c0_47] : memref<13x3x128x128xbf16, #tpu.memory_space<vmem>>, vector<1x1x128x128xbf16>
    %46 = vector.shape_cast %45 : vector<1x1x128x128xbf16> to vector<128x128xbf16>
    %cst_48 = arith.constant dense<0.000000e+00> : vector<24x128xf32>
    %47 = tpu.matmul %44, %46, %cst_48 {dimension_numbers = #tpu.dot_dimension_numbers<[1], [0], [0], [1], [0, 0, 1, 1], [], []>} : vector<24x128xbf16>, vector<128x128xbf16>, vector<24x128xf32> -> vector<24x128xf32>
    %48 = arith.addf %43, %47 : vector<24x128xf32>
    %49 = vector.extract_strided_slice %39 {offsets = [6, 0], sizes = [24, 128], strides = [1, 1]} : vector<30x128xbf16> to vector<24x128xbf16>
    %c1_49 = arith.constant 1 : index
    %c2_50 = arith.constant 2 : index
    %c0_51 = arith.constant 0 : index
    %c0_52 = arith.constant 0 : index
    %50 = vector.load %arg2[%c1_49, %c2_50, %c0_51, %c0_52] : memref<13x3x128x128xbf16, #tpu.memory_space<vmem>>, vector<1x1x128x128xbf16>
    %51 = vector.shape_cast %50 : vector<1x1x128x128xbf16> to vector<128x128xbf16>
    %cst_53 = arith.constant dense<0.000000e+00> : vector<24x128xf32>
    %52 = tpu.matmul %49, %51, %cst_53 {dimension_numbers = #tpu.dot_dimension_numbers<[1], [0], [0], [1], [0, 0, 1, 1], [], []>} : vector<24x128xbf16>, vector<128x128xbf16>, vector<24x128xf32> -> vector<24x128xf32>
    %53 = arith.addf %48, %52 : vector<24x128xf32>
    %c1_54 = arith.constant 1 : index
    %c0_55 = arith.constant 0 : index
    %c0_56 = arith.constant 0 : index
    %54 = vector.load %arg3[%c1_54, %c0_55, %c0_56] : memref<13x1x128xf32, #tpu.memory_space<vmem>>, vector<1x1x128xf32>
    %55 = vector.shape_cast %54 : vector<1x1x128xf32> to vector<1x128xf32>
    %56 = vector.broadcast %55 : vector<1x128xf32> to vector<24x128xf32>
    %57 = arith.addf %53, %56 : vector<24x128xf32>
    %cst_57 = arith.constant 0.000000e+00 : f32
    %58 = vector.broadcast %cst_57 : f32 to vector<24x128xf32>
    %59 = arith.maximumf %57, %58 : vector<24x128xf32>
    %60 = arith.truncf %59 : vector<24x128xf32> to vector<24x128xbf16>
    %c2_58 = arith.constant 2 : index
    %c1_59 = arith.constant 1 : index
    %c0_60 = arith.constant 0 : index
    %c0_61 = arith.constant 0 : index
    %61 = vector.load %arg2[%c2_58, %c1_59, %c0_60, %c0_61] : memref<13x3x128x128xbf16, #tpu.memory_space<vmem>>, vector<1x1x128x128xbf16>
    %62 = vector.shape_cast %61 : vector<1x1x128x128xbf16> to vector<128x128xbf16>
    %cst_62 = arith.constant dense<0.000000e+00> : vector<24x128xf32>
    %63 = tpu.matmul %60, %62, %cst_62 {dimension_numbers = #tpu.dot_dimension_numbers<[1], [0], [0], [1], [0, 0, 1, 1], [], []>} : vector<24x128xbf16>, vector<128x128xbf16>, vector<24x128xf32> -> vector<24x128xf32>
    %c2_63 = arith.constant 2 : index
    %c0_64 = arith.constant 0 : index
    %c0_65 = arith.constant 0 : index
    %64 = vector.load %arg3[%c2_63, %c0_64, %c0_65] : memref<13x1x128xf32, #tpu.memory_space<vmem>>, vector<1x1x128xf32>
    %65 = vector.shape_cast %64 : vector<1x1x128xf32> to vector<1x128xf32>
    %66 = vector.broadcast %65 : vector<1x128xf32> to vector<24x128xf32>
    %67 = arith.addf %63, %66 : vector<24x128xf32>
    %c8_66 = arith.constant 8 : index
    %c0_67 = arith.constant 0 : index
    %68 = vector.load %arg6[%c8_66, %c0_67] : memref<88x128xf32, #tpu.memory_space<vmem>>, vector<24x128xf32>
    %69 = arith.addf %67, %68 : vector<24x128xf32>
    %c8_68 = arith.constant 8 : index
    %c0_69 = arith.constant 0 : index
    %70 = vector.load %arg6[%c8_68, %c0_69] : memref<88x128xf32, #tpu.memory_space<vmem>>, vector<24x128xf32>
    tpu.vector_store %arg6[%c8_68, %c0_69], %69 {strides = array<i32>} : memref<88x128xf32, #tpu.memory_space<vmem>>, vector<24x128xf32>,
    %c16_70 = arith.constant 16 : index
    %c0_71 = arith.constant 0 : index
    %71 = vector.load %arg6[%c16_70, %c0_71] : memref<88x128xf32, #tpu.memory_space<vmem>>, vector<8x128xf32>
    tpu.vector_store %arg6[%c16_70, %c0_71], %0 {strides = array<i32>} : memref<88x128xf32, #tpu.memory_space<vmem>>, vector<8x128xf32>,
    %c32_72 = arith.constant 32 : index
    %c0_73 = arith.constant 0 : index
    %72 = vector.load %arg6[%c32_72, %c0_73] : memref<88x128xf32, #tpu.memory_space<vmem>>, vector<8x128xf32>
    tpu.vector_store %arg6[%c32_72, %c0_73], %0 {strides = array<i32>} : memref<88x128xf32, #tpu.memory_space<vmem>>, vector<8x128xf32>,
    %c7_74 = arith.constant 7 : index
    %c0_75 = arith.constant 0 : index
    %73 = vector.load %arg6[%c7_74, %c0_75] : memref<88x128xf32, #tpu.memory_space<vmem>>, vector<26x128xf32>
    %cst_76 = arith.constant 0.000000e+00 : f32
    %74 = vector.broadcast %cst_76 : f32 to vector<26x128xf32>
    %75 = arith.maximumf %73, %74 : vector<26x128xf32>
    %76 = arith.truncf %75 : vector<26x128xf32> to vector<26x128xbf16>
    %77 = vector.extract_strided_slice %76 {offsets = [0, 0], sizes = [24, 128], strides = [1, 1]} : vector<26x128xbf16> to vector<24x128xbf16>
    %c3 = arith.constant 3 : index
    %c0_77 = arith.constant 0 : index
    %c0_78 = arith.constant 0 : index
    %c0_79 = arith.constant 0 : index
    %78 = vector.load %arg2[%c3, %c0_77, %c0_78, %c0_79] : memref<13x3x128x128xbf16, #tpu.memory_space<vmem>>, vector<1x1x128x128xbf16>
    %79 = vector.shape_cast %78 : vector<1x1x128x128xbf16> to vector<128x128xbf16>
    %cst_80 = arith.constant dense<0.000000e+00> : vector<24x128xf32>
    %80 = tpu.matmul %77, %79, %cst_80 {dimension_numbers = #tpu.dot_dimension_numbers<[1], [0], [0], [1], [0, 0, 1, 1], [], []>} : vector<24x128xbf16>, vector<128x128xbf16>, vector<24x128xf32> -> vector<24x128xf32>
    %81 = vector.extract_strided_slice %76 {offsets = [1, 0], sizes = [24, 128], strides = [1, 1]} : vector<26x128xbf16> to vector<24x128xbf16>
    %c3_81 = arith.constant 3 : index
    %c1_82 = arith.constant 1 : index
    %c0_83 = arith.constant 0 : index
    %c0_84 = arith.constant 0 : index
    %82 = vector.load %arg2[%c3_81, %c1_82, %c0_83, %c0_84] : memref<13x3x128x128xbf16, #tpu.memory_space<vmem>>, vector<1x1x128x128xbf16>
    %83 = vector.shape_cast %82 : vector<1x1x128x128xbf16> to vector<128x128xbf16>
    %cst_85 = arith.constant dense<0.000000e+00> : vector<24x128xf32>
    %84 = tpu.matmul %81, %83, %cst_85 {dimension_numbers = #tpu.dot_dimension_numbers<[1], [0], [0], [1], [0, 0, 1, 1], [], []>} : vector<24x128xbf16>, vector<128x128xbf16>, vector<24x128xf32> -> vector<24x128xf32>
    %85 = arith.addf %80, %84 : vector<24x128xf32>
    %86 = vector.extract_strided_slice %76 {offsets = [2, 0], sizes = [24, 128], strides = [1, 1]} : vector<26x128xbf16> to vector<24x128xbf16>
    %c3_86 = arith.constant 3 : index
    %c2_87 = arith.constant 2 : index
    %c0_88 = arith.constant 0 : index
    %c0_89 = arith.constant 0 : index
    %87 = vector.load %arg2[%c3_86, %c2_87, %c0_88, %c0_89] : memref<13x3x128x128xbf16, #tpu.memory_space<vmem>>, vector<1x1x128x128xbf16>
    %88 = vector.shape_cast %87 : vector<1x1x128x128xbf16> to vector<128x128xbf16>
    %cst_90 = arith.constant dense<0.000000e+00> : vector<24x128xf32>
    %89 = tpu.matmul %86, %88, %cst_90 {dimension_numbers = #tpu.dot_dimension_numbers<[1], [0], [0], [1], [0, 0, 1, 1], [], []>} : vector<24x128xbf16>, vector<128x128xbf16>, vector<24x128xf32> -> vector<24x128xf32>
    %90 = arith.addf %85, %89 : vector<24x128xf32>
    %c3_91 = arith.constant 3 : index
    %c0_92 = arith.constant 0 : index
    %c0_93 = arith.constant 0 : index
    %91 = vector.load %arg3[%c3_91, %c0_92, %c0_93] : memref<13x1x128xf32, #tpu.memory_space<vmem>>, vector<1x1x128xf32>
    %92 = vector.shape_cast %91 : vector<1x1x128xf32> to vector<1x128xf32>
    %93 = vector.broadcast %92 : vector<1x128xf32> to vector<24x128xf32>
    %94 = arith.addf %90, %93 : vector<24x128xf32>
    %cst_94 = arith.constant 0.000000e+00 : f32
    %95 = vector.broadcast %cst_94 : f32 to vector<24x128xf32>
    %96 = arith.maximumf %94, %95 : vector<24x128xf32>
    %97 = arith.truncf %96 : vector<24x128xf32> to vector<24x128xbf16>
    %c4 = arith.constant 4 : index
    %c1_95 = arith.constant 1 : index
    %c0_96 = arith.constant 0 : index
    %c0_97 = arith.constant 0 : index
    %98 = vector.load %arg2[%c4, %c1_95, %c0_96, %c0_97] : memref<13x3x128x128xbf16, #tpu.memory_space<vmem>>, vector<1x1x128x128xbf16>
    %99 = vector.shape_cast %98 : vector<1x1x128x128xbf16> to vector<128x128xbf16>
    %cst_98 = arith.constant dense<0.000000e+00> : vector<24x128xf32>
    %100 = tpu.matmul %97, %99, %cst_98 {dimension_numbers = #tpu.dot_dimension_numbers<[1], [0], [0], [1], [0, 0, 1, 1], [], []>} : vector<24x128xbf16>, vector<128x128xbf16>, vector<24x128xf32> -> vector<24x128xf32>
    %c4_99 = arith.constant 4 : index
    %c0_100 = arith.constant 0 : index
    %c0_101 = arith.constant 0 : index
    %101 = vector.load %arg3[%c4_99, %c0_100, %c0_101] : memref<13x1x128xf32, #tpu.memory_space<vmem>>, vector<1x1x128xf32>
    %102 = vector.shape_cast %101 : vector<1x1x128xf32> to vector<1x128xf32>
    %103 = vector.broadcast %102 : vector<1x128xf32> to vector<24x128xf32>
    %104 = arith.addf %100, %103 : vector<24x128xf32>
    %c8_102 = arith.constant 8 : index
    %c0_103 = arith.constant 0 : index
    %105 = vector.load %arg6[%c8_102, %c0_103] : memref<88x128xf32, #tpu.memory_space<vmem>>, vector<24x128xf32>
    %106 = arith.addf %104, %105 : vector<24x128xf32>
    %c8_104 = arith.constant 8 : index
    %c0_105 = arith.constant 0 : index
    %107 = vector.load %arg6[%c8_104, %c0_105] : memref<88x128xf32, #tpu.memory_space<vmem>>, vector<24x128xf32>
    tpu.vector_store %arg6[%c8_104, %c0_105], %106 {strides = array<i32>} : memref<88x128xf32, #tpu.memory_space<vmem>>, vector<24x128xf32>,
    %c16_106 = arith.constant 16 : index
    %c0_107 = arith.constant 0 : index
    %108 = vector.load %arg6[%c16_106, %c0_107] : memref<88x128xf32, #tpu.memory_space<vmem>>, vector<8x128xf32>
    tpu.vector_store %arg6[%c16_106, %c0_107], %0 {strides = array<i32>} : memref<88x128xf32, #tpu.memory_space<vmem>>, vector<8x128xf32>,
    %c32_108 = arith.constant 32 : index
    %c0_109 = arith.constant 0 : index
    %109 = vector.load %arg6[%c32_108, %c0_109] : memref<88x128xf32, #tpu.memory_space<vmem>>, vector<8x128xf32>
    tpu.vector_store %arg6[%c32_108, %c0_109], %0 {strides = array<i32>} : memref<88x128xf32, #tpu.memory_space<vmem>>, vector<8x128xf32>,
    %c7_110 = arith.constant 7 : index
    %c0_111 = arith.constant 0 : index
    %110 = vector.load %arg6[%c7_110, %c0_111] : memref<88x128xf32, #tpu.memory_space<vmem>>, vector<26x128xf32>
    %111 = arith.truncf %110 : vector<26x128xf32> to vector<26x128xbf16>
    %112 = vector.extract_strided_slice %111 {offsets = [0, 0], sizes = [24, 128], strides = [1, 1]} : vector<26x128xbf16> to vector<24x128xbf16>
    %113 = vector.extract_strided_slice %111 {offsets = [1, 0], sizes = [24, 128], strides = [1, 1]} : vector<26x128xbf16> to vector<24x128xbf16>
    %114 = vector.extract_strided_slice %111 {offsets = [2, 0], sizes = [24, 128], strides = [1, 1]} : vector<26x128xbf16> to vector<24x128xbf16>
    %c5_112 = arith.constant 5 : index
    %c0_113 = arith.constant 0 : index
    %c0_114 = arith.constant 0 : index
    %c0_115 = arith.constant 0 : index
    %115 = vector.load %arg2[%c5_112, %c0_113, %c0_114, %c0_115] : memref<13x3x128x128xbf16, #tpu.memory_space<vmem>>, vector<1x1x128x128xbf16>
    %116 = vector.shape_cast %115 : vector<1x1x128x128xbf16> to vector<128x128xbf16>
    %c5_116 = arith.constant 5 : index
    %c1_117 = arith.constant 1 : index
    %c0_118 = arith.constant 0 : index
    %c0_119 = arith.constant 0 : index
    %117 = vector.load %arg2[%c5_116, %c1_117, %c0_118, %c0_119] : memref<13x3x128x128xbf16, #tpu.memory_space<vmem>>, vector<1x1x128x128xbf16>
    %118 = vector.shape_cast %117 : vector<1x1x128x128xbf16> to vector<128x128xbf16>
    %c5_120 = arith.constant 5 : index
    %c2_121 = arith.constant 2 : index
    %c0_122 = arith.constant 0 : index
    %c0_123 = arith.constant 0 : index
    %119 = vector.load %arg2[%c5_120, %c2_121, %c0_122, %c0_123] : memref<13x3x128x128xbf16, #tpu.memory_space<vmem>>, vector<1x1x128x128xbf16>
    %120 = vector.shape_cast %119 : vector<1x1x128x128xbf16> to vector<128x128xbf16>
    %c5_124 = arith.constant 5 : index
    %c0_125 = arith.constant 0 : index
    %c0_126 = arith.constant 0 : index
    %121 = vector.load %arg3[%c5_124, %c0_125, %c0_126] : memref<13x1x128xf32, #tpu.memory_space<vmem>>, vector<1x1x128xf32>
    %122 = vector.shape_cast %121 : vector<1x1x128xf32> to vector<1x128xf32>
    %cst_127 = arith.constant dense<0.000000e+00> : vector<24x128xf32>
    %123 = tpu.matmul %112, %116, %cst_127 {dimension_numbers = #tpu.dot_dimension_numbers<[1], [0], [0], [1], [0, 0, 1, 1], [], []>} : vector<24x128xbf16>, vector<128x128xbf16>, vector<24x128xf32> -> vector<24x128xf32>
    %124 = arith.addf %118, %120 : vector<128x128xbf16>
    %cst_128 = arith.constant dense<0.000000e+00> : vector<24x128xf32>
    %125 = tpu.matmul %113, %124, %cst_128 {dimension_numbers = #tpu.dot_dimension_numbers<[1], [0], [0], [1], [0, 0, 1, 1], [], []>} : vector<24x128xbf16>, vector<128x128xbf16>, vector<24x128xf32> -> vector<24x128xf32>
    %126 = arith.addf %123, %125 : vector<24x128xf32>
    %127 = vector.broadcast %122 : vector<1x128xf32> to vector<24x128xf32>
    %128 = arith.addf %126, %127 : vector<24x128xf32>
    %129 = arith.addf %116, %118 : vector<128x128xbf16>
    %cst_129 = arith.constant dense<0.000000e+00> : vector<24x128xf32>
    %130 = tpu.matmul %113, %129, %cst_129 {dimension_numbers = #tpu.dot_dimension_numbers<[1], [0], [0], [1], [0, 0, 1, 1], [], []>} : vector<24x128xbf16>, vector<128x128xbf16>, vector<24x128xf32> -> vector<24x128xf32>
    %cst_130 = arith.constant dense<0.000000e+00> : vector<24x128xf32>
    %131 = tpu.matmul %114, %120, %cst_130 {dimension_numbers = #tpu.dot_dimension_numbers<[1], [0], [0], [1], [0, 0, 1, 1], [], []>} : vector<24x128xbf16>, vector<128x128xbf16>, vector<24x128xf32> -> vector<24x128xf32>
    %132 = arith.addf %130, %131 : vector<24x128xf32>
    %133 = vector.broadcast %122 : vector<1x128xf32> to vector<24x128xf32>
    %134 = arith.addf %132, %133 : vector<24x128xf32>
    %135 = vector.extract_strided_slice %128 {offsets = [0, 0], sizes = [8, 128], strides = [1, 1]} : vector<24x128xf32> to vector<8x128xf32>
    %136 = vector.extract_strided_slice %134 {offsets = [0, 0], sizes = [8, 128], strides = [1, 1]} : vector<24x128xf32> to vector<8x128xf32>
    %c8_131 = arith.constant 8 : index
    %c0_132 = arith.constant 0 : index
    %137 = tpu.strided_load %arg5[%c8_131, %c0_132] {strides = array<i32: 2, 1>} : memref<88x128xf32, #tpu.memory_space<vmem>>, vector<8x128xf32>
    tpu.strided_store %arg5[%c8_131, %c0_132], %135 {strides = array<i32: 2, 1>} : memref<88x128xf32, #tpu.memory_space<vmem>>, vector<8x128xf32>
    %c9 = arith.constant 9 : index
    %c0_133 = arith.constant 0 : index
    %138 = tpu.strided_load %arg5[%c9, %c0_133] {strides = array<i32: 2, 1>} : memref<88x128xf32, #tpu.memory_space<vmem>>, vector<8x128xf32>
    tpu.strided_store %arg5[%c9, %c0_133], %136 {strides = array<i32: 2, 1>} : memref<88x128xf32, #tpu.memory_space<vmem>>, vector<8x128xf32>
    %139 = vector.extract_strided_slice %128 {offsets = [16, 0], sizes = [8, 128], strides = [1, 1]} : vector<24x128xf32> to vector<8x128xf32>
    %140 = vector.extract_strided_slice %134 {offsets = [16, 0], sizes = [8, 128], strides = [1, 1]} : vector<24x128xf32> to vector<8x128xf32>
    %c32_134 = arith.constant 32 : index
    %c0_135 = arith.constant 0 : index
    %141 = tpu.strided_load %arg5[%c32_134, %c0_135] {strides = array<i32: 2, 1>} : memref<88x128xf32, #tpu.memory_space<vmem>>, vector<8x128xf32>
    tpu.strided_store %arg5[%c32_134, %c0_135], %139 {strides = array<i32: 2, 1>} : memref<88x128xf32, #tpu.memory_space<vmem>>, vector<8x128xf32>
    %c33 = arith.constant 33 : index
    %c0_136 = arith.constant 0 : index
    %142 = tpu.strided_load %arg5[%c33, %c0_136] {strides = array<i32: 2, 1>} : memref<88x128xf32, #tpu.memory_space<vmem>>, vector<8x128xf32>
    tpu.strided_store %arg5[%c33, %c0_136], %140 {strides = array<i32: 2, 1>} : memref<88x128xf32, #tpu.memory_space<vmem>>, vector<8x128xf32>
    %c24_137 = arith.constant 24 : index
    %c0_138 = arith.constant 0 : index
    %143 = vector.load %arg5[%c24_137, %c0_138] : memref<88x128xf32, #tpu.memory_space<vmem>>, vector<8x128xf32>
    tpu.vector_store %arg5[%c24_137, %c0_138], %0 {strides = array<i32>} : memref<88x128xf32, #tpu.memory_space<vmem>>, vector<8x128xf32>,
    %c48 = arith.constant 48 : index
    %c0_139 = arith.constant 0 : index
    %144 = vector.load %arg5[%c48, %c0_139] : memref<88x128xf32, #tpu.memory_space<vmem>>, vector<8x128xf32>
    tpu.vector_store %arg5[%c48, %c0_139], %0 {strides = array<i32>} : memref<88x128xf32, #tpu.memory_space<vmem>>, vector<8x128xf32>,
    %c5_140 = arith.constant 5 : index
    %c0_141 = arith.constant 0 : index
    %145 = vector.load %arg5[%c5_140, %c0_141] : memref<88x128xf32, #tpu.memory_space<vmem>>, vector<46x128xf32>
    %cst_142 = arith.constant 0.000000e+00 : f32
    %146 = vector.broadcast %cst_142 : f32 to vector<46x128xf32>
    %147 = arith.maximumf %145, %146 : vector<46x128xf32>
    %148 = arith.truncf %147 : vector<46x128xf32> to vector<46x128xbf16>
    %149 = vector.extract_strided_slice %148 {offsets = [0, 0], sizes = [40, 128], strides = [1, 1]} : vector<46x128xbf16> to vector<40x128xbf16>
    %c6 = arith.constant 6 : index
    %c0_143 = arith.constant 0 : index
    %c0_144 = arith.constant 0 : index
    %c0_145 = arith.constant 0 : index
    %150 = vector.load %arg2[%c6, %c0_143, %c0_144, %c0_145] : memref<13x3x128x128xbf16, #tpu.memory_space<vmem>>, vector<1x1x128x128xbf16>
    %151 = vector.shape_cast %150 : vector<1x1x128x128xbf16> to vector<128x128xbf16>
    %cst_146 = arith.constant dense<0.000000e+00> : vector<40x128xf32>
    %152 = tpu.matmul %149, %151, %cst_146 {dimension_numbers = #tpu.dot_dimension_numbers<[1], [0], [0], [1], [0, 0, 1, 1], [], []>} : vector<40x128xbf16>, vector<128x128xbf16>, vector<40x128xf32> -> vector<40x128xf32>
    %153 = vector.extract_strided_slice %148 {offsets = [3, 0], sizes = [40, 128], strides = [1, 1]} : vector<46x128xbf16> to vector<40x128xbf16>
    %c6_147 = arith.constant 6 : index
    %c1_148 = arith.constant 1 : index
    %c0_149 = arith.constant 0 : index
    %c0_150 = arith.constant 0 : index
    %154 = vector.load %arg2[%c6_147, %c1_148, %c0_149, %c0_150] : memref<13x3x128x128xbf16, #tpu.memory_space<vmem>>, vector<1x1x128x128xbf16>
    %155 = vector.shape_cast %154 : vector<1x1x128x128xbf16> to vector<128x128xbf16>
    %cst_151 = arith.constant dense<0.000000e+00> : vector<40x128xf32>
    %156 = tpu.matmul %153, %155, %cst_151 {dimension_numbers = #tpu.dot_dimension_numbers<[1], [0], [0], [1], [0, 0, 1, 1], [], []>} : vector<40x128xbf16>, vector<128x128xbf16>, vector<40x128xf32> -> vector<40x128xf32>
    %157 = arith.addf %152, %156 : vector<40x128xf32>
    %158 = vector.extract_strided_slice %148 {offsets = [6, 0], sizes = [40, 128], strides = [1, 1]} : vector<46x128xbf16> to vector<40x128xbf16>
    %c6_152 = arith.constant 6 : index
    %c2_153 = arith.constant 2 : index
    %c0_154 = arith.constant 0 : index
    %c0_155 = arith.constant 0 : index
    %159 = vector.load %arg2[%c6_152, %c2_153, %c0_154, %c0_155] : memref<13x3x128x128xbf16, #tpu.memory_space<vmem>>, vector<1x1x128x128xbf16>
    %160 = vector.shape_cast %159 : vector<1x1x128x128xbf16> to vector<128x128xbf16>
    %cst_156 = arith.constant dense<0.000000e+00> : vector<40x128xf32>
    %161 = tpu.matmul %158, %160, %cst_156 {dimension_numbers = #tpu.dot_dimension_numbers<[1], [0], [0], [1], [0, 0, 1, 1], [], []>} : vector<40x128xbf16>, vector<128x128xbf16>, vector<40x128xf32> -> vector<40x128xf32>
    %162 = arith.addf %157, %161 : vector<40x128xf32>
    %c6_157 = arith.constant 6 : index
    %c0_158 = arith.constant 0 : index
    %c0_159 = arith.constant 0 : index
    %163 = vector.load %arg3[%c6_157, %c0_158, %c0_159] : memref<13x1x128xf32, #tpu.memory_space<vmem>>, vector<1x1x128xf32>
    %164 = vector.shape_cast %163 : vector<1x1x128xf32> to vector<1x128xf32>
    %165 = vector.broadcast %164 : vector<1x128xf32> to vector<40x128xf32>
    %166 = arith.addf %162, %165 : vector<40x128xf32>
    %cst_160 = arith.constant 0.000000e+00 : f32
    %167 = vector.broadcast %cst_160 : f32 to vector<40x128xf32>
    %168 = arith.maximumf %166, %167 : vector<40x128xf32>
    %169 = arith.truncf %168 : vector<40x128xf32> to vector<40x128xbf16>
    %c7_161 = arith.constant 7 : index
    %c1_162 = arith.constant 1 : index
    %c0_163 = arith.constant 0 : index
    %c0_164 = arith.constant 0 : index
    %170 = vector.load %arg2[%c7_161, %c1_162, %c0_163, %c0_164] : memref<13x3x128x128xbf16, #tpu.memory_space<vmem>>, vector<1x1x128x128xbf16>
    %171 = vector.shape_cast %170 : vector<1x1x128x128xbf16> to vector<128x128xbf16>
    %cst_165 = arith.constant dense<0.000000e+00> : vector<40x128xf32>
    %172 = tpu.matmul %169, %171, %cst_165 {dimension_numbers = #tpu.dot_dimension_numbers<[1], [0], [0], [1], [0, 0, 1, 1], [], []>} : vector<40x128xbf16>, vector<128x128xbf16>, vector<40x128xf32> -> vector<40x128xf32>
    %c7_166 = arith.constant 7 : index
    %c0_167 = arith.constant 0 : index
    %c0_168 = arith.constant 0 : index
    %173 = vector.load %arg3[%c7_166, %c0_167, %c0_168] : memref<13x1x128xf32, #tpu.memory_space<vmem>>, vector<1x1x128xf32>
    %174 = vector.shape_cast %173 : vector<1x1x128xf32> to vector<1x128xf32>
    %175 = vector.broadcast %174 : vector<1x128xf32> to vector<40x128xf32>
    %176 = arith.addf %172, %175 : vector<40x128xf32>
    %c8_169 = arith.constant 8 : index
    %c0_170 = arith.constant 0 : index
    %177 = vector.load %arg5[%c8_169, %c0_170] : memref<88x128xf32, #tpu.memory_space<vmem>>, vector<40x128xf32>
    %178 = arith.addf %176, %177 : vector<40x128xf32>
    %c8_171 = arith.constant 8 : index
    %c0_172 = arith.constant 0 : index
    %179 = vector.load %arg5[%c8_171, %c0_172] : memref<88x128xf32, #tpu.memory_space<vmem>>, vector<40x128xf32>
    tpu.vector_store %arg5[%c8_171, %c0_172], %178 {strides = array<i32>} : memref<88x128xf32, #tpu.memory_space<vmem>>, vector<40x128xf32>,
    %c24_173 = arith.constant 24 : index
    %c0_174 = arith.constant 0 : index
    %180 = vector.load %arg5[%c24_173, %c0_174] : memref<88x128xf32, #tpu.memory_space<vmem>>, vector<8x128xf32>
    tpu.vector_store %arg5[%c24_173, %c0_174], %0 {strides = array<i32>} : memref<88x128xf32, #tpu.memory_space<vmem>>, vector<8x128xf32>,
    %c48_175 = arith.constant 48 : index
    %c0_176 = arith.constant 0 : index
    %181 = vector.load %arg5[%c48_175, %c0_176] : memref<88x128xf32, #tpu.memory_space<vmem>>, vector<8x128xf32>
    tpu.vector_store %arg5[%c48_175, %c0_176], %0 {strides = array<i32>} : memref<88x128xf32, #tpu.memory_space<vmem>>, vector<8x128xf32>,
    %c7_177 = arith.constant 7 : index
    %c0_178 = arith.constant 0 : index
    %182 = vector.load %arg5[%c7_177, %c0_178] : memref<88x128xf32, #tpu.memory_space<vmem>>, vector<42x128xf32>
    %cst_179 = arith.constant 0.000000e+00 : f32
    %183 = vector.broadcast %cst_179 : f32 to vector<42x128xf32>
    %184 = arith.maximumf %182, %183 : vector<42x128xf32>
    %185 = arith.truncf %184 : vector<42x128xf32> to vector<42x128xbf16>
    %186 = vector.extract_strided_slice %185 {offsets = [0, 0], sizes = [40, 128], strides = [1, 1]} : vector<42x128xbf16> to vector<40x128xbf16>
    %c8_180 = arith.constant 8 : index
    %c0_181 = arith.constant 0 : index
    %c0_182 = arith.constant 0 : index
    %c0_183 = arith.constant 0 : index
    %187 = vector.load %arg2[%c8_180, %c0_181, %c0_182, %c0_183] : memref<13x3x128x128xbf16, #tpu.memory_space<vmem>>, vector<1x1x128x128xbf16>
    %188 = vector.shape_cast %187 : vector<1x1x128x128xbf16> to vector<128x128xbf16>
    %cst_184 = arith.constant dense<0.000000e+00> : vector<40x128xf32>
    %189 = tpu.matmul %186, %188, %cst_184 {dimension_numbers = #tpu.dot_dimension_numbers<[1], [0], [0], [1], [0, 0, 1, 1], [], []>} : vector<40x128xbf16>, vector<128x128xbf16>, vector<40x128xf32> -> vector<40x128xf32>
    %190 = vector.extract_strided_slice %185 {offsets = [1, 0], sizes = [40, 128], strides = [1, 1]} : vector<42x128xbf16> to vector<40x128xbf16>
    %c8_185 = arith.constant 8 : index
    %c1_186 = arith.constant 1 : index
    %c0_187 = arith.constant 0 : index
    %c0_188 = arith.constant 0 : index
    %191 = vector.load %arg2[%c8_185, %c1_186, %c0_187, %c0_188] : memref<13x3x128x128xbf16, #tpu.memory_space<vmem>>, vector<1x1x128x128xbf16>
    %192 = vector.shape_cast %191 : vector<1x1x128x128xbf16> to vector<128x128xbf16>
    %cst_189 = arith.constant dense<0.000000e+00> : vector<40x128xf32>
    %193 = tpu.matmul %190, %192, %cst_189 {dimension_numbers = #tpu.dot_dimension_numbers<[1], [0], [0], [1], [0, 0, 1, 1], [], []>} : vector<40x128xbf16>, vector<128x128xbf16>, vector<40x128xf32> -> vector<40x128xf32>
    %194 = arith.addf %189, %193 : vector<40x128xf32>
    %195 = vector.extract_strided_slice %185 {offsets = [2, 0], sizes = [40, 128], strides = [1, 1]} : vector<42x128xbf16> to vector<40x128xbf16>
    %c8_190 = arith.constant 8 : index
    %c2_191 = arith.constant 2 : index
    %c0_192 = arith.constant 0 : index
    %c0_193 = arith.constant 0 : index
    %196 = vector.load %arg2[%c8_190, %c2_191, %c0_192, %c0_193] : memref<13x3x128x128xbf16, #tpu.memory_space<vmem>>, vector<1x1x128x128xbf16>
    %197 = vector.shape_cast %196 : vector<1x1x128x128xbf16> to vector<128x128xbf16>
    %cst_194 = arith.constant dense<0.000000e+00> : vector<40x128xf32>
    %198 = tpu.matmul %195, %197, %cst_194 {dimension_numbers = #tpu.dot_dimension_numbers<[1], [0], [0], [1], [0, 0, 1, 1], [], []>} : vector<40x128xbf16>, vector<128x128xbf16>, vector<40x128xf32> -> vector<40x128xf32>
    %199 = arith.addf %194, %198 : vector<40x128xf32>
    %c8_195 = arith.constant 8 : index
    %c0_196 = arith.constant 0 : index
    %c0_197 = arith.constant 0 : index
    %200 = vector.load %arg3[%c8_195, %c0_196, %c0_197] : memref<13x1x128xf32, #tpu.memory_space<vmem>>, vector<1x1x128xf32>
    %201 = vector.shape_cast %200 : vector<1x1x128xf32> to vector<1x128xf32>
    %202 = vector.broadcast %201 : vector<1x128xf32> to vector<40x128xf32>
    %203 = arith.addf %199, %202 : vector<40x128xf32>
    %cst_198 = arith.constant 0.000000e+00 : f32
    %204 = vector.broadcast %cst_198 : f32 to vector<40x128xf32>
    %205 = arith.maximumf %203, %204 : vector<40x128xf32>
    %206 = arith.truncf %205 : vector<40x128xf32> to vector<40x128xbf16>
    %c9_199 = arith.constant 9 : index
    %c1_200 = arith.constant 1 : index
    %c0_201 = arith.constant 0 : index
    %c0_202 = arith.constant 0 : index
    %207 = vector.load %arg2[%c9_199, %c1_200, %c0_201, %c0_202] : memref<13x3x128x128xbf16, #tpu.memory_space<vmem>>, vector<1x1x128x128xbf16>
    %208 = vector.shape_cast %207 : vector<1x1x128x128xbf16> to vector<128x128xbf16>
    %cst_203 = arith.constant dense<0.000000e+00> : vector<40x128xf32>
    %209 = tpu.matmul %206, %208, %cst_203 {dimension_numbers = #tpu.dot_dimension_numbers<[1], [0], [0], [1], [0, 0, 1, 1], [], []>} : vector<40x128xbf16>, vector<128x128xbf16>, vector<40x128xf32> -> vector<40x128xf32>
    %c9_204 = arith.constant 9 : index
    %c0_205 = arith.constant 0 : index
    %c0_206 = arith.constant 0 : index
    %210 = vector.load %arg3[%c9_204, %c0_205, %c0_206] : memref<13x1x128xf32, #tpu.memory_space<vmem>>, vector<1x1x128xf32>
    %211 = vector.shape_cast %210 : vector<1x1x128xf32> to vector<1x128xf32>
    %212 = vector.broadcast %211 : vector<1x128xf32> to vector<40x128xf32>
    %213 = arith.addf %209, %212 : vector<40x128xf32>
    %c8_207 = arith.constant 8 : index
    %c0_208 = arith.constant 0 : index
    %214 = vector.load %arg5[%c8_207, %c0_208] : memref<88x128xf32, #tpu.memory_space<vmem>>, vector<40x128xf32>
    %215 = arith.addf %213, %214 : vector<40x128xf32>
    %c8_209 = arith.constant 8 : index
    %c0_210 = arith.constant 0 : index
    %216 = vector.load %arg5[%c8_209, %c0_210] : memref<88x128xf32, #tpu.memory_space<vmem>>, vector<40x128xf32>
    tpu.vector_store %arg5[%c8_209, %c0_210], %215 {strides = array<i32>} : memref<88x128xf32, #tpu.memory_space<vmem>>, vector<40x128xf32>,
    %c24_211 = arith.constant 24 : index
    %c0_212 = arith.constant 0 : index
    %217 = vector.load %arg5[%c24_211, %c0_212] : memref<88x128xf32, #tpu.memory_space<vmem>>, vector<8x128xf32>
    tpu.vector_store %arg5[%c24_211, %c0_212], %0 {strides = array<i32>} : memref<88x128xf32, #tpu.memory_space<vmem>>, vector<8x128xf32>,
    %c48_213 = arith.constant 48 : index
    %c0_214 = arith.constant 0 : index
    %218 = vector.load %arg5[%c48_213, %c0_214] : memref<88x128xf32, #tpu.memory_space<vmem>>, vector<8x128xf32>
    tpu.vector_store %arg5[%c48_213, %c0_214], %0 {strides = array<i32>} : memref<88x128xf32, #tpu.memory_space<vmem>>, vector<8x128xf32>,
    %c7_215 = arith.constant 7 : index
    %c0_216 = arith.constant 0 : index
    %219 = vector.load %arg5[%c7_215, %c0_216] : memref<88x128xf32, #tpu.memory_space<vmem>>, vector<42x128xf32>
    %220 = arith.truncf %219 : vector<42x128xf32> to vector<42x128xbf16>
    %221 = vector.extract_strided_slice %220 {offsets = [0, 0], sizes = [40, 128], strides = [1, 1]} : vector<42x128xbf16> to vector<40x128xbf16>
    %222 = vector.extract_strided_slice %220 {offsets = [1, 0], sizes = [40, 128], strides = [1, 1]} : vector<42x128xbf16> to vector<40x128xbf16>
    %223 = vector.extract_strided_slice %220 {offsets = [2, 0], sizes = [40, 128], strides = [1, 1]} : vector<42x128xbf16> to vector<40x128xbf16>
    %c10 = arith.constant 10 : index
    %c0_217 = arith.constant 0 : index
    %c0_218 = arith.constant 0 : index
    %c0_219 = arith.constant 0 : index
    %224 = vector.load %arg2[%c10, %c0_217, %c0_218, %c0_219] : memref<13x3x128x128xbf16, #tpu.memory_space<vmem>>, vector<1x1x128x128xbf16>
    %225 = vector.shape_cast %224 : vector<1x1x128x128xbf16> to vector<128x128xbf16>
    %c10_220 = arith.constant 10 : index
    %c1_221 = arith.constant 1 : index
    %c0_222 = arith.constant 0 : index
    %c0_223 = arith.constant 0 : index
    %226 = vector.load %arg2[%c10_220, %c1_221, %c0_222, %c0_223] : memref<13x3x128x128xbf16, #tpu.memory_space<vmem>>, vector<1x1x128x128xbf16>
    %227 = vector.shape_cast %226 : vector<1x1x128x128xbf16> to vector<128x128xbf16>
    %c10_224 = arith.constant 10 : index
    %c2_225 = arith.constant 2 : index
    %c0_226 = arith.constant 0 : index
    %c0_227 = arith.constant 0 : index
    %228 = vector.load %arg2[%c10_224, %c2_225, %c0_226, %c0_227] : memref<13x3x128x128xbf16, #tpu.memory_space<vmem>>, vector<1x1x128x128xbf16>
    %229 = vector.shape_cast %228 : vector<1x1x128x128xbf16> to vector<128x128xbf16>
    %c10_228 = arith.constant 10 : index
    %c0_229 = arith.constant 0 : index
    %c0_230 = arith.constant 0 : index
    %230 = vector.load %arg3[%c10_228, %c0_229, %c0_230] : memref<13x1x128xf32, #tpu.memory_space<vmem>>, vector<1x1x128xf32>
    %231 = vector.shape_cast %230 : vector<1x1x128xf32> to vector<1x128xf32>
    %cst_231 = arith.constant dense<0.000000e+00> : vector<40x128xf32>
    %232 = tpu.matmul %221, %225, %cst_231 {dimension_numbers = #tpu.dot_dimension_numbers<[1], [0], [0], [1], [0, 0, 1, 1], [], []>} : vector<40x128xbf16>, vector<128x128xbf16>, vector<40x128xf32> -> vector<40x128xf32>
    %233 = arith.addf %227, %229 : vector<128x128xbf16>
    %cst_232 = arith.constant dense<0.000000e+00> : vector<40x128xf32>
    %234 = tpu.matmul %222, %233, %cst_232 {dimension_numbers = #tpu.dot_dimension_numbers<[1], [0], [0], [1], [0, 0, 1, 1], [], []>} : vector<40x128xbf16>, vector<128x128xbf16>, vector<40x128xf32> -> vector<40x128xf32>
    %235 = arith.addf %232, %234 : vector<40x128xf32>
    %236 = vector.broadcast %231 : vector<1x128xf32> to vector<40x128xf32>
    %237 = arith.addf %235, %236 : vector<40x128xf32>
    %238 = arith.addf %225, %227 : vector<128x128xbf16>
    %cst_233 = arith.constant dense<0.000000e+00> : vector<40x128xf32>
    %239 = tpu.matmul %222, %238, %cst_233 {dimension_numbers = #tpu.dot_dimension_numbers<[1], [0], [0], [1], [0, 0, 1, 1], [], []>} : vector<40x128xbf16>, vector<128x128xbf16>, vector<40x128xf32> -> vector<40x128xf32>
    %cst_234 = arith.constant dense<0.000000e+00> : vector<40x128xf32>
    %240 = tpu.matmul %223, %229, %cst_234 {dimension_numbers = #tpu.dot_dimension_numbers<[1], [0], [0], [1], [0, 0, 1, 1], [], []>} : vector<40x128xbf16>, vector<128x128xbf16>, vector<40x128xf32> -> vector<40x128xf32>
    %241 = arith.addf %239, %240 : vector<40x128xf32>
    %242 = vector.broadcast %231 : vector<1x128xf32> to vector<40x128xf32>
    %243 = arith.addf %241, %242 : vector<40x128xf32>
    %244 = vector.extract_strided_slice %237 {offsets = [0, 0], sizes = [16, 128], strides = [1, 1]} : vector<40x128xf32> to vector<16x128xf32>
    %245 = vector.extract_strided_slice %243 {offsets = [0, 0], sizes = [16, 128], strides = [1, 1]} : vector<40x128xf32> to vector<16x128xf32>
    %c8_235 = arith.constant 8 : index
    %c0_236 = arith.constant 0 : index
    %246 = tpu.strided_load %arg6[%c8_235, %c0_236] {strides = array<i32: 2, 1>} : memref<88x128xf32, #tpu.memory_space<vmem>>, vector<16x128xf32>
    tpu.strided_store %arg6[%c8_235, %c0_236], %244 {strides = array<i32: 2, 1>} : memref<88x128xf32, #tpu.memory_space<vmem>>, vector<16x128xf32>
    %c9_237 = arith.constant 9 : index
    %c0_238 = arith.constant 0 : index
    %247 = tpu.strided_load %arg6[%c9_237, %c0_238] {strides = array<i32: 2, 1>} : memref<88x128xf32, #tpu.memory_space<vmem>>, vector<16x128xf32>
    tpu.strided_store %arg6[%c9_237, %c0_238], %245 {strides = array<i32: 2, 1>} : memref<88x128xf32, #tpu.memory_space<vmem>>, vector<16x128xf32>
    %248 = vector.extract_strided_slice %237 {offsets = [24, 0], sizes = [16, 128], strides = [1, 1]} : vector<40x128xf32> to vector<16x128xf32>
    %249 = vector.extract_strided_slice %243 {offsets = [24, 0], sizes = [16, 128], strides = [1, 1]} : vector<40x128xf32> to vector<16x128xf32>
    %c48_239 = arith.constant 48 : index
    %c0_240 = arith.constant 0 : index
    %250 = tpu.strided_load %arg6[%c48_239, %c0_240] {strides = array<i32: 2, 1>} : memref<88x128xf32, #tpu.memory_space<vmem>>, vector<16x128xf32>
    tpu.strided_store %arg6[%c48_239, %c0_240], %248 {strides = array<i32: 2, 1>} : memref<88x128xf32, #tpu.memory_space<vmem>>, vector<16x128xf32>
    %c49 = arith.constant 49 : index
    %c0_241 = arith.constant 0 : index
    %251 = tpu.strided_load %arg6[%c49, %c0_241] {strides = array<i32: 2, 1>} : memref<88x128xf32, #tpu.memory_space<vmem>>, vector<16x128xf32>
    tpu.strided_store %arg6[%c49, %c0_241], %249 {strides = array<i32: 2, 1>} : memref<88x128xf32, #tpu.memory_space<vmem>>, vector<16x128xf32>
    %c40 = arith.constant 40 : index
    %c0_242 = arith.constant 0 : index
    %252 = vector.load %arg6[%c40, %c0_242] : memref<88x128xf32, #tpu.memory_space<vmem>>, vector<8x128xf32>
    tpu.vector_store %arg6[%c40, %c0_242], %0 {strides = array<i32>} : memref<88x128xf32, #tpu.memory_space<vmem>>, vector<8x128xf32>,
    %c80 = arith.constant 80 : index
    %c0_243 = arith.constant 0 : index
    %253 = vector.load %arg6[%c80, %c0_243] : memref<88x128xf32, #tpu.memory_space<vmem>>, vector<8x128xf32>
    tpu.vector_store %arg6[%c80, %c0_243], %0 {strides = array<i32>} : memref<88x128xf32, #tpu.memory_space<vmem>>, vector<8x128xf32>,
    %c7_244 = arith.constant 7 : index
    %c0_245 = arith.constant 0 : index
    %254 = vector.load %arg6[%c7_244, %c0_245] : memref<88x128xf32, #tpu.memory_space<vmem>>, vector<74x128xf32>
    %255 = arith.truncf %254 : vector<74x128xf32> to vector<74x128xbf16>
    %256 = vector.extract_strided_slice %255 {offsets = [0, 0], sizes = [72, 128], strides = [1, 1]} : vector<74x128xbf16> to vector<72x128xbf16>
    %c11 = arith.constant 11 : index
    %c0_246 = arith.constant 0 : index
    %c0_247 = arith.constant 0 : index
    %c0_248 = arith.constant 0 : index
    %257 = vector.load %arg2[%c11, %c0_246, %c0_247, %c0_248] : memref<13x3x128x128xbf16, #tpu.memory_space<vmem>>, vector<1x1x128x128xbf16>
    %258 = vector.shape_cast %257 : vector<1x1x128x128xbf16> to vector<128x128xbf16>
    %cst_249 = arith.constant dense<0.000000e+00> : vector<72x128xf32>
    %259 = tpu.matmul %256, %258, %cst_249 {dimension_numbers = #tpu.dot_dimension_numbers<[1], [0], [0], [1], [0, 0, 1, 1], [], []>} : vector<72x128xbf16>, vector<128x128xbf16>, vector<72x128xf32> -> vector<72x128xf32>
    %260 = vector.extract_strided_slice %255 {offsets = [1, 0], sizes = [72, 128], strides = [1, 1]} : vector<74x128xbf16> to vector<72x128xbf16>
    %c11_250 = arith.constant 11 : index
    %c1_251 = arith.constant 1 : index
    %c0_252 = arith.constant 0 : index
    %c0_253 = arith.constant 0 : index
    %261 = vector.load %arg2[%c11_250, %c1_251, %c0_252, %c0_253] : memref<13x3x128x128xbf16, #tpu.memory_space<vmem>>, vector<1x1x128x128xbf16>
    %262 = vector.shape_cast %261 : vector<1x1x128x128xbf16> to vector<128x128xbf16>
    %cst_254 = arith.constant dense<0.000000e+00> : vector<72x128xf32>
    %263 = tpu.matmul %260, %262, %cst_254 {dimension_numbers = #tpu.dot_dimension_numbers<[1], [0], [0], [1], [0, 0, 1, 1], [], []>} : vector<72x128xbf16>, vector<128x128xbf16>, vector<72x128xf32> -> vector<72x128xf32>
    %264 = arith.addf %259, %263 : vector<72x128xf32>
    %265 = vector.extract_strided_slice %255 {offsets = [2, 0], sizes = [72, 128], strides = [1, 1]} : vector<74x128xbf16> to vector<72x128xbf16>
    %c11_255 = arith.constant 11 : index
    %c2_256 = arith.constant 2 : index
    %c0_257 = arith.constant 0 : index
    %c0_258 = arith.constant 0 : index
    %266 = vector.load %arg2[%c11_255, %c2_256, %c0_257, %c0_258] : memref<13x3x128x128xbf16, #tpu.memory_space<vmem>>, vector<1x1x128x128xbf16>
    %267 = vector.shape_cast %266 : vector<1x1x128x128xbf16> to vector<128x128xbf16>
    %cst_259 = arith.constant dense<0.000000e+00> : vector<72x128xf32>
    %268 = tpu.matmul %265, %267, %cst_259 {dimension_numbers = #tpu.dot_dimension_numbers<[1], [0], [0], [1], [0, 0, 1, 1], [], []>} : vector<72x128xbf16>, vector<128x128xbf16>, vector<72x128xf32> -> vector<72x128xf32>
    %269 = arith.addf %264, %268 : vector<72x128xf32>
    %c11_260 = arith.constant 11 : index
    %c0_261 = arith.constant 0 : index
    %c0_262 = arith.constant 0 : index
    %270 = vector.load %arg3[%c11_260, %c0_261, %c0_262] : memref<13x1x128xf32, #tpu.memory_space<vmem>>, vector<1x1x128xf32>
    %271 = vector.shape_cast %270 : vector<1x1x128xf32> to vector<1x128xf32>
    %272 = vector.broadcast %271 : vector<1x128xf32> to vector<72x128xf32>
    %273 = arith.addf %269, %272 : vector<72x128xf32>
    %cst_263 = arith.constant 0.000000e+00 : f32
    %274 = vector.broadcast %cst_263 : f32 to vector<72x128xf32>
    %275 = arith.maximumf %273, %274 : vector<72x128xf32>
    %c8_264 = arith.constant 8 : index
    %c0_265 = arith.constant 0 : index
    %276 = vector.load %arg5[%c8_264, %c0_265] : memref<88x128xf32, #tpu.memory_space<vmem>>, vector<72x128xf32>
    tpu.vector_store %arg5[%c8_264, %c0_265], %275 {strides = array<i32>} : memref<88x128xf32, #tpu.memory_space<vmem>>, vector<72x128xf32>,
    %c40_266 = arith.constant 40 : index
    %c0_267 = arith.constant 0 : index
    %277 = vector.load %arg5[%c40_266, %c0_267] : memref<88x128xf32, #tpu.memory_space<vmem>>, vector<8x128xf32>
    tpu.vector_store %arg5[%c40_266, %c0_267], %0 {strides = array<i32>} : memref<88x128xf32, #tpu.memory_space<vmem>>, vector<8x128xf32>,
    %c80_268 = arith.constant 80 : index
    %c0_269 = arith.constant 0 : index
    %278 = vector.load %arg5[%c80_268, %c0_269] : memref<88x128xf32, #tpu.memory_space<vmem>>, vector<8x128xf32>
    tpu.vector_store %arg5[%c80_268, %c0_269], %0 {strides = array<i32>} : memref<88x128xf32, #tpu.memory_space<vmem>>, vector<8x128xf32>,
    %c7_270 = arith.constant 7 : index
    %c0_271 = arith.constant 0 : index
    %279 = vector.load %arg5[%c7_270, %c0_271] : memref<88x128xf32, #tpu.memory_space<vmem>>, vector<74x128xf32>
    %280 = arith.truncf %279 : vector<74x128xf32> to vector<74x128xbf16>
    %281 = vector.extract_strided_slice %280 {offsets = [0, 0], sizes = [72, 128], strides = [1, 1]} : vector<74x128xbf16> to vector<72x128xbf16>
    %c12 = arith.constant 12 : index
    %c0_272 = arith.constant 0 : index
    %c0_273 = arith.constant 0 : index
    %c0_274 = arith.constant 0 : index
    %282 = vector.load %arg2[%c12, %c0_272, %c0_273, %c0_274] : memref<13x3x128x128xbf16, #tpu.memory_space<vmem>>, vector<1x1x128x128xbf16>
    %283 = vector.shape_cast %282 : vector<1x1x128x128xbf16> to vector<128x128xbf16>
    %cst_275 = arith.constant dense<0.000000e+00> : vector<72x128xf32>
    %284 = tpu.matmul %281, %283, %cst_275 {dimension_numbers = #tpu.dot_dimension_numbers<[1], [0], [0], [1], [0, 0, 1, 1], [], []>} : vector<72x128xbf16>, vector<128x128xbf16>, vector<72x128xf32> -> vector<72x128xf32>
    %285 = vector.extract_strided_slice %280 {offsets = [1, 0], sizes = [72, 128], strides = [1, 1]} : vector<74x128xbf16> to vector<72x128xbf16>
    %c12_276 = arith.constant 12 : index
    %c1_277 = arith.constant 1 : index
    %c0_278 = arith.constant 0 : index
    %c0_279 = arith.constant 0 : index
    %286 = vector.load %arg2[%c12_276, %c1_277, %c0_278, %c0_279] : memref<13x3x128x128xbf16, #tpu.memory_space<vmem>>, vector<1x1x128x128xbf16>
    %287 = vector.shape_cast %286 : vector<1x1x128x128xbf16> to vector<128x128xbf16>
    %cst_280 = arith.constant dense<0.000000e+00> : vector<72x128xf32>
    %288 = tpu.matmul %285, %287, %cst_280 {dimension_numbers = #tpu.dot_dimension_numbers<[1], [0], [0], [1], [0, 0, 1, 1], [], []>} : vector<72x128xbf16>, vector<128x128xbf16>, vector<72x128xf32> -> vector<72x128xf32>
    %289 = arith.addf %284, %288 : vector<72x128xf32>
    %290 = vector.extract_strided_slice %280 {offsets = [2, 0], sizes = [72, 128], strides = [1, 1]} : vector<74x128xbf16> to vector<72x128xbf16>
    %c12_281 = arith.constant 12 : index
    %c2_282 = arith.constant 2 : index
    %c0_283 = arith.constant 0 : index
    %c0_284 = arith.constant 0 : index
    %291 = vector.load %arg2[%c12_281, %c2_282, %c0_283, %c0_284] : memref<13x3x128x128xbf16, #tpu.memory_space<vmem>>, vector<1x1x128x128xbf16>
    %292 = vector.shape_cast %291 : vector<1x1x128x128xbf16> to vector<128x128xbf16>
    %cst_285 = arith.constant dense<0.000000e+00> : vector<72x128xf32>
    %293 = tpu.matmul %290, %292, %cst_285 {dimension_numbers = #tpu.dot_dimension_numbers<[1], [0], [0], [1], [0, 0, 1, 1], [], []>} : vector<72x128xbf16>, vector<128x128xbf16>, vector<72x128xf32> -> vector<72x128xf32>
    %294 = arith.addf %289, %293 : vector<72x128xf32>
    %c12_286 = arith.constant 12 : index
    %c0_287 = arith.constant 0 : index
    %c0_288 = arith.constant 0 : index
    %295 = vector.load %arg3[%c12_286, %c0_287, %c0_288] : memref<13x1x128xf32, #tpu.memory_space<vmem>>, vector<1x1x128xf32>
    %296 = vector.shape_cast %295 : vector<1x1x128xf32> to vector<1x128xf32>
    %297 = vector.broadcast %296 : vector<1x128xf32> to vector<72x128xf32>
    %298 = arith.addf %294, %297 : vector<72x128xf32>
    %299 = vector.extract_strided_slice %298 {offsets = [0, 0], sizes = [32, 128], strides = [1, 1]} : vector<72x128xf32> to vector<32x128xf32>
    %c0_289 = arith.constant 0 : index
    %c0_290 = arith.constant 0 : index
    %c0_291 = arith.constant 0 : index
    %300 = vector.load %arg4[%c0_289, %c0_290, %c0_291] : memref<2x32x128xf32, #tpu.memory_space<vmem>>, vector<1x32x128xf32>
    %301 = vector.shape_cast %300 : vector<1x32x128xf32> to vector<32x128xf32>
    %302 = vector.shape_cast %299 : vector<32x128xf32> to vector<1x32x128xf32>
    tpu.vector_store %arg4[%c0_289, %c0_290, %c0_291], %302 {strides = array<i32>} : memref<2x32x128xf32, #tpu.memory_space<vmem>>, vector<1x32x128xf32>,
    %303 = vector.extract_strided_slice %298 {offsets = [40, 0], sizes = [32, 128], strides = [1, 1]} : vector<72x128xf32> to vector<32x128xf32>
    %c1_292 = arith.constant 1 : index
    %c0_293 = arith.constant 0 : index
    %c0_294 = arith.constant 0 : index
    %304 = vector.load %arg4[%c1_292, %c0_293, %c0_294] : memref<2x32x128xf32, #tpu.memory_space<vmem>>, vector<1x32x128xf32>
    %305 = vector.shape_cast %304 : vector<1x32x128xf32> to vector<32x128xf32>
    %306 = vector.shape_cast %303 : vector<32x128xf32> to vector<1x32x128xf32>
    tpu.vector_store %arg4[%c1_292, %c0_293, %c0_294], %306 {strides = array<i32>} : memref<2x32x128xf32, #tpu.memory_space<vmem>>, vector<1x32x128xf32>,
    return
  }
  func.func @transform_0(%arg0: i32) -> (i32, i32, i32) {
    %c0_i32 = arith.constant 0 : i32
    %c0_i32_0 = arith.constant 0 : i32
    %c0_i32_1 = arith.constant 0 : i32
    return %arg0, %c0_i32, %c0_i32_0 : i32, i32, i32
  }
  func.func @transform_1(%arg0: i32) -> (i32, i32, i32, i32) {
    %c0_i32 = arith.constant 0 : i32
    %c0_i32_0 = arith.constant 0 : i32
    %c0_i32_1 = arith.constant 0 : i32
    %c0_i32_2 = arith.constant 0 : i32
    %c0_i32_3 = arith.constant 0 : i32
    return %c0_i32, %c0_i32_0, %c0_i32_1, %c0_i32_2 : i32, i32, i32, i32
  }
  func.func @transform_2(%arg0: i32) -> (i32, i32, i32) {
    %c0_i32 = arith.constant 0 : i32
    %c0_i32_0 = arith.constant 0 : i32
    %c0_i32_1 = arith.constant 0 : i32
    %c0_i32_2 = arith.constant 0 : i32
    return %c0_i32, %c0_i32_0, %c0_i32_1 : i32, i32, i32
  }
  func.func @transform_3(%arg0: i32) -> (i32, i32, i32) {
    %c0_i32 = arith.constant 0 : i32
    %c0_i32_0 = arith.constant 0 : i32
    %c0_i32_1 = arith.constant 0 : i32
    return %arg0, %c0_i32, %c0_i32_0 : i32, i32, i32
  }
}

</mosaic_0001>

<bundles_post_ra>
// kernel: tpu_custom_call.1
= control target key start
LH: loop header
LB: loop body
LE: loop exit
PB: predicated region body
PF: predicated region fallthrough
CT: control target
= control target key end

     0   :  { %8 = vsyncpa [#allocation5], 0  ;;  %s8292_s0 = inlined_call_operand.hbm [shape: f32[4,8,128], index: 0, kind: input, shape index: {}]   ;;  %s8293_s1 = inlined_call_operand.hbm [shape: bf16[13,3,128,128], index: 1, kind: input, shape index: {}]   ;;  %s8294_s2 = inlined_call_operand.hbm [shape: f32[13,1,128], index: 2, kind: input, shape index: {}]   ;;  %s8295_s3 = inlined_call_operand.hbm [shape: f32[4,32,128], index: 3, kind: output, shape index: {}]  }
   0x1   :  { %10 = vsyncpa [#allocation5 + $0x1], 0 }
   0x2   :  { %11 = vsyncpa [#allocation8], 0 }
   0x3   :  { %12 = vsyncpa [#allocation6], 0 }
   0x4   :  { %14 = vsyncpa [#allocation6 + $0x1], 0  ;;  %s7168_s12 = smov 0   ;;  %s7170_s13 = smov 0  }
   0x5   :  { %s7172_s14 = smov 0   ;;  %s7174_s15 = smov 0  }
   0x6 LB: > { %s7189_s16 = sadd.s32 4294967295, %s7132_s15   ;;  %s5101_s17 = sadd.s32 4294967294, %s7132_s15   ;;  %s7132_s15 = sphi %s7174_s15, %s8315_s15   ;;  %s7128_s14 = sphi %s7172_s14, %s8314_s14   ;;  %s7124_s13 = sphi %s7170_s13, %s8313_s13   ;;  %s7120_s12 = sphi %s7168_s12, %s8312_s12  }
   0x7   : > { %p40_p0 = scmp.ne.s32.totalorder %s7124_s13, %s7120_s12  ;;  %p8296_p1 = scmp.eq.s32.totalorder %s7189_s16, 0 }
   0x8   : > { %p112_p3 = scmp.eq.s32.totalorder %s5101_s17, 1  ;;  %p5102_p5 = scmp.ge.s32.totalorder %s7132_s15, 1 }
   0x9   : > { %p7198_p4 = por %p8296_p1, %p40_p0  ;;  %p119_p7 = scmp.lt.s32.totalorder %s7132_s15, 3 }
   0xa   : > { %p7203_p6 = por %p112_p3, %p40_p0  ;;  %s7134_s21 = smov [#allocation7]  }
   0xb   : > { %s8299_s18 = scalar_select %p7198_p4, 1, 0 }
   0xc   : > { %s8300_s19 = scalar_select %p7203_p6, 1, 0 }
   0xd   : > { %p7208_p8 = pnand %p5102_p5, %p119_p7  ;;  %s131_s22 = sshll.u32 %s7134_s21, 4  ;;  %s7212_s22 = int_to_ptr.vmem [resolvable:$true] %s131_s22 }
   0xe   : > { %s7135_s24 = smov [#allocation9]   ;;  %s6976_s28 = scalar_lea.hbm %s8293_s1, 39936 }
   0xf   : > { %p6674_p9 = pneg %p7208_p8  ;;  %s144_s25 = sshll.u32 %s7135_s24, 4  ;;  %s7223_s25 = int_to_ptr.vmem [resolvable:$true] %s144_s25 }
  0x10   : > { %p6977_p12 = scmp.ne.s32.totalorder %s8293_s1, %s6976_s28  ;;  %p6983_p5 = scmp.lt.u32.totalorder %s6976_s28, %s8293_s1 }
  0x11   : > { %p7219_p11 = pnand %p6674_p9, %p8296_p1 }
  0x13   : > { %p6978_p13 = pneg %p7219_p11 }
  0x15   : > { %p6979_p0 = pnand %p6978_p13, %p6977_p12 }
  0x17   : > { %p6980_p3 = pneg %p6979_p0 }
  0x19   : > { %p6985_p7 = pnand %p6983_p5, %p6980_p3 }
  0x1b   : > { %6988 = shalt.err (!%p6985_p7)
}
  0x1c   : > { %s6989_s6 = scalar_lea.vmem %s7212_s22, 39936  ;;  %p6997_p2 = scmp.lt.s32.totalorder %s7212_s22, %s7212_s22 }
  0x1d   : > { %p6990_p9 = scmp.ne.s32.totalorder %s7212_s22, %s6989_s6  ;;  %p6998_p12 = scmp.lt.s32.totalorder %s6989_s6, %s6989_s6 }
  0x1f   : > { %p6992_p10 = pnand %p6990_p9, %p6978_p13  ;;  %p6999_p0 = por %p6998_p12, %p6997_p2 }
  0x21   : > { %p6993_p1 = pneg %p6992_p10 }
  0x23   : > { %p7000_p6 = pnand %p6999_p0, %p6993_p1 }
  0x25   : > { %7003 = shalt.err (!%p7000_p6)
}
  0x26   : > { %s7136_s7 = smov 64   ;;  %s7137_s8 = smov 4  }
  0x27   : > { %6677 = dma.hbm_to_vmem [thread:$0]  (!%p7219_p11), %s8293_s1, 39936, %s7212_s22, [#allocation8], %s7136_s7, %s7136_s7, %s7137_s8  }
  0x28   : > { %s7004_s21 = scalar_lea.hbm %s8294_s2, 208 }
  0x29   : > { %p7005_p2 = scmp.ne.s32.totalorder %s8294_s2, %s7004_s21  ;;  %p7011_p10 = scmp.lt.u32.totalorder %s7004_s21, %s8294_s2 }
  0x2b   : > { %p7007_p1 = pnand %p7005_p2, %p6978_p13 }
  0x2d   : > { %p7008_p6 = pneg %p7007_p1 }
  0x2f   : > { %p7013_p3 = pnand %p7011_p10, %p7008_p6 }
  0x31   : > { %7016 = shalt.err (!%p7013_p3)
}
  0x32   : > { %s7017_s22 = scalar_lea.vmem %s7223_s25, 208  ;;  %s7024_s29 = scalar_lea.vmem %s7223_s25, 224 }
  0x33   : > { %p7018_p5 = scmp.ne.s32.totalorder %s7223_s25, %s7017_s22  ;;  %p7025_p12 = scmp.lt.s32.totalorder %s7223_s25, %s7223_s25 }
  0x34   : > { %p7026_p0 = scmp.lt.s32.totalorder %s7024_s29, %s7017_s22 }
  0x35   : > { %p7020_p7 = pnand %p7018_p5, %p6978_p13 }
  0x36   : > { %p7027_p2 = por %p7026_p0, %p7025_p12 }
  0x37   : > { %p7021_p9 = pneg %p7020_p7 }
  0x39   : > { %p7028_p1 = pnand %p7027_p2, %p7021_p9 }
  0x3b   : > { %7031 = shalt.err (!%p7028_p1)
}
  0x3c   : > { %s7138_s30 = smov 16   ;;  %s7139_s4 = smov 1  }
  0x3d   : > { %6680 = dma.hbm_to_vmem [thread:$0]  (!%p7219_p11), %s8294_s2, 208, %s7223_s25, [#allocation8], %s7138_s30, %s7138_s30, %s7139_s4  }
  0x3e   : > { %s7279_s7 = sadd.s32 1, %s7132_s15   ;;  %s27_s9 = sadd.s32 1, %s7128_s14 }
  0x3f   : > { %s24_s8 = ssub.s32 %s7132_s15, %s7279_s7  ;;  %p34_p6 = scmp.ne.s32.totalorder %s7128_s14, %s7124_s13 }
  0x40   : > { %p25_p13 = scmp.eq.s32.totalorder %s24_s8, 0  ;;  %p35_p10 = scmp.eq.s32.totalorder %s7132_s15, 0 }
  0x41   : > { %p8303_p5 = scmp.eq.s32.totalorder %s7189_s16, 1  ;;  %p6691_p9 = scmp.lt.s32.totalorder %s7132_s15, 2 }
  0x42   : > { %s7288_s10 = scalar_select %p25_p13, %s7128_s14, %s27_s9  }
  0x43   : > { %p36_p3 = por %p35_p10, %p34_p6  ;;  %p7292_p7 = por %p8303_p5, %p34_p6 }
  0x44   : > { %s158_s23 = sand.u32 1, %s7128_s14   ;;  %s5402_s25 = sshll.u32 %s7132_s15, 8 }
  0x45   : > { %s8304_s11 = scalar_select %p7292_p7, 1, 0 }
  0x46   : > { %s5106_s17 = sshll.u32 %s158_s23, 4  ;;  %s7302_s26 = scalar_lea.hbm %s8292_s0, %s5402_s25 }
  0x47   : > { %s162_s27 = scalar_lea.vmem [#allocation4], %s5106_s17  ;;  %p7306_p11 = pnand %p6691_p9, %p36_p3 }
  0x48   : > { %s169_s28 = sshll.u32 %s162_s27, 4  ;;  %s7310_s29 = scalar_lea.sflag [#allocation5], %s158_s23  ;;  %s7304_s28 = int_to_ptr.vmem [resolvable:$true] %s169_s28 }
  0x49   : > { %s7032_s30 = scalar_lea.hbm %s7302_s26, 256  ;;  %p7034_p0 = pneg %p7306_p11 }
  0x4a   : > { %p7033_p12 = scmp.ne.s32.totalorder %s7302_s26, %s7032_s30  ;;  %s7037_s6 = scalar_lea.hbm %s8292_s0, 512 }
  0x4b   : > { %p7038_p13 = scmp.lt.u32.totalorder %s7302_s26, %s8292_s0  ;;  %p7039_p6 = scmp.lt.u32.totalorder %s7037_s6, %s7032_s30 }
  0x4c   : > { %p7035_p2 = pnand %p7034_p0, %p7033_p12  ;;  %p7041_p3 = scmp.lt.u32.totalorder %s7032_s30, %s7302_s26 }
  0x4d   : > { %p7040_p10 = por %p7039_p6, %p7038_p13 }
  0x4e   : > { %p7036_p1 = pneg %p7035_p2 }
  0x4f   : > { %p7042_p5 = por %p7041_p3, %p7040_p10 }
  0x51   : > { %p7043_p9 = pnand %p7042_p5, %p7036_p1 }
  0x53   : > { %7046 = shalt.err (!%p7043_p9)
}
  0x54   : > { %s7047_s23 = scalar_lea.vmem %s7304_s28, 256  ;;  %s7140_s17 = smov [#allocation4]  }
  0x55   : > { %p7048_p12 = scmp.ne.s32.totalorder %s7304_s28, %s7047_s23  ;;  %s7052_s25 = sshll.u32 %s7140_s17, 4  ;;  %s7053_s25 = int_to_ptr.vmem [resolvable:$false] %s7052_s25 }
  0x56   : > { %s7054_s21 = scalar_lea.vmem %s7053_s25, 512  ;;  %p7055_p4 = scmp.lt.s32.totalorder %s7304_s28, %s7053_s25 }
  0x57   : > { %p7050_p2 = pnand %p7048_p12, %p7034_p0  ;;  %p7056_p13 = scmp.lt.s32.totalorder %s7054_s21, %s7047_s23 }
  0x59   : > { %p7051_p7 = pneg %p7050_p2  ;;  %p7057_p6 = por %p7056_p13, %p7055_p4 }
  0x5b   : > { %p7058_p10 = pnand %p7057_p6, %p7051_p7 }
  0x5d   : > { %7061 = shalt.err (!%p7058_p10)
}
  0x5e   : > { %s7141_s24 = smov 128   ;;  %s7142_s27 = smov 8  }
  0x5f   : > { %6684 = dma.hbm_to_vmem [thread:$0]  (!%p7306_p11), %s7302_s26, 256, %s7304_s28, %s7310_s29, %s7141_s24, %s7141_s24, %s7142_s27  }
  0x60   : > { %181 = sbr.rel (%p7208_p8) target bundleno = 3493 (0xda5), region = 32  ;;  %s7341_s30 = sand.u32 (!%p7208_p8), 1, %s7124_s13  }
  0x61   : > { %s5110_s4 = sshll.u32 (!%p7208_p8), %s7341_s30, 4  ;;  %s184_s5 = scalar_lea.sflag (!%p7208_p8), [#allocation5], %s7341_s30 }
  0x62   : > { %s7345_s6 = scalar_lea.vmem (!%p7208_p8), [#allocation4], %s5110_s4  ;;  %p8306_p4 = scmp.ne.s32.totalorder (!%p7208_p8), %s8299_s18, 0 }
  0x67   : > { %7107 = dma.done.wait (%p8306_p4), %s184_s5, 256  }
  0x68   : > { %7109 = vsyncadd (%p8306_p4), %s184_s5, 4294967040  ;;  %p8307_p7 = scmp.eq.s32.totalorder %s7189_s16, 0 }
  0x6a   : > { %7111 = dma.done.wait (%p8307_p7), [#allocation8], 40144   ;;  %p8308_p8 = pmov %p8307_p7 }
  0x6b   : > { %v7143_v0 = vmov 0.0   ;;  %v6739_v1 = vld [vmem:[#allocation7 + $0x40] sm:$0xff]   ;;  %v6741_v3 = vld [vmem:[#allocation7 + $0x48] sm:$0xff]   ;;  %v6743_v5 = vld [vmem:[#allocation7 + $0x50] sm:$0xff]   ;;  %vm269_vm0 = vsmask.f32 7424 }
  0x6c   : > { %7113 = vsyncadd (%p8308_p8), [#allocation8], 4294927152  ;;  %221 = vst [vmem:[#allocation2] sm:$0xff] %v7143_v0  ;;  %v6740_v2 = vld [vmem:[#allocation7] sm:$0xff]   ;;  %5765 = vmatprep.subr.bf16.mxu0 %v6739_v1  ;;  %v6742_v4 = vld [vmem:[#allocation7 + $0x8] sm:$0xff]   ;;  %vm498_vm1 = vcmask 1046528  }
  0x6d   : > { %228 = vst [vmem:[#allocation2 + $0x10] sm:$0xff] %v7143_v0  ;;  %229 = vst [vmem:[#allocation2 + $0x20] sm:$0xff] %v7143_v0  ;;  %5785 = vmatprep.subr.bf16.mxu1 %v6740_v2  ;;  %5766 = vmatpush3.bf16.msra.mxu0 %v6739_v1  ;;  %v6744_v6 = vld [vmem:[#allocation7 + $0x10] sm:$0xff]   ;;  %v6745_v7 = vld [vmem:[#allocation7 + $0x58] sm:$0xff]   ;;  %vm665_vm2 = vsmask.f32 6400 }
  0x6e   : > { %222 = vst [vmem:[#allocation3] sm:$0xff] %v7143_v0  ;;  %620 = vst [vmem:[#allocation3 + $0x20] sm:$0xff] %v7143_v0  ;;  %5786 = vmatpush3.bf16.msra.mxu1 %v6740_v2  ;;  %5767 = vmatprep.subr.bf16.mxu0 %v6741_v3  ;;  %v6746_v8 = vld [vmem:[#allocation7 + $0x18] sm:$0xff]   ;;  %v6747_v9 = vld [vmem:[#allocation7 + $0x60] sm:$0xff]   ;;  %vm896_vm3 = vcmask 1044480   ;;  %vm7144_vm4 = vmmov 0  }
  0x6f   : > { %2187 = vst [vmem:[#allocation2 + $0x30] sm:$0xff] %v7143_v0  ;;  %3938 = vst [vmem:[#allocation3 + $0x28] sm:$0xff] %v7143_v0  ;;  %5787 = vmatprep.subr.bf16.mxu1 %v6742_v4  ;;  %v6748_v10 = vld [vmem:[#allocation7 + $0x20] sm:$0xff]   ;;  %v6749_v11 = vld [vmem:[#allocation7 + $0x68] sm:$0xff]   ;;  %s5113_s18 = sshll.u32 %s7341_s30, 6  ;;  %s5404_s28 = sshll.u32 %s7189_s16, 10 }
  0x70   : > { %3939 = vst [vmem:[#allocation3 + $0x50] sm:$0xff] %v7143_v0  ;;  %4474 = vst [vmem:[#allocation2 + $0x50] sm:$0xff] %v7143_v0  ;;  %v223_v12 = vld [vmem:[%s7345_s6] sm:$0xff]  ;;  %v5114_v13 = vld [vmem:[%s7345_s6 + $0x8] sm:$0xff]  ;;  %s8230_s20 = scalar_lea.vmem [#allocation10], %s5113_s18  ;;  %s8247_s8 = scalar_lea.hbm %s8295_s3, %s5404_s28 }
  0x71   : > { %619 = vst [vmem:[#allocation3 + $0x10] sm:$0xff] %v7143_v0  ;;  %5768 = vmatpush3.bf16.msra.mxu0 %v6741_v3  ;;  %v6750_v14 = vld [vmem:[#allocation7 + $0x28] sm:$0xff]   ;;  %224 = vst [vmem:[#allocation2 + $0x8] sm:$0xff] %v223_v12  ;;  %v6751_v15 = vld [vmem:[#allocation7 + $0x70] sm:$0xff]   ;;  %s5009_s26 = sshll.u32 %s8230_s20, 4  ;;  %s4995_s9 = scalar_lea.sflag [#allocation6], %s7341_s30  ;;  %s8241_s26 = int_to_ptr.vmem [resolvable:$true] %s5009_s26 }
  0x72   : > { %5788 = vmatpush3.bf16.msra.mxu1 %v6742_v4  ;;  %5769 = vmatprep.subr.bf16.mxu0 %v6743_v5  ;;  %227 = vst [vmem:[#allocation2 + $0x18] sm:$0xff] %v5114_v13  ;;  %v6752_v16 = vld [vmem:[#allocation7 + $0x30] sm:$0xff]   ;;  %v6753_v17 = vld [vmem:[#allocation7 + $0x78] sm:$0xff]   ;;  %v6755_v29 = vld [vmem:[#allocation7 + $0x80] sm:$0xff]   ;;  %s7062_s23 = scalar_lea.vmem %s8241_s26, 1024  ;;  %p8309_p0 = scmp.ne.s32.totalorder %s8304_s11, 0 }
  0x73   : > { %5789 = vmatprep.subr.bf16.mxu1 %v6744_v6  ;;  %v6754_v21 = vld [vmem:[#allocation7 + $0x38] sm:$0xff]   ;;  %v6756_v35 = vld [vmem:[#allocation7 + $0x88] sm:$0xff]   ;;  %v6757_v39 = vld [vmem:[#allocation7 + $0x90] sm:$0xff]   ;;  %p7063_p11 = scmp.ne.s32.totalorder %s8241_s26, %s7062_s23  ;;  %s7145_s16 = smov [#allocation10]  }
  0x74   : > { %v6758_v40 = vld [vmem:[#allocation7 + $0x98] sm:$0xff]   ;;  %v6759_v41 = vld [vmem:[#allocation7 + $0xa0] sm:$0xff]   ;;  %v6760_v42 = vld [vmem:[#allocation7 + $0xa8] sm:$0xff]   ;;  %s7066_s17 = sshll.u32 %s7145_s16, 4  ;;  %s7067_s17 = int_to_ptr.vmem [resolvable:$false] %s7066_s17 }
  0x75   : > { %5770 = vmatpush3.bf16.msra.mxu0 %v6743_v5  ;;  %v6761_v43 = vld [vmem:[#allocation7 + $0xb0] sm:$0xff]   ;;  %v6762_v44 = vld [vmem:[#allocation7 + $0xb8] sm:$0xff]   ;;  %v6763_v45 = vld [vmem:[#allocation7 + $0xc0] sm:$0xff]   ;;  %p7064_p1 = pnand %p7063_p11, %p8309_p0  ;;  %s7068_s25 = scalar_lea.vmem %s7067_s17, 2048 }
  0x76   : > { %5790 = vmatpush3.bf16.msra.mxu1 %v6744_v6  ;;  %5771 = vmatprep.subr.bf16.mxu0 %v6745_v7  ;;  %v6764_v46 = vld [vmem:[#allocation7 + $0xc8] sm:$0xff]   ;;  %v6765_v47 = vld [vmem:[#allocation7 + $0x100] sm:$0xff]   ;;  %v6766_v48 = vld [vmem:[#allocation7 + $0xd0] sm:$0xff]   ;;  %p7069_p5 = scmp.lt.s32.totalorder %s8241_s26, %s7067_s17  ;;  %p7070_p9 = scmp.lt.s32.totalorder %s7068_s25, %s7062_s23 }
  0x77   : > { %5791 = vmatprep.subr.bf16.mxu1 %v6746_v8  ;;  %v6767_v49 = vld [vmem:[#allocation7 + $0x108] sm:$0xff]   ;;  %v6768_v50 = vld [vmem:[#allocation7 + $0xd8] sm:$0xff]   ;;  %v6769_v51 = vld [vmem:[#allocation7 + $0x110] sm:$0xff]   ;;  %p7065_p3 = pneg %p7064_p1 }
  0x78   : > { %v230_v18 = vld [vmem:[#allocation2 + $0x7] sm:$0xff]  ;;  %v231_v19 = vld [vmem:[#allocation2 + $0xf] sm:$0xff]  ;;  %v6772_v54 = vld [vmem:[#allocation7 + $0xe8] sm:$0xff]   ;;  %p7071_p12 = por %p7070_p9, %p7069_p5 }
  0x79   : > { %5772 = vmatpush3.bf16.msra.mxu0 %v6745_v7  ;;  %v232_v20 = vld [vmem:[#allocation2 + $0x17] sm:$0xff]  ;;  %v233_v22 = vld [vmem:[#allocation2 + $0x1f] sm:$0x3]  ;;  %v234_v23 = vpack.c.bf16 %v231_v19, %v230_v18  ;;  %v6771_v53 = vld [vmem:[#allocation7 + $0x118] sm:$0xff]  }
  0x7a   : > { %5792 = vmatpush3.bf16.msra.mxu1 %v6746_v8  ;;  %5773 = vmatprep.subr.bf16.mxu0 %v6747_v9  ;;  %v235_v24 = vpack.c.bf16 %v233_v22, %v232_v20  ;;  %2186 = vst [vmem:[#allocation2 + $0x18] sm:$0xff] %v7143_v0  ;;  %v6770_v52 = vld [vmem:[#allocation7 + $0xe0] sm:$0xff]   ;;  %v6774_v56 = vld [vmem:[#allocation7 + $0xf0] sm:$0xff]   ;;  %v6775_v57 = vld [vmem:[#allocation7 + $0x128] sm:$0xff]   ;;  %p7072_p2 = pnand %p7071_p12, %p7065_p3 }
  0x7b   : > { %5793 = vmatprep.subr.bf16.mxu1 %v6748_v10  ;;  %v271_v25 = vshrl.u32 %v234_v23, 16  ;;  %v273_v26 = vshll.u32 %v234_v23, 16  ;;  %5801 = vmatprep.mubr.bf16.mxu1 %v234_v23  ;;  %v499_v30 = vrot.slane %v234_v23, 1  ;;  %v6773_v55 = vld [vmem:[#allocation7 + $0x120] sm:$0xff]   ;;  %v6776_v58 = vld [vmem:[#allocation7 + $0xf8] sm:$0xff]   ;;  %v6777_v59 = vld [vmem:[#allocation7 + $0x130] sm:$0xff]  }
  0x7c   : > { %v278_v27 = vshll.u32 %v235_v24, 16  ;;  %v282_v28 = vshrl.u32 %v235_v24, 16  ;;  %v500_v32 = vrot.slane %v235_v24, 1  ;;  %v6778_v60 = vld [vmem:[#allocation7 + $0x138] sm:$0xff]   ;;  %v6779_v61 = vld [vmem:[#allocation7 + $0x140] sm:$0xff]  }
  0x7d   : > { %5774 = vmatpush3.bf16.msra.mxu0 %v6747_v9  ;;  %v275_v31 = vrot.slane %v273_v26, 1  ;;  %v5139_v9 = vld [vmem:[#allocation9] ss:$0 sm:$0xff] }
  0x7e   : > { %5794 = vmatpush3.bf16.msra.mxu1 %v6748_v10  ;;  %5775 = vmatprep.subr.bf16.mxu0 %v6749_v11  ;;  %v280_v33 = vrot.slane %v278_v27, 1  ;;  %v501_v38 = vsel %vm498_vm1, %v499_v30, %v500_v32 }
  0x7f   : > { %5795 = vmatprep.subr.bf16.mxu1 %v6750_v14  ;;  %v276_v34 = vor.u32 %v275_v31, %v271_v25  ;;  %v7380_v25 = vld [vmem:[#allocation2] sm:$0xff] }
  0x80   : > { %v284_v36 = vor.u32 %v282_v28, %v280_v33 }
  0x81   : > { %5776 = vmatpush3.bf16.msra.mxu0 %v6749_v11  ;;  %v281_v37 = vsel %vm269_vm0, %v276_v34, %v280_v33 }
  0x82   : > { %5796 = vmatpush3.bf16.msra.mxu1 %v6750_v14  ;;  %5777 = vmatprep.subr.bf16.mxu0 %v6751_v15 }
  0x83   : > { %5797 = vmatprep.subr.bf16.mxu1 %v6752_v16  ;;  %5781 = vmatprep.mubr.bf16.mxu0 %v281_v37 }
  0x85   : > { %5778 = vmatpush3.bf16.msra.mxu0 %v6751_v15 }
  0x86   : > { %5798 = vmatpush3.bf16.msra.mxu1 %v6752_v16  ;;  %5779 = vmatprep.subr.bf16.mxu0 %v6753_v17 }
  0x87   : > { %5799 = vmatprep.subr.bf16.mxu1 %v6754_v21 }
  0x89   : > { %5780 = vmatpush3.bf16.msra.mxu0 %v6753_v17 }
  0x8a   : > { %5800 = vmatpush3.bf16.msra.mxu1 %v6754_v21  ;;  %5805 = vmatprep.subr.bf16.mxu0 %v6755_v29 }
  0x8b   : > { %5825 = vmatprep.subr.bf16.mxu1 %v6765_v47 }
  0x8c   : > { %5782 = vmatmul.mubr.bf16.vlgmr.msra.gmra.mrb[0].mxu0 %v284_v36 }
  0x8d   : > { %5802 = vmatmul.mubr.bf16.vlgmr.msra.gmra.mrb[0].mxu1 %v235_v24  ;;  %5806 = vmatpush3.bf16.msra.mxu0 %v6755_v29 }
  0x8e   : > { %5821 = vmatprep.mubr.bf16.mxu0 %v501_v38  ;;  %5807 = vmatprep.subr.bf16.mxu0 %v6756_v35 }
  0x8f   : > { %5826 = vmatpush3.bf16.msra.mxu1 %v6765_v47  ;;  %v6783_v47 = vld [vmem:[#allocation7 + $0x160] sm:$0xff]  }
  0x90   : > { %5827 = vmatprep.subr.bf16.mxu1 %v6767_v49 }
  0x91   : > { %5808 = vmatpush3.bf16.msra.mxu0 %v6756_v35 }
  0x92   : > { %5809 = vmatprep.subr.bf16.mxu0 %v6757_v39 }
  0x93   : > { %5828 = vmatpush3.bf16.msra.mxu1 %v6767_v49  ;;  %v6785_v49 = vld [vmem:[#allocation7 + $0x170] sm:$0xff]  }
  0x94   : > { %5829 = vmatprep.subr.bf16.mxu1 %v6769_v51 }
  0x95   : > { %5810 = vmatpush3.bf16.msra.mxu0 %v6757_v39 }
  0x96   : > { %5811 = vmatprep.subr.bf16.mxu0 %v6758_v40 }
  0x97   : > { %5830 = vmatpush3.bf16.msra.mxu1 %v6769_v51  ;;  %v6787_v51 = vld [vmem:[#allocation7 + $0x1c0] sm:$0xff]  }
  0x98   : > { %5831 = vmatprep.subr.bf16.mxu1 %v6771_v53 }
  0x99   : > { %5812 = vmatpush3.bf16.msra.mxu0 %v6758_v40 }
  0x9a   : > { %5813 = vmatprep.subr.bf16.mxu0 %v6759_v41 }
  0x9b   : > { %5832 = vmatpush3.bf16.msra.mxu1 %v6771_v53  ;;  %v6789_v53 = vld [vmem:[#allocation7 + $0x1d0] sm:$0xff]  }
  0x9c   : > { %5833 = vmatprep.subr.bf16.mxu1 %v6773_v55 }
  0x9d   : > { %5814 = vmatpush3.bf16.msra.mxu0 %v6759_v41 }
  0x9e   : > { %5815 = vmatprep.subr.bf16.mxu0 %v6760_v42 }
  0x9f   : > { %5834 = vmatpush3.bf16.msra.mxu1 %v6773_v55  ;;  %v6791_v55 = vld [vmem:[#allocation7 + $0x1e0] sm:$0xff]  }
  0xa0   : > { %5835 = vmatprep.subr.bf16.mxu1 %v6775_v57 }
  0xa1   : > { %5816 = vmatpush3.bf16.msra.mxu0 %v6760_v42 }
  0xa2   : > { %5817 = vmatprep.subr.bf16.mxu0 %v6761_v43 }
  0xa3   : > { %5836 = vmatpush3.bf16.msra.mxu1 %v6775_v57  ;;  %v6793_v57 = vld [vmem:[#allocation7 + $0x1f0] sm:$0xff]  }
  0xa4   : > { %5837 = vmatprep.subr.bf16.mxu1 %v6777_v59 }
  0xa5   : > { %5818 = vmatpush3.bf16.msra.mxu0 %v6761_v43  ;;  %v6780_v43 = vld [vmem:[#allocation7 + $0x148] sm:$0xff]  }
  0xa6   : > { %5819 = vmatprep.subr.bf16.mxu0 %v6762_v44 }
  0xa7   : > { %5838 = vmatpush3.bf16.msra.mxu1 %v6777_v59  ;;  %v6795_v59 = vld [vmem:[#allocation7 + $0x240] sm:$0xff]  }
  0xa8   : > { %5839 = vmatprep.subr.bf16.mxu1 %v6778_v60 }
  0xa9   : > { %5820 = vmatpush3.bf16.msra.mxu0 %v6762_v44 }
  0xaa   : > { %5845 = vmatprep.subr.bf16.mxu0 %v6763_v45 }
  0xab   : > { %5840 = vmatpush3.bf16.msra.mxu1 %v6778_v60  ;;  %v6797_v60 = vld [vmem:[#allocation7 + $0x280] sm:$0xff]  }
  0xac   : > { %5822 = vmatmul.mubr.bf16.vlgmr.msra.gmra.mrb[4].mxu0 %v500_v32  ;;  %5865 = vmatprep.subr.bf16.mxu1 %v6779_v61 }
  0xad   : > { %5846 = vmatpush3.bf16.msra.mxu0 %v6763_v45  ;;  %v6781_v45 = vld [vmem:[#allocation7 + $0x150] sm:$0xff]  }
  0xae   : > { %5847 = vmatprep.subr.bf16.mxu0 %v6764_v46 }
  0xb1   : > { %5848 = vmatpush3.bf16.msra.mxu0 %v6764_v46  ;;  %v6782_v46 = vld [vmem:[#allocation7 + $0x158] sm:$0xff]  }
  0xb2   : > { %5849 = vmatprep.subr.bf16.mxu0 %v6766_v48 }
  0xb5   : > { %5850 = vmatpush3.bf16.msra.mxu0 %v6766_v48  ;;  %v6784_v48 = vld [vmem:[#allocation7 + $0x168] sm:$0xff]  }
  0xb6   : > { %5851 = vmatprep.subr.bf16.mxu0 %v6768_v50 }
  0xb9   : > { %5852 = vmatpush3.bf16.msra.mxu0 %v6768_v50  ;;  %v6786_v50 = vld [vmem:[#allocation7 + $0x178] sm:$0xff]  }
  0xba   : > { %5853 = vmatprep.subr.bf16.mxu0 %v6770_v52 }
  0xbd   : > { %5854 = vmatpush3.bf16.msra.mxu0 %v6770_v52  ;;  %v6788_v52 = vld [vmem:[#allocation7 + $0x1c8] sm:$0xff]  }
  0xbe   : > { %5855 = vmatprep.subr.bf16.mxu0 %v6772_v54 }
  0xc1   : > { %5856 = vmatpush3.bf16.msra.mxu0 %v6772_v54  ;;  %v6790_v54 = vld [vmem:[#allocation7 + $0x1d8] sm:$0xff]  }
  0xc2   : > { %5857 = vmatprep.subr.bf16.mxu0 %v6774_v56 }
  0xc5   : > { %5858 = vmatpush3.bf16.msra.mxu0 %v6774_v56  ;;  %v6792_v56 = vld [vmem:[#allocation7 + $0x1e8] sm:$0xff]  }
  0xc6   : > { %5859 = vmatprep.subr.bf16.mxu0 %v6776_v58 }
  0xc9   : > { %5860 = vmatpush3.bf16.msra.mxu0 %v6776_v58  ;;  %v6794_v58 = vld [vmem:[#allocation7 + $0x1f8] sm:$0xff]  }
  0xca   : > { %5885 = vmatprep.subr.bf16.mxu0 %v6787_v51 }
 0x15f   : > { %v5783_v62 = vpop.f32.mrb[0].mxu0 }
 0x160   : > { %v5803_v63 = vpop.f32.mrb[0].mxu1  ;;  %v369_v1 = vpop.f32.mrb[1].mxu0 }
 0x161   : > { %v474_v0 = vadd.f32 %v5803_v63, %v5783_v62  ;;  %v465_v2 = vpop.f32.mrb[1].mxu1  ;;  %v5784_v4 = vpop.f32.mrb[2].mxu0 }
 0x162   : > { %v466_v3 = vadd.f32 %v465_v2, %v369_v1  ;;  %v5804_v5 = vpop.f32.mrb[2].mxu1  ;;  %v372_v6 = vpop.f32.mrb[3].mxu0 }
 0x163   : > { %v468_v7 = vpop.f32.mrb[3].mxu1 }
 0x17f   : > { %v5823_v8 = vpop.f32.mrb[4].mxu0 }
 0x180   : > { %v602_v10 = vadd.f32 %v5823_v8, %v474_v0  ;;  %v586_v11 = vpop.f32.mrb[5].mxu0 }
 0x181   : > { %v600_v12 = vadd.f32 %v586_v11, %v466_v3  ;;  %v5824_v13 = vpop.f32.mrb[6].mxu0 }
 0x182   : > { %v7370_v14 = vadd.f32 %v5139_v9, %v602_v10  ;;  %v589_v15 = vpop.f32.mrb[7].mxu0 }
 0x183   : > { %v7372_v16 = vadd.f32 %v5139_v9, %v600_v12  ;;  %v5164_v9 = vld [vmem:[#allocation9 + $0x1] ss:$0 sm:$0xff] }
 0x184   : > { %v615_v17 = vmax.f32 %v7370_v14, 0.0 }
 0x185   : > { %v613_v18 = vmax.f32 %v7372_v16, 0.0 }
 0x186   : > { %618 = vst [vmem:[#allocation3 + $0x18] sm:$0xff] %v615_v17 }
 0x187   : > { %616 = vst [vmem:[#allocation3 + $0x8] sm:$0xff] %v613_v18 }
 0x18d   : > { %v623_v19 = vld [vmem:[#allocation3 + $0x15] sm:$0xff]  ;;  %v624_v20 = vld [vmem:[#allocation3 + $0x1d] sm:$0x3f] }
 0x18e   : > { %v621_v21 = vld [vmem:[#allocation3 + $0x5] sm:$0xff]  ;;  %v622_v22 = vld [vmem:[#allocation3 + $0xd] sm:$0xff]  ;;  %v627_v23 = vmax.f32 %v623_v19, 0.0  ;;  %v628_v24 = vmax.f32 %v624_v20, 0.0  ;;  %1148 = vst [vmem:[#allocation3 + $0x20] sm:$0xff] %v7380_v25 }
 0x18f   : > { %v625_v26 = vmax.f32 %v621_v21, 0.0  ;;  %v626_v27 = vmax.f32 %v622_v22, 0.0  ;;  %1147 = vst [vmem:[#allocation3 + $0x10] sm:$0xff] %v7380_v25 }
 0x190   : > { %v630_v28 = vpack.c.bf16 %v628_v24, %v627_v23 }
 0x191   : > { %v629_v29 = vpack.c.bf16 %v626_v27, %v625_v26 }
 0x192   : > { %v675_v30 = vshrl.u32 %v630_v28, 16  ;;  %v678_v31 = vshll.u32 %v630_v28, 16  ;;  %v898_v41 = vrot.slane %v630_v28, 3 }
 0x193   : > { %5861 = vmatprep.mubr.bf16.mxu0 %v629_v29  ;;  %v667_v32 = vshrl.u32 %v629_v29, 16  ;;  %v670_v33 = vshll.u32 %v629_v29, 16  ;;  %v897_v40 = vrot.slane %v629_v29, 3  ;;  %v6796_v29 = vld [vmem:[#allocation7 + $0x248] sm:$0xff]  }
 0x194   : > { %5862 = vmatmul.mubr.bf16.vlgmr.msra.gmra.mrb[8].mxu0 %v630_v28  ;;  %v677_v34 = vrot.slane %v675_v30, 1  ;;  %v680_v35 = vrot.slane %v678_v31, 2  ;;  %v6798_v30 = vld [vmem:[#allocation7 + $0x250] sm:$0xff]   ;;  %v6799_v31 = vld [vmem:[#allocation7 + $0x288] sm:$0xff]  }
 0x195   : > { %v669_v36 = vrot.slane %v667_v32, 1  ;;  %v672_v37 = vrot.slane %v670_v33, 2  ;;  %v899_v44 = vsel %vm896_vm3, %v897_v40, %v898_v41  ;;  %5886 = vmatpush3.bf16.msra.mxu0 %v6787_v51  ;;  %v6800_v32 = vld [vmem:[#allocation7 + $0x258] sm:$0xff]   ;;  %v6801_v33 = vld [vmem:[#allocation7 + $0x290] sm:$0xff]  }
 0x196   : > { %v681_v38 = vor.u32 %v680_v35, %v677_v34  ;;  %5887 = vmatprep.subr.bf16.mxu0 %v6788_v52  ;;  %v6802_v34 = vld [vmem:[#allocation7 + $0x260] sm:$0xff]   ;;  %v6803_v35 = vld [vmem:[#allocation7 + $0x298] sm:$0xff]  }
 0x197   : > { %v673_v39 = vor.u32 %v672_v37, %v669_v36  ;;  %v6804_v36 = vld [vmem:[#allocation7 + $0x268] sm:$0xff]   ;;  %v6805_v37 = vld [vmem:[#allocation7 + $0x2a0] sm:$0xff]   ;;  %v6808_v40 = vld [vmem:[#allocation7 + $0x278] sm:$0xff]  }
 0x199   : > { %v682_v42 = vsel %vm665_vm2, %v673_v39, %v681_v38  ;;  %5888 = vmatpush3.bf16.msra.mxu0 %v6788_v52  ;;  %v6807_v39 = vld [vmem:[#allocation7 + $0x2a8] sm:$0xff]  }
 0x19a   : > { %5841 = vmatprep.mubr.bf16.mxu1 %v682_v42  ;;  %5889 = vmatprep.subr.bf16.mxu0 %v6789_v53  ;;  %v6810_v42 = vld [vmem:[#allocation7 + $0x2b8] sm:$0xff]  }
 0x19b   : > { %5842 = vmatmul.mubr.bf16.vlgmr.msra.gmra.mrb[4].mxu1 %v681_v38  ;;  %v6806_v38 = vld [vmem:[#allocation7 + $0x270] sm:$0xff]  }
 0x19c   : > { %5866 = vmatpush3.bf16.msra.mxu1 %v6779_v61  ;;  %5881 = vmatprep.mubr.bf16.mxu1 %v899_v44  ;;  %v5165_v44 = vld [vmem:[#allocation9 + $0x2] ss:$0 sm:$0xff] }
 0x19d   : > { %5867 = vmatprep.subr.bf16.mxu1 %v6780_v43  ;;  %5890 = vmatpush3.bf16.msra.mxu0 %v6789_v53 }
 0x19e   : > { %5891 = vmatprep.subr.bf16.mxu0 %v6790_v54 }
 0x1a0   : > { %5868 = vmatpush3.bf16.msra.mxu1 %v6780_v43  ;;  %v6811_v43 = vld [vmem:[#allocation7 + $0x2c0] sm:$0xff]  }
 0x1a1   : > { %5869 = vmatprep.subr.bf16.mxu1 %v6781_v45  ;;  %5892 = vmatpush3.bf16.msra.mxu0 %v6790_v54 }
 0x1a2   : > { %5893 = vmatprep.subr.bf16.mxu0 %v6791_v55 }
 0x1a4   : > { %5870 = vmatpush3.bf16.msra.mxu1 %v6781_v45 }
 0x1a5   : > { %5871 = vmatprep.subr.bf16.mxu1 %v6782_v46  ;;  %5894 = vmatpush3.bf16.msra.mxu0 %v6791_v55 }
 0x1a6   : > { %5895 = vmatprep.subr.bf16.mxu0 %v6792_v56 }
 0x1a8   : > { %5872 = vmatpush3.bf16.msra.mxu1 %v6782_v46 }
 0x1a9   : > { %5873 = vmatprep.subr.bf16.mxu1 %v6783_v47  ;;  %5896 = vmatpush3.bf16.msra.mxu0 %v6792_v56 }
 0x1aa   : > { %5897 = vmatprep.subr.bf16.mxu0 %v6793_v57 }
 0x1ac   : > { %5874 = vmatpush3.bf16.msra.mxu1 %v6783_v47 }
 0x1ad   : > { %5875 = vmatprep.subr.bf16.mxu1 %v6784_v48  ;;  %5898 = vmatpush3.bf16.msra.mxu0 %v6793_v57 }
 0x1ae   : > { %5899 = vmatprep.subr.bf16.mxu0 %v6794_v58 }
 0x1b0   : > { %5876 = vmatpush3.bf16.msra.mxu1 %v6784_v48 }
 0x1b1   : > { %5877 = vmatprep.subr.bf16.mxu1 %v6785_v49  ;;  %5900 = vmatpush3.bf16.msra.mxu0 %v6794_v58 }
 0x1b2   : > { %5925 = vmatprep.subr.bf16.mxu0 %v6795_v59 }
 0x1b4   : > { %5878 = vmatpush3.bf16.msra.mxu1 %v6785_v49 }
 0x1b5   : > { %5879 = vmatprep.subr.bf16.mxu1 %v6786_v50 }
 0x1b8   : > { %5880 = vmatpush3.bf16.msra.mxu1 %v6786_v50 }
 0x1b9   : > { %5905 = vmatprep.subr.bf16.mxu1 %v6797_v60 }
 0x1bb   : > { %5882 = vmatmul.mubr.bf16.vlgmr.msra.gmra.mrb[8].mxu1 %v898_v41  ;;  %v6809_v41 = vld [vmem:[#allocation7 + $0x2b0] sm:$0xff]  }
 0x1bc   : > { %5906 = vmatpush3.bf16.msra.mxu1 %v6797_v60 }
 0x1bd   : > { %5907 = vmatprep.subr.bf16.mxu1 %v6799_v31 }
 0x1c0   : > { %5908 = vmatpush3.bf16.msra.mxu1 %v6799_v31  ;;  %v7408_v31 = vld [vmem:[#allocation7 + $0x404] sm:$0xf] }
 0x1c1   : > { %5909 = vmatprep.subr.bf16.mxu1 %v6801_v33 }
 0x1c4   : > { %5910 = vmatpush3.bf16.msra.mxu1 %v6801_v33  ;;  %v7412_v33 = vld [vmem:[#allocation7 + $0x444] sm:$0xf] }
 0x1c5   : > { %5911 = vmatprep.subr.bf16.mxu1 %v6803_v35 }
 0x1c8   : > { %5912 = vmatpush3.bf16.msra.mxu1 %v6803_v35  ;;  %v1733_v35 = vadd.bf16 %v7412_v33, %v7408_v31 }
 0x1c9   : > { %5913 = vmatprep.subr.bf16.mxu1 %v6805_v37 }
 0x1cc   : > { %5914 = vmatpush3.bf16.msra.mxu1 %v6805_v37  ;;  %v7418_v37 = vld [vmem:[#allocation7 + $0x408] sm:$0xf] }
 0x1cd   : > { %5915 = vmatprep.subr.bf16.mxu1 %v6807_v39 }
 0x1d0   : > { %5916 = vmatpush3.bf16.msra.mxu1 %v6807_v39  ;;  %v7422_v39 = vld [vmem:[#allocation7 + $0x448] sm:$0xf] }
 0x1d1   : > { %5917 = vmatprep.subr.bf16.mxu1 %v6809_v41 }
 0x1d4   : > { %5918 = vmatpush3.bf16.msra.mxu1 %v6809_v41  ;;  %v1734_v41 = vadd.bf16 %v7422_v39, %v7418_v37 }
 0x1d5   : > { %5919 = vmatprep.subr.bf16.mxu1 %v6810_v42 }
 0x1d8   : > { %5920 = vmatpush3.bf16.msra.mxu1 %v6810_v42 }
 0x1d9   : > { %5945 = vmatprep.subr.bf16.mxu1 %v6811_v43 }
 0x267   : > { %v5863_v61 = vpop.f32.mrb[8].mxu0 }
 0x268   : > { %v863_v62 = vpop.f32.mrb[9].mxu0 }
 0x269   : > { %v5864_v63 = vpop.f32.mrb[10].mxu0 }
 0x26a   : > { %v866_v0 = vpop.f32.mrb[11].mxu0 }
 0x26e   : > { %v5843_v1 = vpop.f32.mrb[4].mxu1 }
 0x26f   : > { %v872_v2 = vadd.f32 %v5863_v61, %v5843_v1  ;;  %v767_v3 = vpop.f32.mrb[5].mxu1 }
 0x270   : > { %v864_v4 = vadd.f32 %v863_v62, %v767_v3  ;;  %v5844_v5 = vpop.f32.mrb[6].mxu1 }
 0x271   : > { %v770_v6 = vpop.f32.mrb[7].mxu1 }
 0x272   : > { %v867_v7 = vadd.f32 %v866_v0, %v770_v6  ;;  %v6812_v6 = vld [vmem:[#allocation7 + $0x2c8] sm:$0xff]  }
 0x28e   : > { %v5883_v8 = vpop.f32.mrb[8].mxu1 }
 0x28f   : > { %v1000_v10 = vadd.f32 %v5883_v8, %v872_v2  ;;  %v984_v11 = vpop.f32.mrb[9].mxu1  ;;  %v6813_v8 = vld [vmem:[#allocation7 + $0x2d0] sm:$0xff]  }
 0x290   : > { %v998_v12 = vadd.f32 %v984_v11, %v864_v4  ;;  %v5884_v13 = vpop.f32.mrb[10].mxu1  ;;  %v6816_v11 = vld [vmem:[#allocation7 + $0x2e8] sm:$0xff]  }
 0x291   : > { %v1011_v15 = vadd.f32 %v5164_v9, %v1000_v10  ;;  %v987_v19 = vpop.f32.mrb[11].mxu1  ;;  %v6815_v10 = vld [vmem:[#allocation7 + $0x2e0] sm:$0xff]   ;;  %v6818_v13 = vld [vmem:[#allocation7 + $0x2f8] sm:$0xff]  }
 0x292   : > { %v1009_v20 = vadd.f32 %v5164_v9, %v998_v12  ;;  %v999_v21 = vadd.f32 %v987_v19, %v867_v7  ;;  %v6817_v12 = vld [vmem:[#allocation7 + $0x2f0] sm:$0xff]   ;;  %v6820_v19 = vld [vmem:[#allocation7 + $0x348] sm:$0xff]  }
 0x293   : > { %v1014_v23 = vmax.f32 %v1011_v15, 0.0  ;;  %v6819_v15 = vld [vmem:[#allocation7 + $0x340] sm:$0xff]  }
 0x294   : > { %v1010_v22 = vadd.f32 %v5164_v9, %v999_v21  ;;  %v1012_v24 = vmax.f32 %v1009_v20, 0.0  ;;  %v6814_v9 = vld [vmem:[#allocation7 + $0x2d8] sm:$0xff]   ;;  %v6821_v20 = vld [vmem:[#allocation7 + $0x350] sm:$0xff]  }
 0x295   : > { %v1016_v28 = vpack.c.bf16 %v1014_v23, %v1014_v23  ;;  %v6822_v21 = vld [vmem:[#allocation7 + $0x358] sm:$0xff]   ;;  %v6824_v23 = vld [vmem:[#allocation7 + $0x368] sm:$0xff]  }
 0x296   : > { %v1013_v26 = vmax.f32 %v1010_v22, 0.0  ;;  %v6823_v22 = vld [vmem:[#allocation7 + $0x360] sm:$0xff]  }
 0x298   : > { %v1015_v27 = vpack.c.bf16 %v1013_v26, %v1012_v24  ;;  %v6825_v24 = vld [vmem:[#allocation7 + $0x370] sm:$0xff]   ;;  %v6826_v26 = vld [vmem:[#allocation7 + $0x378] sm:$0xff]  }
 0x29a   : > { %5901 = vmatprep.mubr.bf16.mxu0 %v1015_v27  ;;  %v7400_v27 = vld [vmem:[#allocation7 + $0x3c0] sm:$0xf] }
 0x29b   : > { %5902 = vmatmul.mubr.bf16.vlgmr.msra.gmra.mrb[12].mxu0 %v1016_v28  ;;  %v7402_v28 = vld [vmem:[#allocation7 + $0x3c4] sm:$0xf] }
 0x29c   : > { %5926 = vmatpush3.bf16.msra.mxu0 %v6795_v59 }
 0x29d   : > { %5927 = vmatprep.subr.bf16.mxu0 %v6796_v29 }
 0x2a0   : > { %5928 = vmatpush3.bf16.msra.mxu0 %v6796_v29  ;;  %v5216_v29 = vcombine.low %v7400_v27, %v7402_v28 }
 0x2a1   : > { %5929 = vmatprep.subr.bf16.mxu0 %v6798_v30 }
 0x2a4   : > { %5930 = vmatpush3.bf16.msra.mxu0 %v6798_v30  ;;  %v7406_v30 = vld [vmem:[#allocation7 + $0x400] sm:$0xf] }
 0x2a5   : > { %5931 = vmatprep.subr.bf16.mxu0 %v6800_v32 }
 0x2a8   : > { %5932 = vmatpush3.bf16.msra.mxu0 %v6800_v32  ;;  %v7410_v32 = vld [vmem:[#allocation7 + $0x440] sm:$0xf] }
 0x2a9   : > { %5933 = vmatprep.subr.bf16.mxu0 %v6802_v34 }
 0x2ac   : > { %5934 = vmatpush3.bf16.msra.mxu0 %v6802_v34  ;;  %v1732_v34 = vadd.bf16 %v7410_v32, %v7406_v30 }
 0x2ad   : > { %5935 = vmatprep.subr.bf16.mxu0 %v6804_v36 }
 0x2b0   : > { %5936 = vmatpush3.bf16.msra.mxu0 %v6804_v36  ;;  %v5208_v36 = vcombine.low %v1732_v34, %v1733_v35  ;;  %v7466_v35 = vld [vmem:[#allocation7 + $0x418] sm:$0xf] }
 0x2b1   : > { %5937 = vmatprep.subr.bf16.mxu0 %v6806_v38 }
 0x2b4   : > { %5938 = vmatpush3.bf16.msra.mxu0 %v6806_v38  ;;  %v7420_v38 = vld [vmem:[#allocation7 + $0x40c] sm:$0xf] }
 0x2b5   : > { %5939 = vmatprep.subr.bf16.mxu0 %v6808_v40 }
 0x2b8   : > { %5940 = vmatpush3.bf16.msra.mxu0 %v6808_v40  ;;  %v7424_v40 = vld [vmem:[#allocation7 + $0x44c] sm:$0xf] }
 0x2b9   : > { %5965 = vmatprep.subr.bf16.mxu0 %v6819_v15  ;;  %v1735_v42 = vadd.bf16 %v7424_v40, %v7420_v38 }
 0x36e   : > { %v5903_v45 = vpop.f32.mrb[12].mxu0 }
 0x36f   : > { %v1133_v46 = vadd.f32 %v5903_v45, %v5165_v44  ;;  %v1124_v47 = vpop.f32.mrb[13].mxu0 }
 0x370   : > { %v1125_v48 = vadd.f32 %v5165_v44, %v1124_v47  ;;  %v5904_v49 = vpop.f32.mrb[14].mxu0 }
 0x371   : > { %v7388_v50 = vadd.f32 %v1133_v46, %v615_v17  ;;  %v1127_v51 = vpop.f32.mrb[15].mxu0 }
 0x372   : > { %v7392_v52 = vadd.f32 %v1125_v48, %v613_v18 }
 0x373   : > { %1146 = vst [vmem:[#allocation3 + $0x18] sm:$0xff] %v7388_v50 }
 0x374   : > { %1144 = vst [vmem:[#allocation3 + $0x8] sm:$0xff] %v7392_v52 }
 0x37a   : > { %v1151_v53 = vld [vmem:[#allocation3 + $0x17] sm:$0xff]  ;;  %v1152_v54 = vld [vmem:[#allocation3 + $0x1f] sm:$0x3] }
 0x37b   : > { %v1149_v55 = vld [vmem:[#allocation3 + $0x7] sm:$0xff]  ;;  %v1150_v56 = vld [vmem:[#allocation3 + $0xf] sm:$0xff]  ;;  %v1155_v57 = vmax.f32 %v1151_v53, 0.0  ;;  %v1156_v58 = vmax.f32 %v1152_v54, 0.0  ;;  %1672 = vst [vmem:[#allocation3 + $0x20] sm:$0xff] %v7380_v25 }
 0x37c   : > { %v1153_v14 = vmax.f32 %v1149_v55, 0.0  ;;  %v1154_v17 = vmax.f32 %v1150_v56, 0.0  ;;  %1671 = vst [vmem:[#allocation3 + $0x10] sm:$0xff] %v7380_v25 }
 0x37d   : > { %v1158_v59 = vpack.c.bf16 %v1156_v58, %v1155_v57  ;;  %v5198_v58 = vld [vmem:[#allocation9 + $0x3] ss:$0 sm:$0xff] }
 0x37e   : > { %v1157_v16 = vpack.c.bf16 %v1154_v17, %v1153_v14 }
 0x37f   : > { %v1201_v18 = vshll.u32 %v1158_v59, 16  ;;  %v1205_v1 = vshrl.u32 %v1158_v59, 16  ;;  %v1422_v3 = vrot.slane %v1158_v59, 1 }
 0x380   : > { %5941 = vmatprep.mubr.bf16.mxu0 %v1157_v16  ;;  %v1196_v60 = vshll.u32 %v1157_v16, 16  ;;  %v1194_v61 = vshrl.u32 %v1157_v16, 16  ;;  %v1421_v2 = vrot.slane %v1157_v16, 1 }
 0x381   : > { %5942 = vmatmul.mubr.bf16.vlgmr.msra.gmra.mrb[16].mxu0 %v1158_v59  ;;  %v1203_v63 = vrot.slane %v1201_v18, 1 }
 0x382   : > { %v1198_v62 = vrot.slane %v1196_v60, 1  ;;  %v1423_v7 = vsel %vm498_vm1, %v1421_v2, %v1422_v3  ;;  %5966 = vmatpush3.bf16.msra.mxu0 %v6819_v15  ;;  %v7448_v15 = vld [vmem:[#allocation7 + $0x410] sm:$0xf] }
 0x383   : > { %v1207_v5 = vor.u32 %v1205_v1, %v1203_v63  ;;  %5967 = vmatprep.subr.bf16.mxu0 %v6820_v19 }
 0x384   : > { %v1199_v0 = vor.u32 %v1198_v62, %v1194_v61 }
 0x386   : > { %v1204_v4 = vsel %vm269_vm0, %v1199_v0, %v1203_v63  ;;  %5968 = vmatpush3.bf16.msra.mxu0 %v6820_v19  ;;  %v7450_v19 = vld [vmem:[#allocation7 + $0x414] sm:$0xf] }
 0x387   : > { %5921 = vmatprep.mubr.bf16.mxu1 %v1204_v4  ;;  %5969 = vmatprep.subr.bf16.mxu0 %v6821_v20  ;;  %v7432_v4 = vld [vmem:[#allocation7 + $0x3cc] sm:$0xf] }
 0x388   : > { %5922 = vmatmul.mubr.bf16.vlgmr.msra.gmra.mrb[12].mxu1 %v1207_v5 }
 0x389   : > { %5946 = vmatpush3.bf16.msra.mxu1 %v6811_v43  ;;  %5961 = vmatprep.mubr.bf16.mxu1 %v1423_v7  ;;  %v5209_v43 = vcombine.low %v1734_v41, %v1735_v42  ;;  %v7470_v41 = vld [vmem:[#allocation7 + $0x458] sm:$0xf]  ;;  %v7472_v42 = vld [vmem:[#allocation7 + $0x45c] sm:$0xf] }
 0x38a   : > { %5947 = vmatprep.subr.bf16.mxu1 %v6812_v6  ;;  %5970 = vmatpush3.bf16.msra.mxu0 %v6821_v20  ;;  %v7452_v20 = vld [vmem:[#allocation7 + $0x450] sm:$0xf] }
 0x38b   : > { %5971 = vmatprep.subr.bf16.mxu0 %v6822_v21 }
 0x38d   : > { %5948 = vmatpush3.bf16.msra.mxu1 %v6812_v6 }
 0x38e   : > { %5949 = vmatprep.subr.bf16.mxu1 %v6813_v8  ;;  %5972 = vmatpush3.bf16.msra.mxu0 %v6822_v21  ;;  %v7454_v21 = vld [vmem:[#allocation7 + $0x454] sm:$0xf] }
 0x38f   : > { %5973 = vmatprep.subr.bf16.mxu0 %v6823_v22 }
 0x391   : > { %5950 = vmatpush3.bf16.msra.mxu1 %v6813_v8  ;;  %v7436_v8 = vld [vmem:[#allocation7 + $0x3d0] sm:$0xf] }
 0x392   : > { %5951 = vmatprep.subr.bf16.mxu1 %v6814_v9  ;;  %5974 = vmatpush3.bf16.msra.mxu0 %v6823_v22  ;;  %v1736_v22 = vadd.bf16 %v7452_v20, %v7448_v15 }
 0x393   : > { %5975 = vmatprep.subr.bf16.mxu0 %v6824_v23 }
 0x395   : > { %5952 = vmatpush3.bf16.msra.mxu1 %v6814_v9  ;;  %v7438_v9 = vld [vmem:[#allocation7 + $0x3d4] sm:$0xf] }
 0x396   : > { %5953 = vmatprep.subr.bf16.mxu1 %v6815_v10  ;;  %5976 = vmatpush3.bf16.msra.mxu0 %v6824_v23  ;;  %v1737_v23 = vadd.bf16 %v7454_v21, %v7450_v19 }
 0x397   : > { %5977 = vmatprep.subr.bf16.mxu0 %v6825_v24 }
 0x399   : > { %5954 = vmatpush3.bf16.msra.mxu1 %v6815_v10  ;;  %v5218_v10 = vcombine.low %v7436_v8, %v7438_v9 }
 0x39a   : > { %5955 = vmatprep.subr.bf16.mxu1 %v6816_v11  ;;  %5978 = vmatpush3.bf16.msra.mxu0 %v6825_v24  ;;  %v7460_v24 = vld [vmem:[#allocation7 + $0x3e0] sm:$0xf] }
 0x39b   : > { %5979 = vmatprep.subr.bf16.mxu0 %v6826_v26 }
 0x39d   : > { %5956 = vmatpush3.bf16.msra.mxu1 %v6816_v11  ;;  %v7442_v11 = vld [vmem:[#allocation7 + $0x3d8] sm:$0xf] }
 0x39e   : > { %5957 = vmatprep.subr.bf16.mxu1 %v6817_v12  ;;  %5980 = vmatpush3.bf16.msra.mxu0 %v6826_v26  ;;  %v7462_v26 = vld [vmem:[#allocation7 + $0x3e4] sm:$0xf] }
 0x39f   : > { %6005 = vmatprep.subr.bf16.mxu0 %v5216_v29  ;;  %v5220_v34 = vcombine.low %v7460_v24, %v7462_v26 }
 0x3a1   : > { %5958 = vmatpush3.bf16.msra.mxu1 %v6817_v12  ;;  %v7444_v12 = vld [vmem:[#allocation7 + $0x3dc] sm:$0xf] }
 0x3a2   : > { %5959 = vmatprep.subr.bf16.mxu1 %v6818_v13 }
 0x3a5   : > { %5960 = vmatpush3.bf16.msra.mxu1 %v6818_v13  ;;  %v5219_v13 = vcombine.low %v7442_v11, %v7444_v12 }
 0x3a6   : > { %5985 = vmatprep.subr.bf16.mxu1 %v5208_v36 }
 0x3a8   : > { %5962 = vmatmul.mubr.bf16.vlgmr.msra.gmra.mrb[16].mxu1 %v1422_v3  ;;  %v7430_v3 = vld [vmem:[#allocation7 + $0x3c8] sm:$0xf] }
 0x3a9   : > { %5986 = vmatpush3.bf16.msra.mxu1 %v5208_v36  ;;  %v5217_v7 = vcombine.low %v7430_v3, %v7432_v4  ;;  %v7468_v36 = vld [vmem:[#allocation7 + $0x41c] sm:$0xf] }
 0x3aa   : > { %5987 = vmatprep.subr.bf16.mxu1 %v5209_v43 }
 0x3ad   : > { %5988 = vmatpush3.bf16.msra.mxu1 %v5209_v43  ;;  %v1738_v43 = vadd.bf16 %v7470_v41, %v7466_v35 }
 0x454   : > { %v5943_v44 = vpop.f32.mrb[16].mxu0 }
 0x455   : > { %v1388_v45 = vpop.f32.mrb[17].mxu0 }
 0x456   : > { %v5944_v46 = vpop.f32.mrb[18].mxu0 }
 0x457   : > { %v1391_v47 = vpop.f32.mrb[19].mxu0  ;;  %v7480_v46 = vld [vmem:[#allocation7 + $0x3ec] sm:$0xf] }
 0x45b   : > { %v5923_v48 = vpop.f32.mrb[12].mxu1 }
 0x45c   : > { %v1397_v49 = vadd.f32 %v5943_v44, %v5923_v48  ;;  %v1292_v51 = vpop.f32.mrb[13].mxu1  ;;  %v1739_v44 = vadd.bf16 %v7472_v42, %v7468_v36 }
 0x45d   : > { %v1389_v53 = vadd.f32 %v1388_v45, %v1292_v51  ;;  %v5924_v54 = vpop.f32.mrb[14].mxu1  ;;  %v7478_v45 = vld [vmem:[#allocation7 + $0x3e8] sm:$0xf]  ;;  %v7486_v51 = vld [vmem:[#allocation7 + $0x424] sm:$0xf] }
 0x45e   : > { %v1295_v55 = vpop.f32.mrb[15].mxu1  ;;  %v5221_v48 = vcombine.low %v7478_v45, %v7480_v46  ;;  %v7490_v54 = vld [vmem:[#allocation7 + $0x464] sm:$0xf] }
 0x45f   : > { %v1392_v56 = vadd.f32 %v1391_v47, %v1295_v55  ;;  %v5211_v47 = vcombine.low %v1738_v43, %v1739_v44  ;;  %v1711_v44 = vld [vmem:[#allocation7 + $0x438] sm:$0xf] }
 0x47b   : > { %v5963_v57 = vpop.f32.mrb[16].mxu1 }
 0x47c   : > { %v1524_v14 = vadd.f32 %v5963_v57, %v1397_v49  ;;  %v1508_v17 = vpop.f32.mrb[17].mxu1  ;;  %v7484_v49 = vld [vmem:[#allocation7 + $0x420] sm:$0xf]  ;;  %v7496_v57 = vld [vmem:[#allocation7 + $0x3f0] sm:$0xf] }
 0x47d   : > { %v1522_v59 = vadd.f32 %v1508_v17, %v1389_v53  ;;  %v5964_v16 = vpop.f32.mrb[18].mxu1  ;;  %v7488_v53 = vld [vmem:[#allocation7 + $0x460] sm:$0xf] }
 0x47e   : > { %v1535_v18 = vadd.f32 %v5198_v58, %v1524_v14  ;;  %v1511_v60 = vpop.f32.mrb[19].mxu1  ;;  %v1740_v55 = vadd.bf16 %v7488_v53, %v7484_v49  ;;  %v1708_v16 = vld [vmem:[#allocation7 + $0x42c] sm:$0xf] }
 0x47f   : > { %v1533_v61 = vadd.f32 %v5198_v58, %v1522_v59  ;;  %v1523_v62 = vadd.f32 %v1511_v60, %v1392_v56  ;;  %v1741_v56 = vadd.bf16 %v7490_v54, %v7486_v51  ;;  %v1707_v59 = vld [vmem:[#allocation7 + $0x428] sm:$0xf]  ;;  %v1725_v60 = vld [vmem:[#allocation7 + $0x46c] sm:$0xf] }
 0x480   : > { %v1538_v0 = vmax.f32 %v1535_v18, 0.0  ;;  %v1724_v18 = vld [vmem:[#allocation7 + $0x468] sm:$0xf] }
 0x481   : > { %v1534_v63 = vadd.f32 %v5198_v58, %v1523_v62  ;;  %v1536_v1 = vmax.f32 %v1533_v61, 0.0  ;;  %v7498_v58 = vld [vmem:[#allocation7 + $0x3f4] sm:$0xf]  ;;  %v5212_v14 = vcombine.low %v1740_v55, %v1741_v56  ;;  %v1742_v61 = vadd.bf16 %v1724_v18, %v1707_v59  ;;  %v1694_v62 = vld [vmem:[#allocation7 + $0x3f8] sm:$0xf] }
 0x482   : > { %v1540_v6 = vpack.c.bf16 %v1538_v0, %v1538_v0  ;;  %v5222_v17 = vcombine.low %v7496_v57, %v7498_v58  ;;  %v1743_v0 = vadd.bf16 %v1725_v60, %v1708_v16  ;;  %v1729_v55 = vld [vmem:[#allocation7 + $0x47c] sm:$0xf] }
 0x483   : > { %v1537_v2 = vmax.f32 %v1534_v63, 0.0  ;;  %v1695_v63 = vld [vmem:[#allocation7 + $0x3fc] sm:$0xf] }
 0x485   : > { %v1539_v5 = vpack.c.bf16 %v1537_v2, %v1536_v1  ;;  %v5223_v1 = vcombine.low %v1694_v62, %v1695_v63  ;;  %v1709_v2 = vld [vmem:[#allocation7 + $0x430] sm:$0xf] }
 0x487   : > { %5981 = vmatprep.mubr.bf16.mxu0 %v1539_v5  ;;  %v1710_v5 = vld [vmem:[#allocation7 + $0x434] sm:$0xf] }
 0x488   : > { %5982 = vmatmul.mubr.bf16.vlgmr.msra.gmra.mrb[20].mxu0 %v1540_v6  ;;  %v1726_v6 = vld [vmem:[#allocation7 + $0x470] sm:$0xf] }
 0x489   : > { %6006 = vmatpush3.bf16.msra.mxu0 %v5216_v29  ;;  %v5210_v29 = vcombine.low %v1736_v22, %v1737_v23 }
 0x48a   : > { %6007 = vmatprep.subr.bf16.mxu0 %v5217_v7 }
 0x48b   : > { %5989 = vmatprep.subr.bf16.mxu1 %v5210_v29 }
 0x48c   : > { %5990 = vmatpush3.bf16.msra.mxu1 %v5210_v29  ;;  %v1963_v29 = vadd.bf16 %v7406_v30, %v7400_v27  ;;  %v1967_v27 = vadd.bf16 %v7448_v15, %v7436_v8  ;;  %v7512_v30 = vcombine.low %v7410_v32, %v7412_v33  ;;  %v1971_v8 = vadd.bf16 %v7484_v49, %v7460_v24  ;;  %v5199_v49 = vld [vmem:[#allocation9 + $0x4] ss:$0 sm:$0xff] }
 0x48d   : > { %6008 = vmatpush3.bf16.msra.mxu0 %v5217_v7  ;;  %5991 = vmatprep.subr.bf16.mxu1 %v5211_v47  ;;  %v1727_v7 = vld [vmem:[#allocation7 + $0x474] sm:$0xf]  ;;  %v7529_v32 = vcombine.low %v7452_v20, %v7454_v21  ;;  %v1973_v15 = vadd.bf16 %v1707_v59, %v7478_v45  ;;  %v1975_v24 = vadd.bf16 %v1709_v2, %v7496_v57 }
 0x48e   : > { %6009 = vmatprep.subr.bf16.mxu0 %v5218_v10  ;;  %v1745_v22 = vadd.bf16 %v1727_v7, %v1710_v5  ;;  %v7545_v20 = vcombine.low %v7488_v53, %v7490_v54  ;;  %v7549_v45 = vcombine.low %v1724_v18, %v1725_v60  ;;  %v1965_v18 = vadd.bf16 %v7418_v37, %v7430_v3 }
 0x48f   : > { %v1966_v60 = vadd.bf16 %v7420_v38, %v7432_v4 }
 0x490   : > { %5992 = vmatpush3.bf16.msra.mxu1 %v5211_v47  ;;  %v1712_v47 = vld [vmem:[#allocation7 + $0x43c] sm:$0xf] }
 0x491   : > { %6010 = vmatpush3.bf16.msra.mxu0 %v5218_v10  ;;  %5993 = vmatprep.subr.bf16.mxu1 %v5212_v14  ;;  %v1744_v10 = vadd.bf16 %v1726_v6, %v1709_v2 }
 0x492   : > { %6011 = vmatprep.subr.bf16.mxu0 %v5219_v13 }
 0x493   : > { %v5214_v23 = vcombine.low %v1744_v10, %v1745_v22 }
 0x494   : > { %5994 = vmatpush3.bf16.msra.mxu1 %v5212_v14  ;;  %v1747_v14 = vadd.bf16 %v1729_v55, %v1712_v47 }
 0x495   : > { %6012 = vmatpush3.bf16.msra.mxu0 %v5219_v13  ;;  %v5213_v13 = vcombine.low %v1742_v61, %v1743_v0  ;;  %v1969_v61 = vadd.bf16 %v7466_v35, %v7442_v11  ;;  %v1970_v0 = vadd.bf16 %v7468_v36, %v7444_v12  ;;  %v1974_v11 = vadd.bf16 %v1708_v16, %v7480_v46 }
 0x496   : > { %6013 = vmatprep.subr.bf16.mxu0 %v5220_v34  ;;  %v7537_v12 = vcombine.low %v7470_v41, %v7472_v42  ;;  %v1977_v35 = vadd.bf16 %v1711_v44, %v1694_v62  ;;  %v1978_v36 = vadd.bf16 %v1712_v47, %v1695_v63  ;;  %v7553_v41 = vcombine.low %v1726_v6, %v1727_v7 }
 0x497   : > { %5995 = vmatprep.subr.bf16.mxu1 %v5213_v13  ;;  %v5226_v47 = vcombine.low %v7422_v39, %v7424_v40  ;;  %v6843_v39 = vld [vmem:[#allocation7 + $0x480] sm:$0xff]   ;;  %v6844_v40 = vld [vmem:[#allocation7 + $0x488] sm:$0xff]  }
 0x498   : > { %5996 = vmatpush3.bf16.msra.mxu1 %v5213_v13  ;;  %v7551_v46 = vcombine.low %v1977_v35, %v1978_v36  ;;  %v5234_v13 = vcombine.low %v1965_v18, %v1966_v60  ;;  %v7616_v18 = vld [vmem:[#allocation9 + $0x7] ss:$0 sm:$0xff] }
 0x499   : > { %6014 = vmatpush3.bf16.msra.mxu0 %v5220_v34  ;;  %v1964_v34 = vadd.bf16 %v7408_v31, %v7402_v28  ;;  %5997 = vmatprep.subr.bf16.mxu1 %v5214_v23  ;;  %v1968_v28 = vadd.bf16 %v7450_v19, %v7438_v9  ;;  %v1972_v9 = vadd.bf16 %v7486_v51, %v7462_v26 }
 0x49a   : > { %6015 = vmatprep.subr.bf16.mxu0 %v5221_v48  ;;  %v7539_v19 = vcombine.low %v1973_v15, %v1974_v11  ;;  %v1976_v26 = vadd.bf16 %v1710_v5, %v7498_v58 }
 0x49b   : > { %v5233_v43 = vcombine.low %v1963_v29, %v1964_v34  ;;  %v7514_v31 = vcombine.low %v1967_v27, %v1968_v28  ;;  %v7531_v33 = vcombine.low %v1971_v8, %v1972_v9  ;;  %v6850_v27 = vld [vmem:[#allocation7 + $0x4a0] sm:$0xff]   ;;  %v6851_v28 = vld [vmem:[#allocation7 + $0x4d8] sm:$0xff]  }
 0x49c   : > { %5998 = vmatpush3.bf16.msra.mxu1 %v5214_v23  ;;  %v7547_v21 = vcombine.low %v1975_v24, %v1976_v26  ;;  %v6856_v8 = vld [vmem:[#allocation7 + $0x4b8] sm:$0xff]  }
 0x49d   : > { %6016 = vmatpush3.bf16.msra.mxu0 %v5221_v48  ;;  %v1728_v48 = vld [vmem:[#allocation7 + $0x478] sm:$0xf] }
 0x49e   : > { %6017 = vmatprep.subr.bf16.mxu0 %v5222_v17  ;;  %v1746_v56 = vadd.bf16 %v1728_v48, %v1711_v44  ;;  %v7555_v42 = vcombine.low %v1728_v48, %v1729_v55  ;;  %v6845_v48 = vld [vmem:[#allocation7 + $0x4c0] sm:$0xff]   ;;  %v6846_v55 = vld [vmem:[#allocation7 + $0x490] sm:$0xff]   ;;  %v6858_v9 = vld [vmem:[#allocation7 + $0x4f8] sm:$0xff]  }
 0x4a1   : > { %6018 = vmatpush3.bf16.msra.mxu0 %v5222_v17  ;;  %v5215_v17 = vcombine.low %v1746_v56, %v1747_v14  ;;  %v6847_v56 = vld [vmem:[#allocation7 + $0x4c8] sm:$0xff]   ;;  %v6848_v14 = vld [vmem:[#allocation7 + $0x498] sm:$0xff]  }
 0x4a2   : > { %6019 = vmatprep.subr.bf16.mxu0 %v5223_v1 }
 0x4a3   : > { %5999 = vmatprep.subr.bf16.mxu1 %v5215_v17 }
 0x4a4   : > { %6000 = vmatpush3.bf16.msra.mxu1 %v5215_v17  ;;  %v6849_v17 = vld [vmem:[#allocation7 + $0x4d0] sm:$0xff]  }
 0x4a5   : > { %6020 = vmatpush3.bf16.msra.mxu0 %v5223_v1  ;;  %6025 = vmatprep.subr.bf16.mxu1 %v7512_v30  ;;  %v7521_v1 = vcombine.low %v1969_v61, %v1970_v0  ;;  %v7603_v61 = vld [vmem:[#allocation2] sm:$0xff] }
 0x4a6   : > { %6045 = vmatprep.subr.bf16.mxu0 %v5233_v43  ;;  %v6854_v0 = vld [vmem:[#allocation7 + $0x4b0] sm:$0xff]  }
 0x55b   : > { %v5983_v51 = vpop.f32.mrb[20].mxu0 }
 0x55c   : > { %v1657_v57 = vadd.f32 %v5983_v51, %v5199_v49  ;;  %v1648_v58 = vpop.f32.mrb[21].mxu0 }
 0x55d   : > { %v1649_v59 = vadd.f32 %v5199_v49, %v1648_v58  ;;  %v5984_v16 = vpop.f32.mrb[22].mxu0 }
 0x55e   : > { %v1667_v53 = vadd.f32 %v1657_v57, %v7388_v50  ;;  %v1651_v54 = vpop.f32.mrb[23].mxu0 }
 0x55f   : > { %v1665_v62 = vadd.f32 %v1649_v59, %v7392_v52 }
 0x560   : > { %1670 = vst [vmem:[#allocation3 + $0x18] sm:$0xff] %v1667_v53 }
 0x561   : > { %1668 = vst [vmem:[#allocation3 + $0x8] sm:$0xff] %v1665_v62 }
 0x567   : > { %v1675_v63 = vld [vmem:[#allocation3 + $0x17] sm:$0xff]  ;;  %v1676_v2 = vld [vmem:[#allocation3 + $0x1f] sm:$0x3] }
 0x568   : > { %v1673_v5 = vld [vmem:[#allocation3 + $0x7] sm:$0xff]  ;;  %v1674_v6 = vld [vmem:[#allocation3 + $0xf] sm:$0xff]  ;;  %v1678_v7 = vpack.c.bf16 %v1676_v2, %v1675_v63 }
 0x569   : > { %v1677_v10 = vpack.c.bf16 %v1674_v6, %v1673_v5 }
 0x56a   : > { %v1756_v22 = vshll.u32 %v1678_v7, 16  ;;  %v1760_v3 = vshrl.u32 %v1678_v7, 16  ;;  %v1982_v38 = vrot.slane %v1678_v7, 1 }
 0x56b   : > { %6021 = vmatprep.mubr.bf16.mxu0 %v1677_v10  ;;  %v1751_v50 = vshll.u32 %v1677_v10, 16  ;;  %v1749_v52 = vshrl.u32 %v1677_v10, 16  ;;  %v1981_v34 = vrot.slane %v1677_v10, 1 }
 0x56c   : > { %6022 = vmatmul.mubr.bf16.vlgmr.msra.gmra.mrb[24].mxu0 %v1678_v7  ;;  %v1758_v29 = vrot.slane %v1756_v22, 1 }
 0x56d   : > { %6046 = vmatpush3.bf16.msra.mxu0 %v5233_v43  ;;  %v1753_v23 = vrot.slane %v1751_v50, 1  ;;  %v1983_v43 = vsel %vm498_vm1, %v1981_v34, %v1982_v38 }
 0x56e   : > { %6047 = vmatprep.subr.bf16.mxu0 %v5234_v13  ;;  %v1762_v44 = vor.u32 %v1760_v3, %v1758_v29 }
 0x56f   : > { %v1754_v37 = vor.u32 %v1753_v23, %v1749_v52 }
 0x571   : > { %6048 = vmatpush3.bf16.msra.mxu0 %v5234_v13  ;;  %v1759_v4 = vsel %vm269_vm0, %v1754_v37, %v1758_v29 }
 0x572   : > { %6001 = vmatprep.mubr.bf16.mxu1 %v1759_v4  ;;  %6061 = vmatprep.mubr.bf16.mxu0 %v1759_v4 }
 0x573   : > { %6002 = vmatmul.mubr.bf16.vlgmr.msra.gmra.mrb[20].mxu1 %v1762_v44  ;;  %6049 = vmatprep.subr.bf16.mxu0 %v7514_v31 }
 0x574   : > { %6026 = vmatpush3.bf16.msra.mxu1 %v7512_v30  ;;  %6041 = vmatprep.mubr.bf16.mxu1 %v1983_v43  ;;  %v6852_v30 = vld [vmem:[#allocation7 + $0x4a8] sm:$0xff]  }
 0x575   : > { %6050 = vmatpush3.bf16.msra.mxu0 %v7514_v31  ;;  %6027 = vmatprep.subr.bf16.mxu1 %v5226_v47  ;;  %v6853_v31 = vld [vmem:[#allocation7 + $0x4e0] sm:$0xff]  }
 0x576   : > { %6051 = vmatprep.subr.bf16.mxu0 %v7521_v1 }
 0x578   : > { %6028 = vmatpush3.bf16.msra.mxu1 %v5226_v47 }
 0x579   : > { %6052 = vmatpush3.bf16.msra.mxu0 %v7521_v1  ;;  %6029 = vmatprep.subr.bf16.mxu1 %v7529_v32  ;;  %v6855_v1 = vld [vmem:[#allocation7 + $0x4e8] sm:$0xff]  }
 0x57a   : > { %6053 = vmatprep.subr.bf16.mxu0 %v7531_v33 }
 0x57c   : > { %6030 = vmatpush3.bf16.msra.mxu1 %v7529_v32 }
 0x57d   : > { %6054 = vmatpush3.bf16.msra.mxu0 %v7531_v33  ;;  %6031 = vmatprep.subr.bf16.mxu1 %v7537_v12 }
 0x57e   : > { %6055 = vmatprep.subr.bf16.mxu0 %v7539_v19 }
 0x580   : > { %6032 = vmatpush3.bf16.msra.mxu1 %v7537_v12  ;;  %v5224_v12 = vld [vmem:[#allocation9 + $0x5] ss:$0 sm:$0xff] }
 0x581   : > { %6056 = vmatpush3.bf16.msra.mxu0 %v7539_v19  ;;  %6033 = vmatprep.subr.bf16.mxu1 %v7545_v20 }
 0x582   : > { %6057 = vmatprep.subr.bf16.mxu0 %v7547_v21 }
 0x584   : > { %6034 = vmatpush3.bf16.msra.mxu1 %v7545_v20 }
 0x585   : > { %6058 = vmatpush3.bf16.msra.mxu0 %v7547_v21  ;;  %6035 = vmatprep.subr.bf16.mxu1 %v7549_v45 }
 0x586   : > { %6059 = vmatprep.subr.bf16.mxu0 %v7551_v46 }
 0x588   : > { %6036 = vmatpush3.bf16.msra.mxu1 %v7549_v45 }
 0x589   : > { %6060 = vmatpush3.bf16.msra.mxu0 %v7551_v46  ;;  %6037 = vmatprep.subr.bf16.mxu1 %v7553_v41 }
 0x58a   : > { %6093 = vmatprep.subr.bf16.mxu0 %v7380_v25 }
 0x58c   : > { %6038 = vmatpush3.bf16.msra.mxu1 %v7553_v41  ;;  %6062 = vmatmul.mubr.bf16.vlgmr.msra.gmra.mrb[28].mxu0 %v1762_v44 }
 0x58d   : > { %6039 = vmatprep.subr.bf16.mxu1 %v7555_v42  ;;  %6094 = vmatpush3.bf16.msra.mxu0 %v6843_v39 }
 0x58e   : > { %6095 = vmatprep.subr.bf16.mxu0 %v7380_v25  ;;  %6109 = vmatprep.mubr.msk.bf16.mxu0 %vm7144_vm4, %v7603_v61 }
 0x590   : > { %6040 = vmatpush3.bf16.msra.mxu1 %v7555_v42 }
 0x591   : > { %6065 = vmatprep.subr.bf16.mxu1 %v7380_v25  ;;  %6096 = vmatpush3.bf16.msra.mxu0 %v6844_v40 }
 0x592   : > { %6097 = vmatprep.subr.bf16.mxu0 %v7380_v25 }
 0x593   : > { %6042 = vmatmul.mubr.bf16.vlgmr.msra.gmra.mrb[24].mxu1 %v1982_v38 }
 0x594   : > { %6066 = vmatpush3.bf16.msra.mxu1 %v6845_v48  ;;  %6081 = vmatprep.mubr.msk.bf16.mxu1 %vm7144_vm4, %v7603_v61 }
 0x595   : > { %6067 = vmatprep.subr.bf16.mxu1 %v7380_v25  ;;  %6098 = vmatpush3.bf16.msra.mxu0 %v6846_v55 }
 0x596   : > { %6099 = vmatprep.subr.bf16.mxu0 %v7380_v25 }
 0x598   : > { %6068 = vmatpush3.bf16.msra.mxu1 %v6847_v56 }
 0x599   : > { %6069 = vmatprep.subr.bf16.mxu1 %v7380_v25  ;;  %6100 = vmatpush3.bf16.msra.mxu0 %v6848_v14 }
 0x59a   : > { %6101 = vmatprep.subr.bf16.mxu0 %v7380_v25 }
 0x59c   : > { %6070 = vmatpush3.bf16.msra.mxu1 %v6849_v17 }
 0x59d   : > { %6071 = vmatprep.subr.bf16.mxu1 %v7380_v25  ;;  %6102 = vmatpush3.bf16.msra.mxu0 %v6850_v27 }
 0x59e   : > { %6103 = vmatprep.subr.bf16.mxu0 %v7380_v25 }
 0x5a0   : > { %6072 = vmatpush3.bf16.msra.mxu1 %v6851_v28 }
 0x5a1   : > { %6073 = vmatprep.subr.bf16.mxu1 %v7380_v25  ;;  %6104 = vmatpush3.bf16.msra.mxu0 %v6852_v30  ;;  %v6857_v25 = vld [vmem:[#allocation7 + $0x4f0] sm:$0xff]  }
 0x5a2   : > { %6105 = vmatprep.subr.bf16.mxu0 %v7603_v61 }
 0x5a4   : > { %6074 = vmatpush3.bf16.msra.mxu1 %v6853_v31 }
 0x5a5   : > { %6075 = vmatprep.subr.bf16.mxu1 %v7603_v61  ;;  %6106 = vmatpush3.bf16.msra.mxu0 %v6854_v0 }
 0x5a6   : > { %6107 = vmatprep.subr.bf16.mxu0 %v7603_v61 }
 0x5a8   : > { %6076 = vmatpush3.bf16.msra.mxu1 %v6855_v1  ;;  %v6859_v1 = vld [vmem:[#allocation7 + $0x500] sm:$0xff]  }
 0x5a9   : > { %6077 = vmatprep.subr.bf16.mxu1 %v7603_v61  ;;  %6108 = vmatpush3.bf16.msra.mxu0 %v6856_v8 }
 0x5aa   : > { %6149 = vmatprep.subr.bf16.mxu0 %v7603_v61 }
 0x5ac   : > { %6078 = vmatpush3.bf16.msra.mxu1 %v6857_v25 }
 0x5ad   : > { %6079 = vmatprep.subr.bf16.mxu1 %v7603_v61 }
 0x5b0   : > { %6080 = vmatpush3.bf16.msra.mxu1 %v6858_v9 }
 0x5b1   : > { %6121 = vmatprep.subr.bf16.mxu1 %v7603_v61 }
 0x63f   : > { %v6023_v32 = vpop.f32.mrb[24].mxu0 }
 0x640   : > { %v1942_v33 = vpop.f32.mrb[25].mxu0 }
 0x641   : > { %v6024_v15 = vpop.f32.mrb[26].mxu0 }
 0x642   : > { %v1945_v11 = vpop.f32.mrb[27].mxu0 }
 0x643   : > { %v6861_v11 = vld [vmem:[#allocation7 + $0x510] sm:$0xff]  }
 0x646   : > { %v6003_v19 = vpop.f32.mrb[20].mxu1 }
 0x647   : > { %v1950_v24 = vadd.f32 %v6023_v32, %v6003_v19  ;;  %v1847_v26 = vpop.f32.mrb[21].mxu1  ;;  %v6862_v19 = vld [vmem:[#allocation7 + $0x518] sm:$0xff]  }
 0x648   : > { %v1943_v20 = vadd.f32 %v1942_v33, %v1847_v26  ;;  %v6004_v21 = vpop.f32.mrb[22].mxu1  ;;  %v6860_v33 = vld [vmem:[#allocation7 + $0x508] sm:$0xff]  }
 0x649   : > { %v1962_v35 = vadd.f32 %v5224_v12, %v1950_v24  ;;  %v1850_v36 = vpop.f32.mrb[23].mxu1  ;;  %v6863_v24 = vld [vmem:[#allocation7 + $0x520] sm:$0xff]   ;;  %v6864_v26 = vld [vmem:[#allocation7 + $0x528] sm:$0xff]   ;;  %v6866_v21 = vld [vmem:[#allocation7 + $0x538] sm:$0xff]  }
 0x64a   : > { %v1961_v45 = vadd.f32 %v5224_v12, %v1943_v20  ;;  %v6865_v20 = vld [vmem:[#allocation7 + $0x530] sm:$0xff]  }
 0x64b   : > { %2183 = vst [vmem:[#allocation2 + $0x20] ss:$2 sm:$0xff] %v1962_v35 }
 0x64c   : > { %2179 = vst [vmem:[#allocation2 + $0x8] ss:$2 sm:$0xff] %v1961_v45 }
 0x65f   : > { %v6063_v46 = vpop.f32.mrb[28].mxu0 }
 0x660   : > { %v2163_v41 = vpop.f32.mrb[29].mxu0 }
 0x661   : > { %v6064_v42 = vpop.f32.mrb[30].mxu0 }
 0x662   : > { %v2166_v49 = vpop.f32.mrb[31].mxu0  ;;  %v6867_v42 = vld [vmem:[#allocation7 + $0x580] sm:$0xff]  }
 0x663   : > { %v6868_v49 = vld [vmem:[#allocation7 + $0x588] sm:$0xff]  }
 0x666   : > { %v6043_v51 = vpop.f32.mrb[24].mxu1 }
 0x667   : > { %v2171_v57 = vadd.f32 %v6063_v46, %v6043_v51  ;;  %v2068_v58 = vpop.f32.mrb[25].mxu1  ;;  %v6869_v51 = vld [vmem:[#allocation7 + $0x590] sm:$0xff]  }
 0x668   : > { %v2164_v59 = vadd.f32 %v2163_v41, %v2068_v58  ;;  %v6044_v16 = vpop.f32.mrb[26].mxu1  ;;  %v6871_v58 = vld [vmem:[#allocation7 + $0x5a0] sm:$0xff]  }
 0x669   : > { %v2177_v53 = vadd.f32 %v5224_v12, %v2171_v57  ;;  %v2071_v54 = vpop.f32.mrb[27].mxu1  ;;  %v6870_v57 = vld [vmem:[#allocation7 + $0x598] sm:$0xff]   ;;  %v6873_v16 = vld [vmem:[#allocation7 + $0x5b0] sm:$0xff]  }
 0x66a   : > { %v2176_v62 = vadd.f32 %v5224_v12, %v2164_v59  ;;  %v6872_v59 = vld [vmem:[#allocation7 + $0x5a8] sm:$0xff]   ;;  %v6883_v54 = vld [vmem:[#allocation7 + $0x640] sm:$0xff]  }
 0x66b   : > { %2185 = vst [vmem:[#allocation2 + $0x21] ss:$2 sm:$0xff] %v2177_v53  ;;  %v6874_v53 = vld [vmem:[#allocation7 + $0x5b8] sm:$0xff]  }
 0x66c   : > { %2181 = vst [vmem:[#allocation2 + $0x9] ss:$2 sm:$0xff] %v2176_v62  ;;  %v6884_v62 = vld [vmem:[#allocation7 + $0x648] sm:$0xff]  }
 0x672   : > { %v2191_v60 = vld [vmem:[#allocation2 + $0x1d] sm:$0xff]  ;;  %v2192_v63 = vld [vmem:[#allocation2 + $0x25] sm:$0xff]  ;;  %v2193_v2 = vld [vmem:[#allocation2 + $0x2d] sm:$0x3f] }
 0x673   : > { %v2765_v5 = vld [vmem:[#allocation2 + $0x28] sm:$0xff]  ;;  %2777 = vst [vmem:[#allocation2 + $0x30] sm:$0xff] %v7603_v61  ;;  %v2762_v6 = vld [vmem:[#allocation2 + $0x10] sm:$0xff]  ;;  %v2197_v10 = vmax.f32 %v2191_v60, 0.0  ;;  %v2198_v13 = vmax.f32 %v2192_v63, 0.0  ;;  %v2199_v22 = vmax.f32 %v2193_v2, 0.0 }
 0x674   : > { %v2188_v7 = vld [vmem:[#allocation2 + $0x5] sm:$0xff]  ;;  %v6647_v50 = vadd.f32 %v7616_v18, %v2765_v5  ;;  %v6640_v52 = vadd.f32 %v7616_v18, %v2762_v6  ;;  %v2189_v23 = vld [vmem:[#allocation2 + $0xd] sm:$0xff]  ;;  %v2190_v3 = vld [vmem:[#allocation2 + $0x15] sm:$0xff] }
 0x675   : > { %v2194_v29 = vmax.f32 %v2188_v7, 0.0  ;;  %v2761_v37 = vld [vmem:[#allocation2 + $0x8] sm:$0xff]  ;;  %v2195_v34 = vmax.f32 %v2189_v23, 0.0  ;;  %v2196_v4 = vmax.f32 %v2190_v3, 0.0  ;;  %2776 = vst [vmem:[#allocation2 + $0x18] sm:$0xff] %v7603_v61  ;;  %v7623_v44 = vpack.c.bf16 %v2199_v22, %v2198_v13 }
 0x676   : > { %v6633_v38 = vadd.f32 %v7616_v18, %v2761_v37  ;;  %6648 = vst [vmem:[#allocation2 + $0x28] sm:$0xff] %v6647_v50  ;;  %6641 = vst [vmem:[#allocation2 + $0x10] sm:$0xff] %v6640_v52 }
 0x677   : > { %v2200_v47 = vpack.c.bf16 %v2195_v34, %v2194_v29  ;;  %v7625_v43 = vpack.c.bf16 %v2197_v10, %v2196_v4  ;;  %v2255_v56 = vshrl.u32 %v7623_v44, 16  ;;  %v2258_v14 = vshll.u32 %v7623_v44, 16 }
 0x678   : > { %6634 = vst [vmem:[#allocation2 + $0x8] sm:$0xff] %v6633_v38  ;;  %v2497_v46 = vrot.slane %v7623_v44, 3 }
 0x679   : > { %6110 = vmatmul.mubr.bf16.vlgmr.msra.gmra.mrb[32].mxu0 %v2200_v47  ;;  %v2238_v39 = vshrl.u32 %v2200_v47, 16  ;;  %v2241_v40 = vshll.u32 %v2200_v47, 16  ;;  %v2246_v48 = vshrl.u32 %v7625_v43, 16  ;;  %v2249_v55 = vshll.u32 %v7625_v43, 16 }
 0x67a   : > { %6113 = vmatprep.mubr.msk.bf16.mxu0 %vm7144_vm4, %v7603_v61  ;;  %v2257_v9 = vrot.slane %v2255_v56, 1  ;;  %v2260_v32 = vrot.slane %v2258_v14, 2  ;;  %v2494_v35 = vrot.slane %v2200_v47, 3  ;;  %v2495_v36 = vrot.slane %v7625_v43, 3  ;;  %6150 = vmatpush3.bf16.msra.mxu0 %v6867_v42 }
 0x67b   : > { %v2240_v17 = vrot.slane %v2238_v39, 1  ;;  %v2243_v27 = vrot.slane %v2241_v40, 2  ;;  %v2248_v28 = vrot.slane %v2246_v48, 1  ;;  %v2251_v30 = vrot.slane %v2249_v55, 2  ;;  %6151 = vmatprep.subr.bf16.mxu0 %v7603_v61 }
 0x67c   : > { %v2261_v15 = vor.u32 %v2260_v32, %v2257_v9  ;;  %v2496_v45 = vsel %vm896_vm3, %v2494_v35, %v2495_v36  ;;  %v2498_v41 = vsel %vm896_vm3, %v2495_v36, %v2497_v46 }
 0x67d   : > { %v2244_v31 = vor.u32 %v2243_v27, %v2240_v17  ;;  %v2252_v0 = vor.u32 %v2251_v30, %v2248_v28  ;;  %v7633_v8 = vld [vmem:[#allocation2 + $0x2f] sm:$0x3]  ;;  %v5265_v30 = vld [vmem:[#allocation9 + $0x6] ss:$0 sm:$0xff] }
 0x67e   : > { %3364 = vst [vmem:[#allocation2 + $0x30] sm:$0xff] %v7603_v61  ;;  %6152 = vmatpush3.bf16.msra.mxu0 %v6868_v49 }
 0x67f   : > { %v2253_v25 = vsel %vm665_vm2, %v2244_v31, %v2252_v0  ;;  %v2262_v12 = vsel %vm665_vm2, %v2252_v0, %v2261_v15  ;;  %6153 = vmatprep.subr.bf16.mxu0 %v7603_v61 }
 0x680   : > { %6082 = vmatmul.mubr.bf16.vlgmr.msra.gmra.mrb[28].mxu1 %v2253_v25 }
 0x681   : > { %6122 = vmatpush3.bf16.msra.mxu1 %v6859_v1  ;;  %6114 = vmatmul.mubr.bf16.gmra.mrb[36].mxu0 %v7625_v43 }
 0x682   : > { %6123 = vmatprep.subr.bf16.mxu1 %v7603_v61  ;;  %6085 = vmatprep.mubr.msk.bf16.mxu1 %vm7144_vm4, %v7603_v61 }
 0x683   : > { %6117 = vmatprep.mubr.msk.bf16.mxu0 %vm7144_vm4, %v7603_v61  ;;  %6154 = vmatpush3.bf16.msra.mxu0 %v6869_v51 }
 0x684   : > { %6155 = vmatprep.subr.bf16.mxu0 %v7603_v61 }
 0x685   : > { %6124 = vmatpush3.bf16.msra.mxu1 %v6860_v33 }
 0x686   : > { %6125 = vmatprep.subr.bf16.mxu1 %v7603_v61 }
 0x687   : > { %6156 = vmatpush3.bf16.msra.mxu0 %v6870_v57  ;;  %v6877_v57 = vld [vmem:[#allocation7 + $0x610] sm:$0xff]  }
 0x688   : > { %6086 = vmatmul.mubr.bf16.gmra.mrb[32].mxu1 %v2262_v12  ;;  %6157 = vmatprep.subr.bf16.mxu0 %v7603_v61 }
 0x689   : > { %6126 = vmatpush3.bf16.msra.mxu1 %v6861_v11  ;;  %6118 = vmatmul.mubr.bf16.gmra.mrb[40].mxu0 %v7623_v44 }
 0x68a   : > { %6127 = vmatprep.subr.bf16.mxu1 %v7603_v61  ;;  %6089 = vmatprep.mubr.msk.bf16.mxu1 %vm7144_vm4, %v7603_v61 }
 0x68b   : > { %6165 = vmatprep.mubr.msk.bf16.mxu0 %vm7144_vm4, %v7603_v61  ;;  %6158 = vmatpush3.bf16.msra.mxu0 %v6871_v58 }
 0x68c   : > { %6159 = vmatprep.subr.bf16.mxu0 %v7603_v61 }
 0x68d   : > { %6128 = vmatpush3.bf16.msra.mxu1 %v6862_v19  ;;  %v6875_v19 = vld [vmem:[#allocation7 + $0x600] sm:$0xff]  }
 0x68e   : > { %6129 = vmatprep.subr.bf16.mxu1 %v7603_v61 }
 0x68f   : > { %6160 = vmatpush3.bf16.msra.mxu0 %v6872_v59 }
 0x690   : > { %6090 = vmatmul.mubr.bf16.gmra.mrb[36].mxu1 %v2261_v15  ;;  %6161 = vmatprep.subr.bf16.mxu0 %v7603_v61 }
 0x691   : > { %6130 = vmatpush3.bf16.msra.mxu1 %v6863_v24  ;;  %6137 = vmatprep.mubr.msk.bf16.mxu1 %vm7144_vm4, %v7603_v61 }
 0x692   : > { %6131 = vmatprep.subr.bf16.mxu1 %v7603_v61 }
 0x693   : > { %6162 = vmatpush3.bf16.msra.mxu0 %v6873_v16 }
 0x694   : > { %6163 = vmatprep.subr.bf16.mxu0 %v7603_v61 }
 0x695   : > { %6132 = vmatpush3.bf16.msra.mxu1 %v6864_v26 }
 0x696   : > { %6133 = vmatprep.subr.bf16.mxu1 %v7603_v61 }
 0x697   : > { %6164 = vmatpush3.bf16.msra.mxu0 %v6874_v53 }
 0x698   : > { %6205 = vmatprep.subr.bf16.mxu0 %v7603_v61 }
 0x699   : > { %6134 = vmatpush3.bf16.msra.mxu1 %v6865_v20 }
 0x69a   : > { %6135 = vmatprep.subr.bf16.mxu1 %v7603_v61 }
 0x69d   : > { %6136 = vmatpush3.bf16.msra.mxu1 %v6866_v21 }
 0x69e   : > { %6177 = vmatprep.subr.bf16.mxu1 %v7603_v61 }
 0x6a0   : > { %6138 = vmatmul.mubr.bf16.vlgmr.msra.gmra.mrb[40].mxu1 %v2496_v45 }
 0x6a1   : > { %6141 = vmatprep.mubr.msk.bf16.mxu1 %vm7144_vm4, %v7603_v61  ;;  %6178 = vmatpush3.bf16.msra.mxu1 %v6883_v54 }
 0x6a2   : > { %6179 = vmatprep.subr.bf16.mxu1 %v7603_v61 }
 0x6a5   : > { %6180 = vmatpush3.bf16.msra.mxu1 %v6884_v62 }
 0x6a6   : > { %6181 = vmatprep.subr.bf16.mxu1 %v7603_v61 }
 0x6a8   : > { %6142 = vmatmul.mubr.bf16.gmra.mrb[44].mxu1 %v2498_v41 }
 0x6a9   : > { %6145 = vmatprep.mubr.msk.bf16.mxu1 %vm7144_vm4, %v7603_v61 }
 0x6b0   : > { %6146 = vmatmul.mubr.bf16.gmra.mrb[48].mxu1 %v2497_v46  ;;  %v6876_v46 = vld [vmem:[#allocation7 + $0x608] sm:$0xff]  }
 0x6b1   : > { %6193 = vmatprep.mubr.msk.bf16.mxu1 %vm7144_vm4, %v7603_v61 }
 0x74c   : > { %v2452_v60 = vpop.f32.mrb[32].mxu0 }
 0x74d   : > { %v6111_v63 = vpop.f32.mrb[33].mxu0 }
 0x74e   : > { %v2455_v2 = vpop.f32.mrb[34].mxu0 }
 0x74f   : > { %v6112_v5 = vpop.f32.mrb[35].mxu0 }
 0x753   : > { %v2348_v6 = vpop.f32.mrb[28].mxu1 }
 0x754   : > { %v2453_v7 = vadd.f32 %v2452_v60, %v2348_v6  ;;  %v6083_v10 = vpop.f32.mrb[29].mxu1  ;;  %v2460_v13 = vpop.f32.mrb[36].mxu0  ;;  %v6878_v60 = vld [vmem:[#allocation7 + $0x618] sm:$0xff]   ;;  %v6880_v6 = vld [vmem:[#allocation7 + $0x628] sm:$0xff]  }
 0x755   : > { %v2351_v22 = vpop.f32.mrb[30].mxu1  ;;  %v6115_v50 = vpop.f32.mrb[37].mxu0  ;;  %v2778_v10 = vld [vmem:[#allocation2 + $0x7] sm:$0xff] }
 0x756   : > { %v2456_v52 = vadd.f32 %v2455_v2, %v2351_v22  ;;  %v6084_v23 = vpop.f32.mrb[31].mxu1  ;;  %v2463_v29 = vpop.f32.mrb[38].mxu0  ;;  %v6879_v2 = vld [vmem:[#allocation7 + $0x620] sm:$0xff]   ;;  %v6882_v22 = vld [vmem:[#allocation7 + $0x638] sm:$0xff]   ;;  %v2784_v50 = vmax.f32 %v2778_v10, 0.0 }
 0x757   : > { %v6116_v37 = vpop.f32.mrb[39].mxu0  ;;  %v6903_v10 = vld [vmem:[#allocation7 + $0x720] sm:$0xff]  }
 0x758   : > { %v6886_v37 = vld [vmem:[#allocation7 + $0x658] sm:$0xff]  }
 0x75b   : > { %v2356_v3 = vpop.f32.mrb[32].mxu1 }
 0x75c   : > { %v2461_v34 = vadd.f32 %v2460_v13, %v2356_v3  ;;  %v6087_v38 = vpop.f32.mrb[33].mxu1  ;;  %v2468_v4 = vpop.f32.mrb[40].mxu0  ;;  %v2779_v13 = vld [vmem:[#allocation2 + $0xf] sm:$0xff] }
 0x75d   : > { %v2359_v44 = vpop.f32.mrb[34].mxu1  ;;  %v6119_v47 = vpop.f32.mrb[41].mxu0  ;;  %v6887_v3 = vld [vmem:[#allocation7 + $0x660] sm:$0xff]   ;;  %v6889_v38 = vld [vmem:[#allocation7 + $0x670] sm:$0xff]  }
 0x75e   : > { %v2464_v43 = vadd.f32 %v2463_v29, %v2359_v44  ;;  %v6088_v39 = vpop.f32.mrb[35].mxu1  ;;  %v2471_v40 = vpop.f32.mrb[42].mxu0  ;;  %v6885_v29 = vld [vmem:[#allocation7 + $0x650] sm:$0xff]  }
 0x75f   : > { %v6120_v48 = vpop.f32.mrb[43].mxu0  ;;  %6182 = vmatpush3.bf16.msra.mxu1 %v6885_v29  ;;  %v7762_v29 = vld [vmem:[#allocation7 + $0x800] sm:$0xf] }
 0x760   : > { %6183 = vmatprep.subr.bf16.mxu1 %v7603_v61  ;;  %v2764_v48 = vld [vmem:[#allocation2 + $0x20] sm:$0xff] }
 0x763   : > { %v2364_v55 = vpop.f32.mrb[36].mxu1  ;;  %6184 = vmatpush3.bf16.msra.mxu1 %v6886_v37  ;;  %v7764_v37 = vld [vmem:[#allocation7 + $0x804] sm:$0xf] }
 0x764   : > { %v2469_v56 = vadd.f32 %v2468_v4, %v2364_v55  ;;  %v6091_v14 = vpop.f32.mrb[37].mxu1  ;;  %6185 = vmatprep.subr.bf16.mxu1 %v7603_v61  ;;  %v6890_v4 = vld [vmem:[#allocation7 + $0x678] sm:$0xff]  }
 0x765   : > { %v2367_v17 = vpop.f32.mrb[38].mxu1 }
 0x766   : > { %v6092_v27 = vpop.f32.mrb[39].mxu1 }
 0x767   : > { %6186 = vmatpush3.bf16.msra.mxu1 %v6887_v3 }
 0x768   : > { %6187 = vmatprep.subr.bf16.mxu1 %v7603_v61 }
 0x773   : > { %v2584_v28 = vpop.f32.mrb[40].mxu1 }
 0x774   : > { %v2606_v31 = vadd.f32 %v2584_v28, %v2453_v7  ;;  %v6139_v0 = vpop.f32.mrb[41].mxu1  ;;  %v6881_v7 = vld [vmem:[#allocation7 + $0x630] sm:$0xff]  }
 0x775   : > { %v2587_v1 = vpop.f32.mrb[42].mxu1 }
 0x776   : > { %v2619_v25 = vadd.f32 %v5265_v30, %v2606_v31  ;;  %v2607_v9 = vadd.f32 %v2587_v1, %v2456_v52  ;;  %v6140_v32 = vpop.f32.mrb[43].mxu1  ;;  %v2785_v52 = vmax.f32 %v2779_v13, 0.0  ;;  %v6904_v13 = vld [vmem:[#allocation7 + $0x728] sm:$0xff]  }
 0x778   : > { %v2620_v33 = vadd.f32 %v5265_v30, %v2607_v9  ;;  %v2624_v15 = vmax.f32 %v2619_v25, 0.0  ;;  %v7691_v23 = vpack.c.bf16 %v2785_v52, %v2784_v50  ;;  %v2789_v9 = vmax.f32 %v7633_v8, 0.0  ;;  %v6906_v50 = vld [vmem:[#allocation7 + $0x738] sm:$0xff]   ;;  %v7758_v52 = vld [vmem:[#allocation7 + $0x7c0] sm:$0xf] }
 0x779   : > { %v3427_v3 = vadd.bf16 %v7762_v29, %v7758_v52 }
 0x77a   : > { %v2625_v11 = vmax.f32 %v2620_v33, 0.0  ;;  %v2830_v14 = vshll.u32 %v7691_v23, 16 }
 0x77b   : > { %v2592_v12 = vpop.f32.mrb[44].mxu1 }
 0x77c   : > { %v2629_v24 = vpack.c.bf16 %v2625_v11, %v2624_v15  ;;  %v2608_v26 = vadd.f32 %v2592_v12, %v2461_v34  ;;  %v6143_v20 = vpop.f32.mrb[45].mxu1  ;;  %v6888_v34 = vld [vmem:[#allocation7 + $0x668] sm:$0xff]   ;;  %v2832_v0 = vrot.slane %v2830_v14, 1  ;;  %v6891_v15 = vld [vmem:[#allocation7 + $0x680] sm:$0xff]  }
 0x77d   : > { %v2595_v21 = vpop.f32.mrb[46].mxu1  ;;  %6188 = vmatpush3.bf16.msra.mxu1 %v6888_v34 }
 0x77e   : > { %v2621_v35 = vadd.f32 %v5265_v30, %v2608_v26  ;;  %v2609_v36 = vadd.f32 %v2595_v21, %v2464_v43  ;;  %v6144_v45 = vpop.f32.mrb[47].mxu1  ;;  %6166 = vmatmul.mubr.bf16.vlgmr.msra.gmra.mrb[44].mxu0 %v2629_v24  ;;  %6189 = vmatprep.subr.bf16.mxu1 %v7603_v61  ;;  %v6892_v26 = vld [vmem:[#allocation7 + $0x688] sm:$0xff]  }
 0x77f   : > { %6206 = vmatpush3.bf16.msra.mxu0 %v6875_v19  ;;  %6169 = vmatprep.mubr.msk.bf16.mxu0 %vm7144_vm4, %v7603_v61 }
 0x780   : > { %v2622_v41 = vadd.f32 %v5265_v30, %v2609_v36  ;;  %6207 = vmatprep.subr.bf16.mxu0 %v7603_v61  ;;  %v2626_v42 = vmax.f32 %v2621_v35, 0.0 }
 0x781   : > { %6190 = vmatpush3.bf16.msra.mxu1 %v6889_v38 }
 0x782   : > { %v2627_v49 = vmax.f32 %v2622_v41, 0.0  ;;  %6191 = vmatprep.subr.bf16.mxu1 %v7603_v61 }
 0x783   : > { %6208 = vmatpush3.bf16.msra.mxu0 %v6876_v46  ;;  %v2600_v51 = vpop.f32.mrb[48].mxu1  ;;  %v6893_v46 = vld [vmem:[#allocation7 + $0x690] sm:$0xff]  }
 0x784   : > { %v2610_v58 = vadd.f32 %v2600_v51, %v2469_v56  ;;  %v6147_v59 = vpop.f32.mrb[49].mxu1  ;;  %6209 = vmatprep.subr.bf16.mxu0 %v7603_v61  ;;  %v2630_v16 = vpack.c.bf16 %v2627_v49, %v2626_v42  ;;  %v2780_v56 = vld [vmem:[#allocation2 + $0x17] sm:$0xff]  ;;  %v6894_v42 = vld [vmem:[#allocation7 + $0x698] sm:$0xff]  }
 0x785   : > { %v2603_v53 = vpop.f32.mrb[50].mxu1  ;;  %6192 = vmatpush3.bf16.msra.mxu1 %v6890_v4  ;;  %v2786_v28 = vmax.f32 %v2780_v56, 0.0  ;;  %v6895_v51 = vld [vmem:[#allocation7 + $0x6a0] sm:$0xff]   ;;  %v6897_v59 = vld [vmem:[#allocation7 + $0x6b0] sm:$0xff]  }
 0x786   : > { %v2623_v54 = vadd.f32 %v5265_v30, %v2610_v58  ;;  %v6148_v62 = vpop.f32.mrb[51].mxu1  ;;  %6170 = vmatmul.mubr.bf16.gmra.mrb[48].mxu0 %v2630_v16  ;;  %6233 = vmatprep.subr.bf16.mxu1 %v7603_v61  ;;  %v6896_v58 = vld [vmem:[#allocation7 + $0x6a8] sm:$0xff]   ;;  %v6898_v16 = vld [vmem:[#allocation7 + $0x6b8] sm:$0xff]  }
 0x787   : > { %6210 = vmatpush3.bf16.msra.mxu0 %v6877_v57  ;;  %6173 = vmatprep.mubr.msk.bf16.mxu0 %vm7144_vm4, %v7603_v61 }
 0x788   : > { %v2628_v63 = vmax.f32 %v2623_v54, 0.0  ;;  %6211 = vmatprep.subr.bf16.mxu0 %v7603_v61  ;;  %v3081_v54 = vrot.slane %v7691_v23, 1 }
 0x78a   : > { %v2631_v5 = vpack.c.bf16 %v2628_v63, %v2628_v63 }
 0x78b   : > { %6212 = vmatpush3.bf16.msra.mxu0 %v6878_v60 }
 0x78c   : > { %6213 = vmatprep.subr.bf16.mxu0 %v7603_v61 }
 0x78e   : > { %6174 = vmatmul.mubr.bf16.gmra.mrb[52].mxu0 %v2631_v5  ;;  %v6900_v5 = vld [vmem:[#allocation7 + $0x708] sm:$0xff]  }
 0x78f   : > { %6214 = vmatpush3.bf16.msra.mxu0 %v6879_v2  ;;  %6221 = vmatprep.mubr.msk.bf16.mxu0 %vm7144_vm4, %v7603_v61  ;;  %v6899_v2 = vld [vmem:[#allocation7 + $0x700] sm:$0xff]  }
 0x790   : > { %6215 = vmatprep.subr.bf16.mxu0 %v7603_v61 }
 0x793   : > { %6216 = vmatpush3.bf16.msra.mxu0 %v6880_v6  ;;  %v6901_v6 = vld [vmem:[#allocation7 + $0x710] sm:$0xff]  }
 0x794   : > { %6217 = vmatprep.subr.bf16.mxu0 %v7603_v61 }
 0x797   : > { %6218 = vmatpush3.bf16.msra.mxu0 %v6881_v7  ;;  %v6902_v7 = vld [vmem:[#allocation7 + $0x718] sm:$0xff]  }
 0x798   : > { %6219 = vmatprep.subr.bf16.mxu0 %v7603_v61 }
 0x79b   : > { %6220 = vmatpush3.bf16.msra.mxu0 %v6882_v22  ;;  %v6905_v22 = vld [vmem:[#allocation7 + $0x730] sm:$0xff]  }
 0x79c   : > { %6261 = vmatprep.subr.bf16.mxu0 %v7603_v61 }
 0x79e   : > { %6222 = vmatmul.mubr.bf16.vlgmr.msra.gmra.mrb[56].mxu0 %v7691_v23 }
 0x79f   : > { %6225 = vmatprep.mubr.msk.bf16.mxu0 %vm7144_vm4, %v7603_v61  ;;  %6262 = vmatpush3.bf16.msra.mxu0 %v6899_v2 }
 0x7a0   : > { %6263 = vmatprep.subr.bf16.mxu0 %v7603_v61 }
 0x7a3   : > { %6264 = vmatpush3.bf16.msra.mxu0 %v6900_v5 }
 0x7a4   : > { %6265 = vmatprep.subr.bf16.mxu0 %v7603_v61 }
 0x7a7   : > { %6266 = vmatpush3.bf16.msra.mxu0 %v6901_v6 }
 0x7a8   : > { %6267 = vmatprep.subr.bf16.mxu0 %v7603_v61 }
 0x7ab   : > { %6268 = vmatpush3.bf16.msra.mxu0 %v6902_v7 }
 0x7ac   : > { %6269 = vmatprep.subr.bf16.mxu0 %v7603_v61 }
 0x7af   : > { %6270 = vmatpush3.bf16.msra.mxu0 %v6903_v10  ;;  %v7788_v10 = vld [vmem:[#allocation7 + $0x790] sm:$0xf] }
 0x7b0   : > { %6271 = vmatprep.subr.bf16.mxu0 %v7603_v61 }
 0x7b3   : > { %6272 = vmatpush3.bf16.msra.mxu0 %v6904_v13  ;;  %v7790_v13 = vld [vmem:[#allocation7 + $0x794] sm:$0xf] }
 0x7b4   : > { %6273 = vmatprep.subr.bf16.mxu0 %v7603_v61 }
 0x7b7   : > { %6274 = vmatpush3.bf16.msra.mxu0 %v6905_v22 }
 0x7b8   : > { %6275 = vmatprep.subr.bf16.mxu0 %v7603_v61 }
 0x7bb   : > { %6276 = vmatpush3.bf16.msra.mxu0 %v6906_v50 }
 0x7bc   : > { %6317 = vmatprep.subr.bf16.mxu0 %v7603_v61 }
 0x859   : > { %v2747_v44 = vpop.f32.mrb[48].mxu0 }
 0x85a   : > { %v6171_v47 = vpop.f32.mrb[49].mxu0 }
 0x85b   : > { %v2750_v43 = vpop.f32.mrb[50].mxu0 }
 0x85c   : > { %v2751_v39 = vadd.f32 %v7616_v18, %v2750_v43  ;;  %v6172_v40 = vpop.f32.mrb[51].mxu0  ;;  %v2828_v18 = vshrl.u32 %v7691_v23, 16  ;;  %v7760_v23 = vld [vmem:[#allocation7 + $0x7c4] sm:$0xf] }
 0x85d   : > { %v3428_v34 = vadd.bf16 %v7764_v37, %v7760_v23 }
 0x85e   : > { %v7704_v55 = vadd.f32 %v2764_v48, %v2751_v39  ;;  %v2833_v32 = vor.u32 %v2832_v0, %v2828_v18 }
 0x85f   : > { %v5309_v38 = vcombine.low %v3427_v3, %v3428_v34  ;;  %v5319_v34 = vcombine.low %v7788_v10, %v7790_v13 }
 0x860   : > { %2774 = vst [vmem:[#allocation2 + $0x20] sm:$0xff] %v7704_v55 }
 0x867   : > { %v2781_v17 = vld [vmem:[#allocation2 + $0x1f] sm:$0xff]  ;;  %v2782_v27 = vld [vmem:[#allocation2 + $0x27] sm:$0xff] }
 0x868   : > { %v2787_v30 = vmax.f32 %v2781_v17, 0.0  ;;  %3363 = vst [vmem:[#allocation2 + $0x18] sm:$0xff] %v7603_v61  ;;  %v2788_v1 = vmax.f32 %v2782_v27, 0.0 }
 0x86a   : > { %v7709_v31 = vpack.c.bf16 %v2787_v30, %v2786_v28  ;;  %v2792_v11 = vpack.c.bf16 %v2789_v9, %v2788_v1 }
 0x86c   : > { %6226 = vmatmul.mubr.bf16.gmra.mrb[60].mxu0 %v7709_v31  ;;  %v2835_v25 = vshll.u32 %v7709_v31, 16  ;;  %v2839_v8 = vshrl.u32 %v7709_v31, 16  ;;  %v2843_v20 = vshll.u32 %v2792_v11, 16  ;;  %v2847_v49 = vshrl.u32 %v2792_v11, 16 }
 0x86d   : > { %6229 = vmatprep.mubr.msk.bf16.mxu0 %vm7144_vm4, %v7603_v61  ;;  %v3082_v53 = vrot.slane %v7709_v31, 1  ;;  %v3084_v60 = vrot.slane %v2792_v11, 1 }
 0x86e   : > { %v2837_v33 = vrot.slane %v2835_v25, 1  ;;  %v2845_v45 = vrot.slane %v2843_v20, 1 }
 0x86f   : > { %v3083_v62 = vsel %vm498_vm1, %v3081_v54, %v3082_v53  ;;  %v3085_v63 = vsel %vm498_vm1, %v3082_v53, %v3084_v60  ;;  %v7779_v54 = vld [vmem:[#allocation7 + $0x788] sm:$0xf] }
 0x870   : > { %v2838_v12 = vsel %vm269_vm0, %v2833_v32, %v2837_v33  ;;  %v2841_v36 = vor.u32 %v2839_v8, %v2837_v33  ;;  %v2849_v57 = vor.u32 %v2847_v49, %v2845_v45 }
 0x871   : > { %v7718_v19 = vpop.f32.mrb[56].mxu0  ;;  %6194 = vmatmul.mubr.bf16.vlgmr.msra.gmra.mrb[52].mxu1 %v2838_v12 }
 0x872   : > { %v6223_v24 = vpop.f32.mrb[57].mxu0  ;;  %6234 = vmatpush3.bf16.msra.mxu1 %v6891_v15  ;;  %6197 = vmatprep.mubr.msk.bf16.mxu1 %vm7144_vm4, %v7603_v61  ;;  %v2846_v41 = vsel %vm269_vm0, %v2841_v36, %v2845_v45 }
 0x873   : > { %v7723_v21 = vpop.f32.mrb[58].mxu0  ;;  %6235 = vmatprep.subr.bf16.mxu1 %v7603_v61 }
 0x874   : > { %v6224_v35 = vpop.f32.mrb[59].mxu0  ;;  %6230 = vmatmul.mubr.bf16.gmra.mrb[64].mxu0 %v2792_v11 }
 0x875   : > { %6277 = vmatprep.mubr.msk.bf16.mxu0 %vm7144_vm4, %v7603_v61 }
 0x876   : > { %6236 = vmatpush3.bf16.msra.mxu1 %v6892_v26  ;;  %v5299_v26 = vld [vmem:[#allocation9 + $0x8] ss:$0 sm:$0xff] }
 0x877   : > { %6237 = vmatprep.subr.bf16.mxu1 %v7603_v61 }
 0x879   : > { %6198 = vmatmul.mubr.bf16.gmra.mrb[56].mxu1 %v2846_v41  ;;  %v7773_v41 = vld [vmem:[#allocation7 + $0x780] sm:$0xf] }
 0x87a   : > { %6238 = vmatpush3.bf16.msra.mxu1 %v6893_v46  ;;  %6201 = vmatprep.mubr.msk.bf16.mxu1 %vm7144_vm4, %v7603_v61 }
 0x87b   : > { %6239 = vmatprep.subr.bf16.mxu1 %v7603_v61 }
 0x87e   : > { %6240 = vmatpush3.bf16.msra.mxu1 %v6894_v42  ;;  %v7775_v42 = vld [vmem:[#allocation7 + $0x784] sm:$0xf] }
 0x87f   : > { %6241 = vmatprep.subr.bf16.mxu1 %v7603_v61 }
 0x881   : > { %6202 = vmatmul.mubr.bf16.gmra.mrb[60].mxu1 %v2849_v57 }
 0x882   : > { %6242 = vmatpush3.bf16.msra.mxu1 %v6895_v51  ;;  %6249 = vmatprep.mubr.msk.bf16.mxu1 %vm7144_vm4, %v7603_v61 }
 0x883   : > { %6243 = vmatprep.subr.bf16.mxu1 %v7603_v61 }
 0x886   : > { %6244 = vmatpush3.bf16.msra.mxu1 %v6896_v58  ;;  %v5317_v58 = vcombine.low %v7773_v41, %v7775_v42 }
 0x887   : > { %6245 = vmatprep.subr.bf16.mxu1 %v7603_v61 }
 0x88a   : > { %6246 = vmatpush3.bf16.msra.mxu1 %v6897_v59 }
 0x88b   : > { %6247 = vmatprep.subr.bf16.mxu1 %v7603_v61 }
 0x88e   : > { %6248 = vmatpush3.bf16.msra.mxu1 %v6898_v16 }
 0x88f   : > { %6289 = vmatprep.subr.bf16.mxu1 %v7603_v61 }
 0x891   : > { %6250 = vmatmul.mubr.bf16.vlgmr.msra.gmra.mrb[64].mxu1 %v3083_v62  ;;  %v7781_v62 = vld [vmem:[#allocation7 + $0x78c] sm:$0xf] }
 0x892   : > { %6253 = vmatprep.mubr.msk.bf16.mxu1 %vm7144_vm4, %v7603_v61  ;;  %6290 = vmatpush3.bf16.msra.mxu1 %v5309_v38  ;;  %v5318_v6 = vcombine.low %v7779_v54, %v7781_v62 }
 0x893   : > { %6291 = vmatprep.subr.bf16.mxu1 %v7603_v61 }
 0x899   : > { %6254 = vmatmul.mubr.bf16.gmra.mrb[68].mxu1 %v3085_v63 }
 0x89a   : > { %6257 = vmatprep.mubr.msk.bf16.mxu1 %vm7144_vm4, %v7603_v61 }
 0x8a1   : > { %6258 = vmatmul.mubr.bf16.gmra.mrb[72].mxu1 %v3084_v60 }
 0x8a2   : > { %6305 = vmatprep.mubr.msk.bf16.mxu1 %vm7144_vm4, %v7603_v61 }
 0x93f   : > { %v3047_v4 = vpop.f32.mrb[60].mxu0 }
 0x940   : > { %v6227_v44 = vpop.f32.mrb[61].mxu0 }
 0x941   : > { %v3050_v47 = vpop.f32.mrb[62].mxu0 }
 0x942   : > { %v6228_v43 = vpop.f32.mrb[63].mxu0 }
 0x943   : > { %v7797_v43 = vld [vmem:[#allocation7 + $0x79c] sm:$0xf] }
 0x944   : > { %v2935_v39 = vpop.f32.mrb[52].mxu1 }
 0x945   : > { %v3040_v40 = vadd.f32 %v7718_v19, %v2935_v39  ;;  %v6195_v48 = vpop.f32.mrb[53].mxu1 }
 0x946   : > { %v2938_v56 = vpop.f32.mrb[54].mxu1 }
 0x947   : > { %v3043_v14 = vadd.f32 %v7723_v21, %v2938_v56  ;;  %v6196_v17 = vpop.f32.mrb[55].mxu1  ;;  %v3055_v27 = vpop.f32.mrb[64].mxu0 }
 0x948   : > { %v6231_v28 = vpop.f32.mrb[65].mxu0  ;;  %v7804_v17 = vld [vmem:[#allocation7 + $0x7a0] sm:$0xf] }
 0x949   : > { %v3058_v30 = vpop.f32.mrb[66].mxu0 }
 0x94a   : > { %v6232_v31 = vpop.f32.mrb[67].mxu0 }
 0x94b   : > { %v3394_v31 = vld [vmem:[#allocation7 + $0x7c8] sm:$0xf] }
 0x94c   : > { %v2943_v0 = vpop.f32.mrb[56].mxu1 }
 0x94d   : > { %v3048_v1 = vadd.f32 %v3047_v4, %v2943_v0  ;;  %v6199_v18 = vpop.f32.mrb[57].mxu1  ;;  %v3395_v0 = vld [vmem:[#allocation7 + $0x7cc] sm:$0xf] }
 0x94e   : > { %v2946_v25 = vpop.f32.mrb[58].mxu1  ;;  %v7816_v18 = vld [vmem:[#allocation7 + $0x80c] sm:$0xf] }
 0x94f   : > { %v3051_v9 = vadd.f32 %v3050_v47, %v2946_v25  ;;  %v6200_v32 = vpop.f32.mrb[59].mxu1  ;;  %v7795_v47 = vld [vmem:[#allocation7 + $0x798] sm:$0xf] }
 0x950   : > { %v5320_v56 = vcombine.low %v7795_v47, %v7797_v43  ;;  %v7820_v32 = vld [vmem:[#allocation7 + $0x7a8] sm:$0xf] }
 0x954   : > { %v2951_v33 = vpop.f32.mrb[60].mxu1 }
 0x955   : > { %v3056_v15 = vadd.f32 %v3055_v27, %v2951_v33  ;;  %v6203_v11 = vpop.f32.mrb[61].mxu1  ;;  %v7806_v27 = vld [vmem:[#allocation7 + $0x7a4] sm:$0xf]  ;;  %v7822_v33 = vld [vmem:[#allocation7 + $0x7ac] sm:$0xf] }
 0x956   : > { %v2954_v12 = vpop.f32.mrb[62].mxu1  ;;  %v5321_v28 = vcombine.low %v7804_v17, %v7806_v27  ;;  %v5322_v11 = vcombine.low %v7820_v32, %v7822_v33 }
 0x957   : > { %v6204_v19 = vpop.f32.mrb[63].mxu1  ;;  %v7826_v12 = vld [vmem:[#allocation7 + $0x7d0] sm:$0xf] }
 0x958   : > { %v7828_v19 = vld [vmem:[#allocation7 + $0x7d4] sm:$0xf] }
 0x964   : > { %v3171_v24 = vpop.f32.mrb[64].mxu1 }
 0x965   : > { %v3193_v8 = vadd.f32 %v3171_v24, %v3040_v40  ;;  %v6251_v20 = vpop.f32.mrb[65].mxu1  ;;  %v7830_v24 = vld [vmem:[#allocation7 + $0x810] sm:$0xf] }
 0x966   : > { %v3174_v21 = vpop.f32.mrb[66].mxu1 }
 0x967   : > { %v3206_v35 = vadd.f32 %v5299_v26, %v3193_v8  ;;  %v3194_v36 = vadd.f32 %v3174_v21, %v3043_v14  ;;  %v6252_v45 = vpop.f32.mrb[67].mxu1  ;;  %v3431_v8 = vadd.bf16 %v7830_v24, %v7826_v12  ;;  %v7840_v21 = vld [vmem:[#allocation7 + $0x7b0] sm:$0xf] }
 0x969   : > { %v3207_v46 = vadd.f32 %v5299_v26, %v3194_v36  ;;  %v3211_v49 = vmax.f32 %v3206_v35, 0.0  ;;  %v7842_v35 = vld [vmem:[#allocation7 + $0x7b4] sm:$0xf] }
 0x96a   : > { %v5323_v45 = vcombine.low %v7840_v21, %v7842_v35 }
 0x96b   : > { %v3212_v51 = vmax.f32 %v3207_v46, 0.0  ;;  %v3398_v46 = vld [vmem:[#allocation7 + $0x7d8] sm:$0xf] }
 0x96c   : > { %v3179_v57 = vpop.f32.mrb[68].mxu1 }
 0x96d   : > { %v3216_v59 = vpack.c.bf16 %v3212_v51, %v3211_v49  ;;  %v3195_v16 = vadd.f32 %v3179_v57, %v3048_v1  ;;  %v6255_v53 = vpop.f32.mrb[69].mxu1  ;;  %v7814_v1 = vld [vmem:[#allocation7 + $0x808] sm:$0xf]  ;;  %v3399_v49 = vld [vmem:[#allocation7 + $0x7dc] sm:$0xf] }
 0x96e   : > { %v3182_v60 = vpop.f32.mrb[70].mxu1  ;;  %v3429_v25 = vadd.bf16 %v7814_v1, %v3394_v31  ;;  %v7846_v51 = vld [vmem:[#allocation7 + $0x818] sm:$0xf]  ;;  %v7848_v57 = vld [vmem:[#allocation7 + $0x81c] sm:$0xf] }
 0x96f   : > { %v3208_v63 = vadd.f32 %v5299_v26, %v3195_v16  ;;  %v3196_v2 = vadd.f32 %v3182_v60, %v3051_v9  ;;  %v6256_v5 = vpop.f32.mrb[71].mxu1  ;;  %6278 = vmatmul.mubr.bf16.vlgmr.msra.gmra.mrb[44].mxu0 %v3216_v59  ;;  %v3430_v9 = vadd.bf16 %v7816_v18, %v3395_v0  ;;  %v7852_v59 = vld [vmem:[#allocation2] sm:$0xff]  ;;  %v7856_v16 = vld [vmem:[#allocation7 + $0x7b8] sm:$0xf]  ;;  %v7858_v53 = vld [vmem:[#allocation7 + $0x7bc] sm:$0xf] }
 0x970   : > { %6281 = vmatprep.mubr.msk.bf16.mxu0 %vm7144_vm4, %v7603_v61  ;;  %6318 = vmatpush3.bf16.msra.mxu0 %v5317_v58  ;;  %v3433_v58 = vadd.bf16 %v7846_v51, %v3398_v46  ;;  %v3401_v5 = vld [vmem:[#allocation7 + $0x7e4] sm:$0xf] }
 0x971   : > { %v3209_v7 = vadd.f32 %v5299_v26, %v3196_v2  ;;  %6319 = vmatprep.subr.bf16.mxu0 %v7603_v61  ;;  %v3213_v22 = vmax.f32 %v3208_v63, 0.0  ;;  %v5324_v63 = vcombine.low %v7856_v16, %v7858_v53  ;;  %v3400_v2 = vld [vmem:[#allocation7 + $0x7e0] sm:$0xf] }
 0x973   : > { %v3214_v50 = vmax.f32 %v3209_v7, 0.0  ;;  %v7864_v7 = vld [vmem:[#allocation7 + $0x824] sm:$0xf] }
 0x974   : > { %v3187_v3 = vpop.f32.mrb[72].mxu1  ;;  %6320 = vmatpush3.bf16.msra.mxu0 %v5318_v6  ;;  %v7862_v6 = vld [vmem:[#allocation7 + $0x820] sm:$0xf] }
 0x975   : > { %v3197_v38 = vadd.f32 %v3187_v3, %v3056_v15  ;;  %v6259_v4 = vpop.f32.mrb[73].mxu1  ;;  %v3217_v44 = vpack.c.bf16 %v3214_v50, %v3213_v22  ;;  %6321 = vmatprep.subr.bf16.mxu0 %v7603_v61  ;;  %v5310_v15 = vcombine.low %v3429_v25, %v3430_v9  ;;  %v3435_v22 = vadd.bf16 %v7862_v6, %v3400_v2  ;;  %v3405_v25 = vld [vmem:[#allocation7 + $0x7f4] sm:$0xf]  ;;  %v7881_v9 = vld [vmem:[#allocation7 + $0x830] sm:$0xf] }
 0x976   : > { %v3190_v39 = vpop.f32.mrb[74].mxu1  ;;  %v3436_v50 = vadd.bf16 %v7864_v7, %v3401_v5  ;;  %v7870_v4 = vld [vmem:[#allocation7 + $0x828] sm:$0xf] }
 0x977   : > { %v3210_v40 = vadd.f32 %v5299_v26, %v3197_v38  ;;  %v6260_v48 = vpop.f32.mrb[75].mxu1  ;;  %6282 = vmatmul.mubr.bf16.gmra.mrb[68].mxu0 %v3217_v44  ;;  %v7832_v26 = vld [vmem:[#allocation7 + $0x814] sm:$0xf]  ;;  %6292 = vmatpush3.bf16.msra.mxu1 %v5310_v15  ;;  %v3403_v38 = vld [vmem:[#allocation7 + $0x7ec] sm:$0xf] }
 0x978   : > { %6285 = vmatprep.mubr.msk.bf16.mxu0 %vm7144_vm4, %v7603_v61  ;;  %6322 = vmatpush3.bf16.msra.mxu0 %v5319_v34  ;;  %v3432_v20 = vadd.bf16 %v7832_v26, %v7828_v19  ;;  %v5313_v3 = vcombine.low %v3435_v22, %v3436_v50  ;;  %v3402_v34 = vld [vmem:[#allocation7 + $0x7e8] sm:$0xf]  ;;  %v7872_v44 = vld [vmem:[#allocation7 + $0x82c] sm:$0xf]  ;;  %v3687_v48 = vadd.bf16 %v3394_v31, %v7779_v54  ;;  %v7883_v15 = vld [vmem:[#allocation7 + $0x834] sm:$0xf] }
 0x979   : > { %v3215_v14 = vmax.f32 %v3210_v40, 0.0  ;;  %6323 = vmatprep.subr.bf16.mxu0 %v7603_v61  ;;  %6293 = vmatprep.subr.bf16.mxu1 %v7603_v61  ;;  %v3437_v39 = vadd.bf16 %v7870_v4, %v3402_v34  ;;  %v3438_v40 = vadd.bf16 %v7872_v44, %v3403_v38  ;;  %v3690_v54 = vadd.bf16 %v7828_v19, %v7790_v13 }
 0x97a   : > { %v5311_v36 = vcombine.low %v3431_v8, %v3432_v20  ;;  %v3440_v8 = vadd.bf16 %v7883_v15, %v3405_v25  ;;  %v3689_v20 = vadd.bf16 %v7826_v12, %v7788_v10  ;;  %v3691_v10 = vadd.bf16 %v3398_v46, %v7795_v47 }
 0x97b   : > { %v3218_v30 = vpack.c.bf16 %v3215_v14, %v3215_v14  ;;  %v5314_v14 = vcombine.low %v3437_v39, %v3438_v40  ;;  %v3692_v13 = vadd.bf16 %v3399_v49, %v7797_v43  ;;  %v3694_v22 = vadd.bf16 %v3401_v5, %v7806_v27  ;;  %v6635_v40 = vld [vmem:[#allocation2 + $0x8] sm:$0xff] }
 0x97c   : > { %6324 = vmatpush3.bf16.msra.mxu0 %v5320_v56  ;;  %6294 = vmatpush3.bf16.msra.mxu1 %v5311_v36  ;;  %v3688_v56 = vadd.bf16 %v3395_v0, %v7781_v62  ;;  %v7892_v31 = vcombine.low %v3689_v20, %v3690_v54  ;;  %v3406_v0 = vld [vmem:[#allocation7 + $0x7f8] sm:$0xf]  ;;  %v3407_v36 = vld [vmem:[#allocation7 + $0x7fc] sm:$0xf]  ;;  %v3696_v47 = vadd.bf16 %v3403_v38, %v7822_v33 }
 0x97d   : > { %6325 = vmatprep.subr.bf16.mxu0 %v7603_v61  ;;  %6295 = vmatprep.subr.bf16.mxu1 %v7852_v59  ;;  %v7903_v19 = vcombine.low %v3691_v10, %v3692_v13  ;;  %v5327_v43 = vcombine.low %v7814_v1, %v7816_v18  ;;  %v3698_v39 = vadd.bf16 %v3405_v25, %v7842_v35 }
 0x97e   : > { %v3700_v33 = vadd.bf16 %v3407_v36, %v7858_v53  ;;  %v5332_v35 = vcombine.low %v7881_v9, %v7883_v15  ;;  %v6927_v15 = vld [vmem:[#allocation7 + $0x888] sm:$0xff]  }
 0x97f   : > { %6286 = vmatmul.mubr.bf16.gmra.mrb[52].mxu0 %v3218_v30  ;;  %v3404_v30 = vld [vmem:[#allocation7 + $0x7f0] sm:$0xf] }
 0x980   : > { %6326 = vmatpush3.bf16.msra.mxu0 %v5321_v28  ;;  %6333 = vmatprep.mubr.msk.bf16.mxu0 %vm7144_vm4, %v7603_v61  ;;  %v7879_v28 = vcombine.low %v3687_v48, %v3688_v56  ;;  %v5300_v48 = vld [vmem:[#allocation9 + $0x9] ss:$0 sm:$0xff] }
 0x981   : > { %6327 = vmatprep.subr.bf16.mxu0 %v7603_v61  ;;  %v6636_v56 = vadd.f32 %v6635_v40, %v5300_v48 }
 0x984   : > { %6328 = vmatpush3.bf16.msra.mxu0 %v5322_v11  ;;  %v3439_v11 = vadd.bf16 %v7881_v9, %v3404_v30  ;;  %v6926_v9 = vld [vmem:[#allocation7 + $0x850] sm:$0xff]  }
 0x985   : > { %6329 = vmatprep.subr.bf16.mxu0 %v7603_v61  ;;  %v3434_v61 = vadd.bf16 %v7848_v57, %v3399_v49  ;;  %v3697_v49 = vadd.bf16 %v3404_v30, %v7840_v21  ;;  %v5331_v21 = vcombine.low %v7870_v4, %v7872_v44  ;;  %v6974_v30 = vld [vmem:[#allocation2 + $0x10] sm:$0xff]  ;;  %v6924_v4 = vld [vmem:[#allocation7 + $0x848] sm:$0xff]  }
 0x986   : > { %v5315_v62 = vcombine.low %v3439_v11, %v3440_v8  ;;  %v6643_v25 = vadd.f32 %v6974_v30, %v5300_v48  ;;  %v6925_v44 = vld [vmem:[#allocation7 + $0x880] sm:$0xff]  }
 0x987   : > { %v5312_v60 = vcombine.low %v3433_v58, %v3434_v61  ;;  %v7896_v58 = vld [vmem:[#allocation7 + $0x83c] sm:$0xf]  ;;  %v7920_v27 = vcombine.low %v3697_v49, %v3698_v39 }
 0x988   : > { %6330 = vmatpush3.bf16.msra.mxu0 %v5323_v45  ;;  %v7894_v45 = vld [vmem:[#allocation7 + $0x838] sm:$0xf] }
 0x989   : > { %6331 = vmatprep.subr.bf16.mxu0 %v7852_v59  ;;  %6296 = vmatpush3.bf16.msra.mxu1 %v5312_v60  ;;  %v3441_v61 = vadd.bf16 %v7894_v45, %v3406_v0  ;;  %v3442_v60 = vadd.bf16 %v7896_v58, %v3407_v36  ;;  %v5333_v38 = vcombine.low %v7894_v45, %v7896_v58  ;;  %v6928_v45 = vld [vmem:[#allocation7 + $0x858] sm:$0xff]   ;;  %v6929_v58 = vld [vmem:[#allocation7 + $0x890] sm:$0xff]  }
 0x98a   : > { %6297 = vmatprep.subr.bf16.mxu1 %v7852_v59 }
 0x98b   : > { %v5316_v12 = vcombine.low %v3441_v61, %v3442_v60 }
 0x98c   : > { %6332 = vmatpush3.bf16.msra.mxu0 %v5324_v63  ;;  %v3693_v63 = vadd.bf16 %v3400_v2, %v7804_v17  ;;  %v5328_v17 = vcombine.low %v7830_v24, %v7832_v26  ;;  %v5329_v2 = vcombine.low %v7846_v51, %v7848_v57 }
 0x98d   : > { %6373 = vmatprep.subr.bf16.mxu0 %v7852_v59  ;;  %6298 = vmatpush3.bf16.msra.mxu1 %v5313_v3  ;;  %v3695_v3 = vadd.bf16 %v3402_v34, %v7820_v32  ;;  %v3699_v32 = vadd.bf16 %v3406_v0, %v7856_v16  ;;  %v5330_v34 = vcombine.low %v7862_v6, %v7864_v7  ;;  %v6923_v7 = vld [vmem:[#allocation7 + $0x840] sm:$0xff]  }
 0x98e   : > { %6299 = vmatprep.subr.bf16.mxu1 %v7852_v59  ;;  %v7908_v50 = vcombine.low %v3693_v63, %v3694_v22  ;;  %v3686_v0 = vadd.bf16 %v7760_v23, %v7775_v42  ;;  %v6649_v22 = vld [vmem:[#allocation2 + $0x28] sm:$0xff] }
 0x98f   : > { %v7914_v46 = vcombine.low %v3695_v3, %v3696_v47  ;;  %v7926_v5 = vcombine.low %v3699_v32, %v3700_v33  ;;  %v6650_v49 = vadd.f32 %v6649_v22, %v5300_v48 }
 0x991   : > { %6300 = vmatpush3.bf16.msra.mxu1 %v5314_v14 }
 0x992   : > { %6301 = vmatprep.subr.bf16.mxu1 %v7852_v59 }
 0x995   : > { %6302 = vmatpush3.bf16.msra.mxu1 %v5315_v62  ;;  %v3685_v62 = vadd.bf16 %v7758_v52, %v7773_v41 }
 0x996   : > { %6303 = vmatprep.subr.bf16.mxu1 %v7852_v59 }
 0x997   : > { %v5334_v63 = vcombine.low %v3685_v62, %v3686_v0 }
 0x999   : > { %6304 = vmatpush3.bf16.msra.mxu1 %v5316_v12 }
 0x99a   : > { %6345 = vmatprep.subr.bf16.mxu1 %v7852_v59 }
 0xa42   : > { %v3326_v16 = vpop.f32.mrb[44].mxu0 }
 0xa43   : > { %v6639_v14 = vadd.f32 %v6636_v56, %v3326_v16  ;;  %v6279_v53 = vpop.f32.mrb[45].mxu0 }
 0xa44   : > { %v3329_v11 = vpop.f32.mrb[46].mxu0 }
 0xa45   : > { %3358 = vst [vmem:[#allocation2 + $0x8] sm:$0xff] %v6639_v14  ;;  %v6646_v8 = vadd.f32 %v6643_v25, %v3329_v11  ;;  %v6280_v20 = vpop.f32.mrb[47].mxu0  ;;  %v5326_v25 = vcombine.low %v7762_v29, %v7764_v37 }
 0xa47   : > { %3359 = vst [vmem:[#allocation2 + $0x10] sm:$0xff] %v6646_v8 }
 0xa4a   : > { %v3334_v54 = vpop.f32.mrb[68].mxu0 }
 0xa4b   : > { %v6283_v36 = vpop.f32.mrb[69].mxu0 }
 0xa4c   : > { %v3337_v61 = vpop.f32.mrb[70].mxu0  ;;  %v3365_v13 = vld [vmem:[#allocation2 + $0x7] sm:$0xff] }
 0xa4d   : > { %v3338_v60 = vadd.f32 %v5300_v48, %v3337_v61  ;;  %v6284_v10 = vpop.f32.mrb[71].mxu0 }
 0xa4e   : > { %v3366_v12 = vld [vmem:[#allocation2 + $0xf] sm:$0xff]  ;;  %v3367_v32 = vld [vmem:[#allocation2 + $0x17] sm:$0xff] }
 0xa4f   : > { %v3356_v3 = vadd.f32 %v3338_v60, %v7704_v55  ;;  %v7941_v47 = vpack.c.bf16 %v3366_v12, %v3365_v13  ;;  %v8044_v10 = vld [vmem:[#allocation9 + $0xa] ss:$0 sm:$0xff] }
 0xa51   : > { %3361 = vst [vmem:[#allocation2 + $0x20] sm:$0xff] %v3356_v3  ;;  %6334 = vmatmul.mubr.bf16.vlgmr.msra.gmra.mrb[72].mxu0 %v7941_v47  ;;  %v3446_v55 = vshll.u32 %v7941_v47, 16  ;;  %v3444_v56 = vshrl.u32 %v7941_v47, 16  ;;  %v3704_v26 = vrot.slane %v7941_v47, 1 }
 0xa52   : > { %6374 = vmatpush3.bf16.msra.mxu0 %v5334_v63  ;;  %v3342_v52 = vpop.f32.mrb[52].mxu0  ;;  %6337 = vmatprep.mubr.msk.bf16.mxu0 %vm7144_vm4, %v7852_v59 }
 0xa53   : > { %v6653_v23 = vadd.f32 %v6650_v49, %v3342_v52  ;;  %v6287_v41 = vpop.f32.mrb[53].mxu0  ;;  %6375 = vmatprep.subr.bf16.mxu0 %v7852_v59  ;;  %v3448_v48 = vrot.slane %v3446_v55, 1 }
 0xa54   : > { %v3345_v42 = vpop.f32.mrb[54].mxu0 }
 0xa55   : > { %3362 = vst [vmem:[#allocation2 + $0x28] sm:$0xff] %v6653_v23  ;;  %v6288_v39 = vpop.f32.mrb[55].mxu0  ;;  %v3449_v53 = vor.u32 %v3448_v48, %v3444_v56 }
 0xa56   : > { %6376 = vmatpush3.bf16.msra.mxu0 %v7879_v28 }
 0xa57   : > { %6377 = vmatprep.subr.bf16.mxu0 %v7852_v59 }
 0xa58   : > { %v3368_v33 = vld [vmem:[#allocation2 + $0x1f] sm:$0xff] }
 0xa59   : > { %v7950_v40 = vpack.c.bf16 %v3368_v33, %v3367_v32 }
 0xa5a   : > { %6378 = vmatpush3.bf16.msra.mxu0 %v7892_v31 }
 0xa5b   : > { %6338 = vmatmul.mubr.bf16.gmra.mrb[76].mxu0 %v7950_v40  ;;  %6379 = vmatprep.subr.bf16.mxu0 %v7852_v59  ;;  %v3451_v16 = vshll.u32 %v7950_v40, 16  ;;  %v3455_v29 = vshrl.u32 %v7950_v40, 16  ;;  %v3705_v24 = vrot.slane %v7950_v40, 1 }
 0xa5c   : > { %6341 = vmatprep.mubr.msk.bf16.mxu0 %vm7144_vm4, %v7852_v59  ;;  %v3369_v28 = vld [vmem:[#allocation2 + $0x27] sm:$0xff]  ;;  %v3370_v14 = vld [vmem:[#allocation2 + $0x2f] sm:$0x3] }
 0xa5d   : > { %v3453_v30 = vrot.slane %v3451_v16, 1  ;;  %v3373_v11 = vpack.c.bf16 %v3370_v14, %v3369_v28  ;;  %4473 = vst [vmem:[#allocation2 + $0x28] sm:$0xff] %v7852_v59  ;;  %v3706_v51 = vsel %vm498_vm1, %v3704_v26, %v3705_v24 }
 0xa5e   : > { %6380 = vmatpush3.bf16.msra.mxu0 %v7903_v19 }
 0xa5f   : > { %v3454_v31 = vsel %vm269_vm0, %v3449_v53, %v3453_v30  ;;  %6381 = vmatprep.subr.bf16.mxu0 %v7852_v59  ;;  %v3459_v8 = vshll.u32 %v3373_v11, 16  ;;  %v3457_v19 = vor.u32 %v3455_v29, %v3453_v30  ;;  %v3463_v1 = vshrl.u32 %v3373_v11, 16 }
 0xa60   : > { %6306 = vmatmul.mubr.bf16.vlgmr.msra.gmra.mrb[76].mxu1 %v3454_v31  ;;  %v3707_v57 = vrot.slane %v3373_v11, 1 }
 0xa61   : > { %6346 = vmatpush3.bf16.msra.mxu1 %v5326_v25  ;;  %6309 = vmatprep.mubr.msk.bf16.mxu1 %vm7144_vm4, %v7852_v59  ;;  %v3461_v37 = vrot.slane %v3459_v8, 1 }
 0xa62   : > { %6382 = vmatpush3.bf16.msra.mxu0 %v7908_v50  ;;  %6347 = vmatprep.subr.bf16.mxu1 %v7852_v59  ;;  %v3708_v6 = vsel %vm498_vm1, %v3705_v24, %v3707_v57 }
 0xa63   : > { %6342 = vmatmul.mubr.bf16.gmra.mrb[80].mxu0 %v3373_v11  ;;  %6383 = vmatprep.subr.bf16.mxu0 %v7852_v59  ;;  %v3462_v50 = vsel %vm269_vm0, %v3457_v19, %v3461_v37  ;;  %v3465_v18 = vor.u32 %v3463_v1, %v3461_v37 }
 0xa64   : > { %6389 = vmatprep.mubr.msk.bf16.mxu0 %vm7144_vm4, %v7852_v59 }
 0xa65   : > { %6348 = vmatpush3.bf16.msra.mxu1 %v5327_v43  ;;  %v6930_v43 = vld [vmem:[#allocation7 + $0x860] sm:$0xff]  }
 0xa66   : > { %6384 = vmatpush3.bf16.msra.mxu0 %v7914_v46  ;;  %6349 = vmatprep.subr.bf16.mxu1 %v7852_v59  ;;  %v6931_v46 = vld [vmem:[#allocation7 + $0x898] sm:$0xff]  }
 0xa67   : > { %6385 = vmatprep.subr.bf16.mxu0 %v7852_v59 }
 0xa68   : > { %6310 = vmatmul.mubr.bf16.gmra.mrb[80].mxu1 %v3462_v50 }
 0xa69   : > { %6350 = vmatpush3.bf16.msra.mxu1 %v5328_v17  ;;  %6313 = vmatprep.mubr.msk.bf16.mxu1 %vm7144_vm4, %v7852_v59  ;;  %v6932_v17 = vld [vmem:[#allocation7 + $0x868] sm:$0xff]  }
 0xa6a   : > { %6386 = vmatpush3.bf16.msra.mxu0 %v7920_v27  ;;  %6351 = vmatprep.subr.bf16.mxu1 %v7852_v59  ;;  %v6933_v27 = vld [vmem:[#allocation7 + $0x8a0] sm:$0xff]  }
 0xa6b   : > { %6387 = vmatprep.subr.bf16.mxu0 %v7852_v59 }
 0xa6d   : > { %6352 = vmatpush3.bf16.msra.mxu1 %v5329_v2  ;;  %v6934_v2 = vld [vmem:[#allocation7 + $0x870] sm:$0xff]  }
 0xa6e   : > { %6388 = vmatpush3.bf16.msra.mxu0 %v7926_v5  ;;  %6353 = vmatprep.subr.bf16.mxu1 %v7852_v59  ;;  %v6935_v5 = vld [vmem:[#allocation7 + $0x8a8] sm:$0xff]  }
 0xa6f   : > { %6437 = vmatprep.subr.bf16.mxu0 %v7852_v59 }
 0xa70   : > { %6314 = vmatmul.mubr.bf16.gmra.mrb[84].mxu1 %v3465_v18 }
 0xa71   : > { %6354 = vmatpush3.bf16.msra.mxu1 %v5330_v34  ;;  %6390 = vmatmul.mubr.bf16.vlgmr.msra.gmra.mrb[84].mxu0 %v3454_v31  ;;  %v6936_v34 = vld [vmem:[#allocation7 + $0x878] sm:$0xff]  }
 0xa72   : > { %6355 = vmatprep.subr.bf16.mxu1 %v7852_v59  ;;  %6393 = vmatprep.mubr.msk.bf16.mxu0 %vm7144_vm4, %v7852_v59 }
 0xa73   : > { %6361 = vmatprep.mubr.msk.bf16.mxu1 %vm7144_vm4, %v7852_v59  ;;  %6438 = vmatpush3.bf16.msra.mxu0 %v6923_v7 }
 0xa74   : > { %6439 = vmatprep.subr.bf16.mxu0 %v7852_v59 }
 0xa75   : > { %6356 = vmatpush3.bf16.msra.mxu1 %v5331_v21  ;;  %v6937_v21 = vld [vmem:[#allocation7 + $0x8b0] sm:$0xff]  }
 0xa76   : > { %6357 = vmatprep.subr.bf16.mxu1 %v7852_v59 }
 0xa77   : > { %6440 = vmatpush3.bf16.msra.mxu0 %v6924_v4 }
 0xa78   : > { %6441 = vmatprep.subr.bf16.mxu0 %v7852_v59 }
 0xa79   : > { %6358 = vmatpush3.bf16.msra.mxu1 %v5332_v35  ;;  %6394 = vmatmul.mubr.bf16.gmra.mrb[88].mxu0 %v3462_v50  ;;  %v6938_v35 = vld [vmem:[#allocation7 + $0x8b8] sm:$0xff]  }
 0xa7a   : > { %6359 = vmatprep.subr.bf16.mxu1 %v7852_v59  ;;  %6397 = vmatprep.mubr.msk.bf16.mxu0 %vm7144_vm4, %v7852_v59 }
 0xa7b   : > { %6442 = vmatpush3.bf16.msra.mxu0 %v6926_v9 }
 0xa7c   : > { %6443 = vmatprep.subr.bf16.mxu0 %v7852_v59 }
 0xa7d   : > { %6360 = vmatpush3.bf16.msra.mxu1 %v5333_v38 }
 0xa7e   : > { %6401 = vmatprep.subr.bf16.mxu1 %v7852_v59 }
 0xa7f   : > { %6444 = vmatpush3.bf16.msra.mxu0 %v6928_v45 }
 0xa80   : > { %6362 = vmatmul.mubr.bf16.vlgmr.msra.gmra.mrb[88].mxu1 %v3706_v51  ;;  %6445 = vmatprep.subr.bf16.mxu0 %v7852_v59 }
 0xa81   : > { %6398 = vmatmul.mubr.bf16.gmra.mrb[92].mxu0 %v3465_v18  ;;  %6365 = vmatprep.mubr.msk.bf16.mxu1 %vm7144_vm4, %v7852_v59 }
 0xa82   : > { %6453 = vmatprep.mubr.msk.bf16.mxu0 %vm7144_vm4, %v7852_v59  ;;  %6402 = vmatpush3.bf16.msra.mxu1 %v6925_v44 }
 0xa83   : > { %6403 = vmatprep.subr.bf16.mxu1 %v7852_v59  ;;  %6446 = vmatpush3.bf16.msra.mxu0 %v6930_v43 }
 0xa84   : > { %6447 = vmatprep.subr.bf16.mxu0 %v7852_v59 }
 0xa86   : > { %6404 = vmatpush3.bf16.msra.mxu1 %v6927_v15 }
 0xa87   : > { %6405 = vmatprep.subr.bf16.mxu1 %v7852_v59  ;;  %6448 = vmatpush3.bf16.msra.mxu0 %v6932_v17 }
 0xa88   : > { %6366 = vmatmul.mubr.bf16.gmra.mrb[92].mxu1 %v3708_v6  ;;  %6449 = vmatprep.subr.bf16.mxu0 %v7852_v59 }
 0xa89   : > { %6369 = vmatprep.mubr.msk.bf16.mxu1 %vm7144_vm4, %v7852_v59 }
 0xa8a   : > { %6406 = vmatpush3.bf16.msra.mxu1 %v6929_v58 }
 0xa8b   : > { %6407 = vmatprep.subr.bf16.mxu1 %v7852_v59  ;;  %6450 = vmatpush3.bf16.msra.mxu0 %v6934_v2 }
 0xa8c   : > { %6451 = vmatprep.subr.bf16.mxu0 %v7852_v59 }
 0xa8e   : > { %6408 = vmatpush3.bf16.msra.mxu1 %v6931_v46 }
 0xa8f   : > { %6409 = vmatprep.subr.bf16.mxu1 %v7852_v59  ;;  %6452 = vmatpush3.bf16.msra.mxu0 %v6936_v34 }
 0xa90   : > { %6370 = vmatmul.mubr.bf16.gmra.mrb[96].mxu1 %v3707_v57  ;;  %6509 = vmatprep.subr.bf16.mxu0 %v7852_v59 }
 0xa91   : > { %6417 = vmatprep.mubr.msk.bf16.mxu1 %vm7144_vm4, %v7852_v59 }
 0xa92   : > { %6410 = vmatpush3.bf16.msra.mxu1 %v6933_v27 }
 0xa93   : > { %6411 = vmatprep.subr.bf16.mxu1 %v7852_v59 }
 0xa96   : > { %6412 = vmatpush3.bf16.msra.mxu1 %v6935_v5 }
 0xa97   : > { %6413 = vmatprep.subr.bf16.mxu1 %v7852_v59 }
 0xa9a   : > { %6414 = vmatpush3.bf16.msra.mxu1 %v6937_v21 }
 0xa9b   : > { %6415 = vmatprep.subr.bf16.mxu1 %v7852_v59 }
 0xa9e   : > { %6416 = vmatpush3.bf16.msra.mxu1 %v6938_v35 }
 0xa9f   : > { %6473 = vmatprep.subr.bf16.mxu1 %v7852_v59 }
 0xb24   : > { %v3654_v38 = vpop.f32.mrb[72].mxu0 }
 0xb25   : > { %v6335_v20 = vpop.f32.mrb[73].mxu0 }
 0xb26   : > { %v3657_v54 = vpop.f32.mrb[74].mxu0 }
 0xb27   : > { %v6336_v62 = vpop.f32.mrb[75].mxu0 }
 0xb2e   : > { %v3662_v0 = vpop.f32.mrb[76].mxu0 }
 0xb2f   : > { %v6339_v36 = vpop.f32.mrb[77].mxu0 }
 0xb30   : > { %v3664_v61 = vpop.f32.mrb[78].mxu0 }
 0xb31   : > { %v6340_v60 = vpop.f32.mrb[79].mxu0 }
 0xb33   : > { %v3551_v13 = vpop.f32.mrb[76].mxu1 }
 0xb34   : > { %v3655_v12 = vadd.f32 %v3654_v38, %v3551_v13  ;;  %v6307_v63 = vpop.f32.mrb[77].mxu1 }
 0xb35   : > { %v3554_v22 = vpop.f32.mrb[78].mxu1 }
 0xb36   : > { %v3681_v3 = vadd.f32 %v8044_v10, %v3655_v12  ;;  %v3658_v47 = vadd.f32 %v3657_v54, %v3554_v22  ;;  %v6308_v49 = vpop.f32.mrb[79].mxu1  ;;  %v3669_v52 = vpop.f32.mrb[80].mxu0 }
 0xb37   : > { %v6343_v23 = vpop.f32.mrb[81].mxu0  ;;  %v6939_v49 = vld [vmem:[#allocation7 + $0x8c0] sm:$0xff]  }
 0xb38   : > { %3923 = vst [vmem:[#allocation3 + $0x8] ss:$2 sm:$0xff] %v3681_v3  ;;  %v3682_v41 = vadd.f32 %v8044_v10, %v3658_v47  ;;  %v3672_v42 = vpop.f32.mrb[82].mxu0 }
 0xb39   : > { %v6344_v39 = vpop.f32.mrb[83].mxu0  ;;  %v6940_v42 = vld [vmem:[#allocation7 + $0x8c8] sm:$0xff]  }
 0xb3a   : > { %3925 = vst [vmem:[#allocation3 + $0x18] ss:$2 sm:$0xff] %v3682_v41 }
 0xb3b   : > { %v3559_v55 = vpop.f32.mrb[80].mxu1 }
 0xb3c   : > { %v6311_v32 = vpop.f32.mrb[81].mxu1 }
 0xb3d   : > { %v3561_v33 = vpop.f32.mrb[82].mxu1 }
 0xb3e   : > { %v3665_v40 = vadd.f32 %v3664_v61, %v3561_v33  ;;  %v6312_v48 = vpop.f32.mrb[83].mxu1 }
 0xb40   : > { %v3683_v56 = vadd.f32 %v8044_v10, %v3665_v40  ;;  %v6941_v40 = vld [vmem:[#allocation7 + $0x8d0] sm:$0xff]  }
 0xb42   : > { %3931 = vst [vmem:[#allocation3 + $0x30] ss:$2 sm:$0xff] %v3683_v56 }
 0xb43   : > { %v3566_v16 = vpop.f32.mrb[84].mxu1 }
 0xb44   : > { %v3670_v28 = vadd.f32 %v3669_v52, %v3566_v16  ;;  %v3897_v14 = vpop.f32.mrb[84].mxu0  ;;  %v6315_v53 = vpop.f32.mrb[85].mxu1 }
 0xb45   : > { %v6391_v30 = vpop.f32.mrb[85].mxu0  ;;  %v3569_v25 = vpop.f32.mrb[86].mxu1 }
 0xb46   : > { %v3684_v11 = vadd.f32 %v8044_v10, %v3670_v28  ;;  %v3900_v31 = vpop.f32.mrb[86].mxu0  ;;  %v6316_v8 = vpop.f32.mrb[87].mxu1 }
 0xb47   : > { %v6392_v29 = vpop.f32.mrb[87].mxu0 }
 0xb48   : > { %3933 = vst [vmem:[#allocation3 + $0x40] ss:$2 sm:$0xff] %v3684_v11  ;;  %v6943_v29 = vld [vmem:[#allocation7 + $0x8e0] sm:$0xff]  }
 0xb4c   : > { %v3905_v37 = vpop.f32.mrb[88].mxu0 }
 0xb4d   : > { %v6395_v19 = vpop.f32.mrb[89].mxu0 }
 0xb4e   : > { %v3907_v50 = vpop.f32.mrb[90].mxu0 }
 0xb4f   : > { %v6396_v1 = vpop.f32.mrb[91].mxu0 }
 0xb53   : > { %v3794_v18 = vpop.f32.mrb[88].mxu1 }
 0xb54   : > { %v3898_v24 = vadd.f32 %v3897_v14, %v3794_v18  ;;  %v6363_v26 = vpop.f32.mrb[89].mxu1  ;;  %v3912_v51 = vpop.f32.mrb[92].mxu0  ;;  %v6942_v14 = vld [vmem:[#allocation7 + $0x8d8] sm:$0xff]   ;;  %v6944_v18 = vld [vmem:[#allocation7 + $0x8e8] sm:$0xff]  }
 0xb55   : > { %v3797_v57 = vpop.f32.mrb[90].mxu1  ;;  %v6399_v6 = vpop.f32.mrb[93].mxu0 }
 0xb56   : > { %v3918_v7 = vadd.f32 %v8044_v10, %v3898_v24  ;;  %v3901_v4 = vadd.f32 %v3900_v31, %v3797_v57  ;;  %v6364_v44 = vpop.f32.mrb[91].mxu1  ;;  %v3915_v9 = vpop.f32.mrb[94].mxu0  ;;  %v6946_v6 = vld [vmem:[#allocation7 + $0x8f8] sm:$0xff]  }
 0xb57   : > { %v6400_v15 = vpop.f32.mrb[95].mxu0 }
 0xb58   : > { %3927 = vst [vmem:[#allocation3 + $0x9] ss:$2 sm:$0xff] %v3918_v7  ;;  %v3919_v45 = vadd.f32 %v8044_v10, %v3901_v4 }
 0xb5a   : > { %3929 = vst [vmem:[#allocation3 + $0x19] ss:$2 sm:$0xff] %v3919_v45 }
 0xb5b   : > { %v3802_v58 = vpop.f32.mrb[92].mxu1 }
 0xb5c   : > { %v6367_v43 = vpop.f32.mrb[93].mxu1 }
 0xb5d   : > { %v3804_v46 = vpop.f32.mrb[94].mxu1 }
 0xb5e   : > { %v3908_v17 = vadd.f32 %v3907_v50, %v3804_v46  ;;  %v6368_v27 = vpop.f32.mrb[95].mxu1 }
 0xb5f   : > { %v3940_v2 = vld [vmem:[#allocation3 + $0x7] sm:$0xff]  ;;  %v3941_v5 = vld [vmem:[#allocation3 + $0xf] sm:$0xff] }
 0xb60   : > { %v3920_v34 = vadd.f32 %v8044_v10, %v3908_v17  ;;  %v8053_v21 = vpack.c.bf16 %v3941_v5, %v3940_v2  ;;  %v6947_v2 = vld [vmem:[#allocation7 + $0x900] sm:$0xff]   ;;  %v6949_v5 = vld [vmem:[#allocation7 + $0x908] sm:$0xff]  }
 0xb61   : > { %v3942_v35 = vld [vmem:[#allocation3 + $0x17] sm:$0xff]  ;;  %v3943_v38 = vld [vmem:[#allocation3 + $0x1f] sm:$0xff]  ;;  %v3944_v23 = vld [vmem:[#allocation3 + $0x27] sm:$0xff] }
 0xb62   : > { %3935 = vst [vmem:[#allocation3 + $0x31] ss:$2 sm:$0xff] %v3920_v34  ;;  %6454 = vmatmul.mubr.bf16.vlgmr.msra.gmra.mrb[96].mxu0 %v8053_v21  ;;  %v8056_v20 = vpack.c.bf16 %v3943_v38, %v3942_v35  ;;  %v3992_v54 = vshll.u32 %v8053_v21, 16  ;;  %v3990_v61 = vshrl.u32 %v8053_v21, 16  ;;  %v4295_v9 = vrot.slane %v8053_v21, 1  ;;  %v6948_v34 = vld [vmem:[#allocation7 + $0x940] sm:$0xff]  }
 0xb63   : > { %v3809_v62 = vpop.f32.mrb[96].mxu1  ;;  %6457 = vmatprep.mubr.msk.bf16.mxu0 %vm7144_vm4, %v7852_v59  ;;  %6510 = vmatpush3.bf16.msra.mxu0 %v6948_v34  ;;  %v6950_v21 = vld [vmem:[#allocation7 + $0x910] sm:$0xff]   ;;  %v6951_v35 = vld [vmem:[#allocation7 + $0x948] sm:$0xff]   ;;  %v6952_v38 = vld [vmem:[#allocation7 + $0x918] sm:$0xff]  }
 0xb64   : > { %v3913_v0 = vadd.f32 %v3912_v51, %v3809_v62  ;;  %v6371_v36 = vpop.f32.mrb[97].mxu1  ;;  %v3994_v60 = vrot.slane %v3992_v54, 1  ;;  %v3997_v13 = vshll.u32 %v8056_v20, 16  ;;  %v6945_v51 = vld [vmem:[#allocation7 + $0x8f0] sm:$0xff]   ;;  %v4296_v44 = vrot.slane %v8056_v20, 1  ;;  %6511 = vmatprep.subr.bf16.mxu0 %v7852_v59  ;;  %v6956_v54 = vld [vmem:[#allocation7 + $0x928] sm:$0xff]  }
 0xb65   : > { %v3812_v12 = vpop.f32.mrb[98].mxu1  ;;  %v6953_v62 = vld [vmem:[#allocation7 + $0x950] sm:$0xff]  }
 0xb66   : > { %v3921_v63 = vadd.f32 %v8044_v10, %v3913_v0  ;;  %v6372_v22 = vpop.f32.mrb[99].mxu1  ;;  %v3995_v3 = vor.u32 %v3994_v60, %v3990_v61  ;;  %v3999_v47 = vrot.slane %v3997_v13, 1  ;;  %v4001_v10 = vshrl.u32 %v8056_v20, 16  ;;  %v6955_v0 = vld [vmem:[#allocation7 + $0x958] sm:$0xff]   ;;  %v6958_v36 = vld [vmem:[#allocation7 + $0x930] sm:$0xff]   ;;  %v6957_v60 = vld [vmem:[#allocation7 + $0x960] sm:$0xff]  }
 0xb67   : > { %v4297_v15 = vsel %vm498_vm1, %v4295_v9, %v4296_v44  ;;  %6512 = vmatpush3.bf16.msra.mxu0 %v6951_v35  ;;  %v6959_v61 = vld [vmem:[#allocation7 + $0x938] sm:$0xff]   ;;  %v6960_v13 = vld [vmem:[#allocation7 + $0x968] sm:$0xff]   ;;  %v6961_v12 = vld [vmem:[#allocation7 + $0x970] sm:$0xff]  }
 0xb68   : > { %3937 = vst [vmem:[#allocation3 + $0x41] ss:$2 sm:$0xff] %v3921_v63  ;;  %v4000_v52 = vsel %vm269_vm0, %v3995_v3, %v3999_v47  ;;  %v4003_v32 = vor.u32 %v4001_v10, %v3999_v47  ;;  %6513 = vmatprep.subr.bf16.mxu0 %v7852_v59  ;;  %v6962_v63 = vld [vmem:[#allocation7 + $0x978] sm:$0xff]  }
 0xb69   : > { %6418 = vmatmul.mubr.bf16.vlgmr.msra.gmra.mrb[100].mxu1 %v4000_v52  ;;  %v3945_v41 = vld [vmem:[#allocation3 + $0x2f] sm:$0xff]  ;;  %v3946_v48 = vld [vmem:[#allocation3 + $0x37] sm:$0xff] }
 0xb6a   : > { %6474 = vmatpush3.bf16.msra.mxu1 %v6939_v49  ;;  %6458 = vmatmul.mubr.bf16.gmra.mrb[100].mxu0 %v8056_v20  ;;  %v8066_v39 = vpack.c.bf16 %v3945_v41, %v3944_v23  ;;  %v6954_v20 = vld [vmem:[#allocation7 + $0x920] sm:$0xff]  }
 0xb6b   : > { %6475 = vmatprep.subr.bf16.mxu1 %v7852_v59  ;;  %6421 = vmatprep.mubr.msk.bf16.mxu1 %vm7144_vm4, %v7852_v59 }
 0xb6c   : > { %v4005_v55 = vshll.u32 %v8066_v39, 16  ;;  %6461 = vmatprep.mubr.msk.bf16.mxu0 %vm7144_vm4, %v7852_v59  ;;  %v4009_v11 = vshrl.u32 %v8066_v39, 16  ;;  %v4298_v45 = vrot.slane %v8066_v39, 1  ;;  %6514 = vmatpush3.bf16.msra.mxu0 %v6953_v62 }
 0xb6d   : > { %6515 = vmatprep.subr.bf16.mxu0 %v7852_v59 }
 0xb6e   : > { %6476 = vmatpush3.bf16.msra.mxu1 %v6940_v42  ;;  %v4007_v33 = vrot.slane %v4005_v55, 1  ;;  %v4299_v58 = vsel %vm498_vm1, %v4296_v44, %v4298_v45 }
 0xb6f   : > { %6477 = vmatprep.subr.bf16.mxu1 %v7852_v59  ;;  %v3947_v56 = vld [vmem:[#allocation3 + $0x3f] sm:$0xff]  ;;  %v3948_v30 = vld [vmem:[#allocation3 + $0x47] sm:$0xff]  ;;  %v3949_v25 = vld [vmem:[#allocation3 + $0x4f] sm:$0x3] }
 0xb70   : > { %v4008_v16 = vsel %vm269_vm0, %v4003_v32, %v4007_v33  ;;  %v8077_v28 = vpack.c.bf16 %v3947_v56, %v3946_v48  ;;  %v4011_v8 = vor.u32 %v4009_v11, %v4007_v33  ;;  %v3954_v37 = vpack.c.bf16 %v3949_v25, %v3948_v30  ;;  %6516 = vmatpush3.bf16.msra.mxu0 %v6955_v0 }
 0xb71   : > { %6422 = vmatmul.mubr.bf16.gmra.mrb[104].mxu1 %v4008_v16  ;;  %6517 = vmatprep.subr.bf16.mxu0 %v7852_v59 }
 0xb72   : > { %6462 = vmatmul.mubr.bf16.gmra.mrb[104].mxu0 %v8066_v39  ;;  %6478 = vmatpush3.bf16.msra.mxu1 %v6941_v40  ;;  %v4013_v53 = vshll.u32 %v8077_v28, 16  ;;  %v4017_v50 = vshrl.u32 %v8077_v28, 16  ;;  %v4021_v1 = vshll.u32 %v3954_v37, 16  ;;  %v4025_v7 = vshrl.u32 %v3954_v37, 16 }
 0xb73   : > { %6479 = vmatprep.subr.bf16.mxu1 %v7852_v59  ;;  %6425 = vmatprep.mubr.msk.bf16.mxu1 %vm7144_vm4, %v7852_v59  ;;  %v4300_v43 = vrot.slane %v8077_v28, 1  ;;  %v4302_v17 = vrot.slane %v3954_v37, 1 }
 0xb74   : > { %v4015_v31 = vrot.slane %v4013_v53, 1  ;;  %6465 = vmatprep.mubr.msk.bf16.mxu0 %vm7144_vm4, %v7852_v59  ;;  %v4023_v26 = vrot.slane %v4021_v1, 1  ;;  %6518 = vmatpush3.bf16.msra.mxu0 %v6957_v60 }
 0xb75   : > { %v4301_v46 = vsel %vm498_vm1, %v4298_v45, %v4300_v43  ;;  %v4303_v27 = vsel %vm498_vm1, %v4300_v43, %v4302_v17  ;;  %6519 = vmatprep.subr.bf16.mxu0 %v7852_v59 }
 0xb76   : > { %6480 = vmatpush3.bf16.msra.mxu1 %v6942_v14  ;;  %v4016_v19 = vsel %vm269_vm0, %v4011_v8, %v4015_v31  ;;  %v4019_v24 = vor.u32 %v4017_v50, %v4015_v31  ;;  %v4027_v4 = vor.u32 %v4025_v7, %v4023_v26 }
 0xb77   : > { %6481 = vmatprep.subr.bf16.mxu1 %v7852_v59 }
 0xb78   : > { %v4024_v57 = vsel %vm269_vm0, %v4019_v24, %v4023_v26  ;;  %6520 = vmatpush3.bf16.msra.mxu0 %v6960_v13 }
 0xb79   : > { %6426 = vmatmul.mubr.bf16.gmra.mrb[108].mxu1 %v4016_v19  ;;  %6521 = vmatprep.subr.bf16.mxu0 %v7852_v59 }
 0xb7a   : > { %6466 = vmatmul.mubr.bf16.gmra.mrb[108].mxu0 %v8077_v28  ;;  %6482 = vmatpush3.bf16.msra.mxu1 %v6943_v29 }
 0xb7b   : > { %6429 = vmatprep.mubr.msk.bf16.mxu1 %vm7144_vm4, %v7852_v59  ;;  %6469 = vmatprep.mubr.msk.bf16.mxu0 %vm7144_vm4, %v7852_v59 }
 0xb7c   : > { %6483 = vmatprep.subr.bf16.mxu1 %v7852_v59  ;;  %6522 = vmatpush3.bf16.msra.mxu0 %v6961_v12 }
 0xb7d   : > { %6523 = vmatprep.subr.bf16.mxu0 %v7852_v59 }
 0xb7e   : > { %6484 = vmatpush3.bf16.msra.mxu1 %v6944_v18 }
 0xb7f   : > { %6485 = vmatprep.subr.bf16.mxu1 %v7852_v59 }
 0xb80   : > { %6524 = vmatpush3.bf16.msra.mxu0 %v6962_v63 }
 0xb81   : > { %6430 = vmatmul.mubr.bf16.gmra.mrb[112].mxu1 %v4024_v57  ;;  %6581 = vmatprep.subr.bf16.mxu0 %v7852_v59 }
 0xb82   : > { %6470 = vmatmul.mubr.bf16.gmra.mrb[112].mxu0 %v3954_v37  ;;  %6486 = vmatpush3.bf16.msra.mxu1 %v6945_v51 }
 0xb83   : > { %6433 = vmatprep.mubr.msk.bf16.mxu1 %vm7144_vm4, %v7852_v59  ;;  %6487 = vmatprep.subr.bf16.mxu1 %v7852_v59 }
 0xb84   : > { %6525 = vmatprep.mubr.msk.bf16.mxu0 %vm7144_vm4, %v7852_v59 }
 0xb86   : > { %6488 = vmatpush3.bf16.msra.mxu1 %v6946_v6 }
 0xb87   : > { %6545 = vmatprep.subr.bf16.mxu1 %v7852_v59 }
 0xb89   : > { %6434 = vmatmul.mubr.bf16.gmra.mrb[116].mxu1 %v4027_v4 }
 0xb8a   : > { %6489 = vmatprep.mubr.msk.bf16.mxu1 %vm7144_vm4, %v7852_v59 }
 0xb91   : > { %6490 = vmatmul.mubr.bf16.vlgmr.msra.gmra.mrb[120].mxu1 %v4297_v15 }
 0xb92   : > { %6493 = vmatprep.mubr.msk.bf16.mxu1 %vm7144_vm4, %v7852_v59  ;;  %6546 = vmatpush3.bf16.msra.mxu1 %v6947_v2 }
 0xb93   : > { %6547 = vmatprep.subr.bf16.mxu1 %v7852_v59 }
 0xb96   : > { %6548 = vmatpush3.bf16.msra.mxu1 %v6949_v5  ;;  %v8146_v5 = vld [vmem:[#allocation9 + $0xb] ss:$0 sm:$0xff] }
 0xb97   : > { %6549 = vmatprep.subr.bf16.mxu1 %v7852_v59 }
 0xb99   : > { %6494 = vmatmul.mubr.bf16.gmra.mrb[124].mxu1 %v4299_v58 }
 0xb9a   : > { %6497 = vmatprep.mubr.msk.bf16.mxu1 %vm7144_vm4, %v7852_v59  ;;  %6550 = vmatpush3.bf16.msra.mxu1 %v6950_v21 }
 0xb9b   : > { %6551 = vmatprep.subr.bf16.mxu1 %v7852_v59 }
 0xb9e   : > { %6552 = vmatpush3.bf16.msra.mxu1 %v6952_v38 }
 0xb9f   : > { %6553 = vmatprep.subr.bf16.mxu1 %v7852_v59 }
 0xba1   : > { %6498 = vmatmul.mubr.bf16.gmra.mrb[128].mxu1 %v4301_v46 }
 0xba2   : > { %6501 = vmatprep.mubr.msk.bf16.mxu1 %vm7144_vm4, %v7852_v59  ;;  %6554 = vmatpush3.bf16.msra.mxu1 %v6954_v20 }
 0xba3   : > { %6555 = vmatprep.subr.bf16.mxu1 %v7852_v59 }
 0xba6   : > { %6556 = vmatpush3.bf16.msra.mxu1 %v6956_v54 }
 0xba7   : > { %6557 = vmatprep.subr.bf16.mxu1 %v7852_v59 }
 0xba9   : > { %6502 = vmatmul.mubr.bf16.gmra.mrb[132].mxu1 %v4303_v27 }
 0xbaa   : > { %6505 = vmatprep.mubr.msk.bf16.mxu1 %vm7144_vm4, %v7852_v59  ;;  %6558 = vmatpush3.bf16.msra.mxu1 %v6958_v36 }
 0xbab   : > { %6559 = vmatprep.subr.bf16.mxu1 %v7852_v59 }
 0xbae   : > { %6560 = vmatpush3.bf16.msra.mxu1 %v6959_v61 }
 0xbaf   : > { %6617 = vmatprep.subr.bf16.mxu1 %v7852_v59 }
 0xbb1   : > { %6506 = vmatmul.mubr.bf16.gmra.mrb[136].mxu1 %v4302_v17 }
 0xbb2   : > { %6561 = vmatprep.mubr.msk.bf16.mxu1 %vm7144_vm4, %v7852_v59 }
 0xc35   : > { %v4235_v22 = vpop.f32.mrb[96].mxu0 }
 0xc36   : > { %v6455_v3 = vpop.f32.mrb[97].mxu0 }
 0xc37   : > { %v4238_v47 = vpop.f32.mrb[98].mxu0 }
 0xc38   : > { %v6456_v49 = vpop.f32.mrb[99].mxu0 }
 0xc3c   : > { %v4115_v52 = vpop.f32.mrb[100].mxu1 }
 0xc3d   : > { %v4236_v23 = vadd.f32 %v4235_v22, %v4115_v52  ;;  %v6419_v41 = vpop.f32.mrb[101].mxu1  ;;  %v4243_v42 = vpop.f32.mrb[100].mxu0 }
 0xc3e   : > { %v4118_v39 = vpop.f32.mrb[102].mxu1  ;;  %v6459_v10 = vpop.f32.mrb[101].mxu0 }
 0xc3f   : > { %v4239_v55 = vadd.f32 %v4238_v47, %v4118_v39  ;;  %v6420_v32 = vpop.f32.mrb[103].mxu1  ;;  %v4246_v33 = vpop.f32.mrb[102].mxu0  ;;  %v6963_v39 = vld [vmem:[#allocation7 + $0x980] sm:$0xff]  }
 0xc40   : > { %v6460_v40 = vpop.f32.mrb[103].mxu0 }
 0xc44   : > { %v4123_v48 = vpop.f32.mrb[104].mxu1 }
 0xc45   : > { %v4244_v56 = vadd.f32 %v4243_v42, %v4123_v48  ;;  %v6423_v16 = vpop.f32.mrb[105].mxu1  ;;  %v4251_v28 = vpop.f32.mrb[104].mxu0  ;;  %v8155_v48 = vld [vmem:[#allocation2] sm:$0xff] }
 0xc46   : > { %v4126_v14 = vpop.f32.mrb[106].mxu1  ;;  %v6463_v59 = vpop.f32.mrb[105].mxu0 }
 0xc47   : > { %v4247_v53 = vadd.f32 %v4246_v33, %v4126_v14  ;;  %v6424_v30 = vpop.f32.mrb[107].mxu1  ;;  %v4254_v25 = vpop.f32.mrb[106].mxu0 }
 0xc48   : > { %v6464_v11 = vpop.f32.mrb[107].mxu0 }
 0xc4c   : > { %v4131_v31 = vpop.f32.mrb[108].mxu1 }
 0xc4d   : > { %v6427_v8 = vpop.f32.mrb[109].mxu1  ;;  %v4259_v29 = vpop.f32.mrb[108].mxu0 }
 0xc4e   : > { %v4134_v37 = vpop.f32.mrb[110].mxu1  ;;  %v6467_v19 = vpop.f32.mrb[109].mxu0 }
 0xc4f   : > { %v4255_v50 = vadd.f32 %v4254_v25, %v4134_v37  ;;  %v6428_v1 = vpop.f32.mrb[111].mxu1  ;;  %v4262_v18 = vpop.f32.mrb[110].mxu0  ;;  %v6965_v25 = vld [vmem:[#allocation7 + $0x990] sm:$0xff]  }
 0xc50   : > { %v6468_v24 = vpop.f32.mrb[111].mxu0 }
 0xc54   : > { %v4139_v26 = vpop.f32.mrb[112].mxu1 }
 0xc55   : > { %v8140_v51 = vadd.f32 %v4259_v29, %v4139_v26  ;;  %v6431_v57 = vpop.f32.mrb[113].mxu1  ;;  %v4267_v6 = vpop.f32.mrb[112].mxu0  ;;  %v6966_v26 = vld [vmem:[#allocation7 + $0x998] sm:$0xff]  }
 0xc56   : > { %v4142_v7 = vpop.f32.mrb[114].mxu1  ;;  %v6471_v4 = vpop.f32.mrb[113].mxu0 }
 0xc57   : > { %v8142_v44 = vadd.f32 %v4262_v18, %v4142_v7  ;;  %v6432_v9 = vpop.f32.mrb[115].mxu1  ;;  %v4270_v15 = vpop.f32.mrb[114].mxu0 }
 0xc58   : > { %v6472_v45 = vpop.f32.mrb[115].mxu0 }
 0xc5c   : > { %v4147_v58 = vpop.f32.mrb[116].mxu1 }
 0xc5d   : > { %v8144_v43 = vadd.f32 %v4267_v6, %v4147_v58  ;;  %v6435_v46 = vpop.f32.mrb[117].mxu1  ;;  %v6967_v58 = vld [vmem:[#allocation7 + $0x9a0] sm:$0xff]  }
 0xc5e   : > { %v4150_v17 = vpop.f32.mrb[118].mxu1 }
 0xc5f   : > { %v6436_v27 = vpop.f32.mrb[119].mxu1 }
 0xc64   : > { %v4391_v2 = vpop.f32.mrb[120].mxu1 }
 0xc65   : > { %v4429_v34 = vadd.f32 %v4391_v2, %v4236_v23  ;;  %v6491_v21 = vpop.f32.mrb[121].mxu1 }
 0xc66   : > { %v4394_v35 = vpop.f32.mrb[122].mxu1 }
 0xc67   : > { %v4446_v38 = vadd.f32 %v8146_v5, %v4429_v34  ;;  %v4430_v20 = vadd.f32 %v4394_v35, %v4239_v55  ;;  %v6492_v54 = vpop.f32.mrb[123].mxu1 }
 0xc69   : > { %v4455_v62 = vmax.f32 %v4446_v38, 0.0  ;;  %v4447_v0 = vadd.f32 %v8146_v5, %v4430_v20  ;;  %v6968_v38 = vld [vmem:[#allocation7 + $0x9a8] sm:$0xff]  }
 0xc6b   : > { %4464 = vst [vmem:[#allocation2 + $0x8] sm:$0xff] %v4455_v62  ;;  %v4456_v36 = vmax.f32 %v4447_v0, 0.0 }
 0xc6c   : > { %v4399_v61 = vpop.f32.mrb[124].mxu1 }
 0xc6d   : > { %4465 = vst [vmem:[#allocation2 + $0x10] sm:$0xff] %v4456_v36  ;;  %v4431_v60 = vadd.f32 %v4399_v61, %v4244_v56  ;;  %v6495_v13 = vpop.f32.mrb[125].mxu1  ;;  %v6964_v56 = vld [vmem:[#allocation7 + $0x988] sm:$0xff]   ;;  %v6969_v61 = vld [vmem:[#allocation7 + $0x9b0] sm:$0xff]  }
 0xc6e   : > { %v4402_v12 = vpop.f32.mrb[126].mxu1 }
 0xc6f   : > { %v4448_v63 = vadd.f32 %v8146_v5, %v4431_v60  ;;  %v4432_v22 = vadd.f32 %v4402_v12, %v4247_v53  ;;  %v6496_v3 = vpop.f32.mrb[127].mxu1 }
 0xc71   : > { %v4457_v47 = vmax.f32 %v4448_v63, 0.0  ;;  %v4449_v49 = vadd.f32 %v8146_v5, %v4432_v22  ;;  %v6970_v63 = vld [vmem:[#allocation7 + $0x9b8] sm:$0xff]  }
 0xc72   : > { %v4475_v41 = vld [vmem:[#allocation2 + $0x7] sm:$0xff] }
 0xc73   : > { %4466 = vst [vmem:[#allocation2 + $0x18] sm:$0xff] %v4457_v47  ;;  %v4458_v52 = vmax.f32 %v4449_v49, 0.0 }
 0xc74   : > { %v4407_v23 = vpop.f32.mrb[128].mxu1  ;;  %v4476_v42 = vld [vmem:[#allocation2 + $0xf] sm:$0xff] }
 0xc75   : > { %4467 = vst [vmem:[#allocation2 + $0x20] sm:$0xff] %v4458_v52  ;;  %v6499_v10 = vpop.f32.mrb[129].mxu1  ;;  %v8152_v55 = vpack.c.bf16 %v4476_v42, %v4475_v41 }
 0xc76   : > { %v4410_v32 = vpop.f32.mrb[130].mxu1 }
 0xc77   : > { %v4434_v33 = vadd.f32 %v4410_v32, %v4255_v50  ;;  %v6500_v40 = vpop.f32.mrb[131].mxu1  ;;  %6562 = vmatmul.mubr.bf16.vlgmr.msra.gmra.mrb[140].mxu1 %v8152_v55  ;;  %v4527_v28 = vshll.u32 %v8152_v55, 16  ;;  %v4525_v18 = vshrl.u32 %v8152_v55, 16 }
 0xc78   : > { %6565 = vmatprep.mubr.msk.bf16.mxu1 %vm7144_vm4, %v8155_v48  ;;  %6625 = vmatpush3.bf16.msra.mxu1 %v6963_v39 }
 0xc79   : > { %v4451_v16 = vadd.f32 %v8146_v5, %v4434_v33  ;;  %6618 = vmatprep.subr.bf16.mxu1 %v8155_v48  ;;  %v4529_v29 = vrot.slane %v4527_v28, 1 }
 0xc7a   : > { %v4477_v53 = vld [vmem:[#allocation2 + $0x17] sm:$0xff] }
 0xc7b   : > { %v4460_v14 = vmax.f32 %v4451_v16, 0.0  ;;  %v4530_v6 = vor.u32 %v4529_v29, %v4525_v18 }
 0xc7c   : > { %v4415_v59 = vpop.f32.mrb[132].mxu1  ;;  %v4478_v30 = vld [vmem:[#allocation2 + $0x1f] sm:$0xff]  ;;  %6626 = vmatpush3.bf16.msra.mxu1 %v6964_v56  ;;  %v4479_v15 = vld [vmem:[#allocation2 + $0x27] sm:$0xff] }
 0xc7d   : > { %4469 = vst [vmem:[#allocation2 + $0x30] sm:$0xff] %v4460_v14  ;;  %v4435_v11 = vadd.f32 %v4415_v59, %v8140_v51  ;;  %v6503_v31 = vpop.f32.mrb[133].mxu1  ;;  %v8163_v8 = vpack.c.bf16 %v4478_v30, %v4477_v53  ;;  %6619 = vmatprep.subr.bf16.mxu1 %v8155_v48  ;;  %v4828_v59 = vrot.slane %v8152_v55, 1 }
 0xc7e   : > { %v4418_v37 = vpop.f32.mrb[134].mxu1 }
 0xc7f   : > { %v4452_v19 = vadd.f32 %v8146_v5, %v4435_v11  ;;  %v4436_v50 = vadd.f32 %v4418_v37, %v8142_v44  ;;  %v6504_v1 = vpop.f32.mrb[135].mxu1  ;;  %6566 = vmatmul.mubr.bf16.gmra.mrb[144].mxu1 %v8163_v8  ;;  %v4532_v24 = vshll.u32 %v8163_v8, 16  ;;  %v4536_v35 = vshrl.u32 %v8163_v8, 16 }
 0xc80   : > { %6569 = vmatprep.mubr.msk.bf16.mxu1 %vm7144_vm4, %v8155_v48  ;;  %6627 = vmatpush3.bf16.msra.mxu1 %v6965_v25  ;;  %v4829_v14 = vrot.slane %v8163_v8, 1 }
 0xc81   : > { %v4461_v51 = vmax.f32 %v4452_v19, 0.0  ;;  %v4453_v57 = vadd.f32 %v8146_v5, %v4436_v50  ;;  %v4534_v7 = vrot.slane %v4532_v24, 1  ;;  %6620 = vmatprep.subr.bf16.mxu1 %v8155_v48 }
 0xc82   : > { %v4830_v53 = vsel %vm498_vm1, %v4828_v59, %v4829_v14 }
 0xc83   : > { %4470 = vst [vmem:[#allocation2 + $0x38] sm:$0xff] %v4461_v51  ;;  %v4462_v4 = vmax.f32 %v4453_v57, 0.0  ;;  %v4535_v44 = vsel %vm269_vm0, %v4530_v6, %v4534_v7  ;;  %v4538_v54 = vor.u32 %v4536_v35, %v4534_v7 }
 0xc84   : > { %v4423_v9 = vpop.f32.mrb[136].mxu1  ;;  %6526 = vmatmul.mubr.bf16.vlgmr.msra.gmra.mrb[116].mxu0 %v4535_v44  ;;  %v4480_v45 = vld [vmem:[#allocation2 + $0x2f] sm:$0xff]  ;;  %6628 = vmatpush3.bf16.msra.mxu1 %v6966_v26 }
 0xc85   : > { %4471 = vst [vmem:[#allocation2 + $0x40] sm:$0xff] %v4462_v4  ;;  %v4437_v46 = vadd.f32 %v4423_v9, %v8144_v43  ;;  %6582 = vmatpush3.bf16.msra.mxu0 %v6963_v39  ;;  %v6507_v17 = vpop.f32.mrb[137].mxu1  ;;  %v8177_v27 = vpack.c.bf16 %v4480_v45, %v4479_v15  ;;  %6529 = vmatprep.mubr.msk.bf16.mxu0 %vm7144_vm4, %v8155_v48 }
 0xc86   : > { %v4426_v2 = vpop.f32.mrb[138].mxu1  ;;  %6583 = vmatprep.subr.bf16.mxu0 %v8155_v48  ;;  %6621 = vmatprep.subr.bf16.mxu1 %v8155_v48 }
 0xc87   : > { %v4454_v34 = vadd.f32 %v8146_v5, %v4437_v46  ;;  %v6508_v21 = vpop.f32.mrb[139].mxu1  ;;  %6570 = vmatmul.mubr.bf16.gmra.mrb[148].mxu1 %v8177_v27  ;;  %v4540_v43 = vshll.u32 %v8177_v27, 16  ;;  %v4544_v13 = vshrl.u32 %v8177_v27, 16  ;;  %v4831_v30 = vrot.slane %v8177_v27, 1 }
 0xc88   : > { %6573 = vmatprep.mubr.msk.bf16.mxu1 %vm7144_vm4, %v8155_v48  ;;  %6629 = vmatpush3.bf16.msra.mxu1 %v6967_v58 }
 0xc89   : > { %v4463_v20 = vmax.f32 %v4454_v34, 0.0  ;;  %6584 = vmatpush3.bf16.msra.mxu0 %v6964_v56  ;;  %v4542_v62 = vrot.slane %v4540_v43, 1  ;;  %6622 = vmatprep.subr.bf16.mxu1 %v8155_v48 }
 0xc8a   : > { %6585 = vmatprep.subr.bf16.mxu0 %v8155_v48  ;;  %v4481_v0 = vld [vmem:[#allocation2 + $0x37] sm:$0xff] }
 0xc8b   : > { %4472 = vst [vmem:[#allocation2 + $0x48] sm:$0xff] %v4463_v20  ;;  %v4543_v5 = vsel %vm269_vm0, %v4538_v54, %v4542_v62  ;;  %v4546_v22 = vor.u32 %v4544_v13, %v4542_v62 }
 0xc8c   : > { %6530 = vmatmul.mubr.bf16.gmra.mrb[120].mxu0 %v4543_v5  ;;  %v4482_v36 = vld [vmem:[#allocation2 + $0x3f] sm:$0xff]  ;;  %6630 = vmatpush3.bf16.msra.mxu1 %v6968_v38 }
 0xc8d   : > { %6586 = vmatpush3.bf16.msra.mxu0 %v6965_v25  ;;  %v4488_v60 = vpack.c.bf16 %v4482_v36, %v4481_v0  ;;  %6533 = vmatprep.mubr.msk.bf16.mxu0 %vm7144_vm4, %v8155_v48  ;;  %v4832_v25 = vsel %vm498_vm1, %v4829_v14, %v4831_v30 }
 0xc8e   : > { %6587 = vmatprep.subr.bf16.mxu0 %v8155_v48  ;;  %6623 = vmatprep.subr.bf16.mxu1 %v8155_v48 }
 0xc8f   : > { %6574 = vmatmul.mubr.bf16.gmra.mrb[152].mxu1 %v4488_v60  ;;  %v4548_v12 = vshll.u32 %v4488_v60, 16  ;;  %v4552_v42 = vshrl.u32 %v4488_v60, 16  ;;  %v4833_v40 = vrot.slane %v4488_v60, 1 }
 0xc90   : > { %6577 = vmatprep.mubr.msk.bf16.mxu1 %vm7144_vm4, %v8155_v48  ;;  %6631 = vmatpush3.bf16.msra.mxu1 %v6969_v61 }
 0xc91   : > { %6588 = vmatpush3.bf16.msra.mxu0 %v6966_v26  ;;  %v4550_v3 = vrot.slane %v4548_v12, 1  ;;  %6624 = vmatprep.subr.bf16.mxu1 %v8155_v48  ;;  %v4834_v11 = vsel %vm498_vm1, %v4831_v30, %v4833_v40 }
 0xc92   : > { %v4483_v47 = vld [vmem:[#allocation2 + $0x47] sm:$0xff]  ;;  %v4484_v49 = vld [vmem:[#allocation2 + $0x4f] sm:$0x3]  ;;  %6589 = vmatprep.subr.bf16.mxu0 %v8155_v48 }
 0xc93   : > { %v4551_v52 = vsel %vm269_vm0, %v4546_v22, %v4550_v3  ;;  %v4489_v23 = vpack.c.bf16 %v4484_v49, %v4483_v47  ;;  %v4554_v10 = vor.u32 %v4552_v42, %v4550_v3  ;;  %v5391_v47 = vld [vmem:[#allocation9 + $0xc] ss:$0 sm:$0xff] }
 0xc94   : > { %6534 = vmatmul.mubr.bf16.gmra.mrb[124].mxu0 %v4551_v52  ;;  %6632 = vmatpush3.bf16.msra.mxu1 %v6970_v63 }
 0xc95   : > { %6590 = vmatpush3.bf16.msra.mxu0 %v6967_v58  ;;  %6537 = vmatprep.mubr.msk.bf16.mxu0 %vm7144_vm4, %v8155_v48  ;;  %v4556_v41 = vshll.u32 %v4489_v23, 16  ;;  %v4835_v32 = vrot.slane %v4489_v23, 1  ;;  %v4560_v16 = vshrl.u32 %v4489_v23, 16 }
 0xc96   : > { %6591 = vmatprep.subr.bf16.mxu0 %v8155_v48 }
 0xc97   : > { %6578 = vmatmul.mubr.bf16.gmra.mrb[156].mxu1 %v4489_v23  ;;  %v4558_v39 = vrot.slane %v4556_v41, 1  ;;  %v4836_v56 = vsel %vm498_vm1, %v4833_v40, %v4835_v32 }
 0xc98   : > { %6609 = vmatprep.mubr.msk.bf16.mxu1 %vm7144_vm4, %v8155_v48 }
 0xc99   : > { %6592 = vmatpush3.bf16.msra.mxu0 %v6968_v38  ;;  %v4559_v33 = vsel %vm269_vm0, %v4554_v10, %v4558_v39  ;;  %v4562_v28 = vor.u32 %v4560_v16, %v4558_v39 }
 0xc9a   : > { %6593 = vmatprep.subr.bf16.mxu0 %v8155_v48 }
 0xc9c   : > { %6538 = vmatmul.mubr.bf16.gmra.mrb[128].mxu0 %v4559_v33 }
 0xc9d   : > { %6594 = vmatpush3.bf16.msra.mxu0 %v6969_v61  ;;  %6541 = vmatprep.mubr.msk.bf16.mxu0 %vm7144_vm4, %v8155_v48 }
 0xc9e   : > { %6595 = vmatprep.subr.bf16.mxu0 %v8155_v48 }
 0xc9f   : > { %6610 = vmatmul.mubr.bf16.vlgmr.msra.gmra.mrb[160].mxu1 %v4836_v56 }
 0xca0   : > { %6613 = vmatprep.mubr.msk.bf16.mxu1 %vm7144_vm4, %v8155_v48 }
 0xca1   : > { %6596 = vmatpush3.bf16.msra.mxu0 %v6970_v63 }
 0xca4   : > { %6542 = vmatmul.mubr.bf16.gmra.mrb[132].mxu0 %v4562_v28 }
 0xca5   : > { %6597 = vmatprep.mubr.msk.bf16.mxu0 %vm7144_vm4, %v8155_v48 }
 0xca7   : > { %6614 = vmatmul.mubr.bf16.gmra.mrb[164].mxu1 %v4835_v32 }
 0xcac   : > { %6598 = vmatmul.mubr.bf16.vlgmr.msra.gmra.mrb[136].mxu0 %v4830_v53 }
 0xcad   : > { %6601 = vmatprep.mubr.msk.bf16.mxu0 %vm7144_vm4, %v8155_v48 }
 0xcb4   : > { %6602 = vmatmul.mubr.bf16.gmra.mrb[140].mxu0 %v4832_v25 }
 0xcb5   : > { %6605 = vmatprep.mubr.msk.bf16.mxu0 %vm7144_vm4, %v8155_v48 }
 0xcbc   : > { %6606 = vmatmul.mubr.bf16.gmra.mrb[144].mxu0 %v4834_v11 }
 0xd4a   : > { %v4769_v31 = vpop.f32.mrb[140].mxu1 }
 0xd4b   : > { %v6563_v8 = vpop.f32.mrb[141].mxu1 }
 0xd4c   : > { %v4772_v55 = vpop.f32.mrb[142].mxu1 }
 0xd4d   : > { %v6564_v29 = vpop.f32.mrb[143].mxu1 }
 0xd52   : > { %v4777_v37 = vpop.f32.mrb[144].mxu1 }
 0xd53   : > { %v6567_v19 = vpop.f32.mrb[145].mxu1 }
 0xd54   : > { %v4780_v50 = vpop.f32.mrb[146].mxu1 }
 0xd55   : > { %v6568_v1 = vpop.f32.mrb[147].mxu1 }
 0xd57   : > { %v4650_v18 = vpop.f32.mrb[116].mxu0 }
 0xd58   : > { %v4770_v24 = vadd.f32 %v4769_v31, %v4650_v18  ;;  %v6527_v26 = vpop.f32.mrb[117].mxu0 }
 0xd59   : > { %v4653_v51 = vpop.f32.mrb[118].mxu0 }
 0xd5a   : > { %v4773_v57 = vadd.f32 %v4772_v55, %v4653_v51  ;;  %v6528_v6 = vpop.f32.mrb[119].mxu0  ;;  %v4785_v7 = vpop.f32.mrb[148].mxu1 }
 0xd5b   : > { %v6571_v4 = vpop.f32.mrb[149].mxu1 }
 0xd5c   : > { %v4787_v48 = vpop.f32.mrb[150].mxu1 }
 0xd5d   : > { %v6572_v44 = vpop.f32.mrb[151].mxu1 }
 0xd5f   : > { %v4658_v9 = vpop.f32.mrb[120].mxu0 }
 0xd60   : > { %v4778_v15 = vadd.f32 %v4777_v37, %v4658_v9  ;;  %v6531_v45 = vpop.f32.mrb[121].mxu0 }
 0xd61   : > { %v4661_v58 = vpop.f32.mrb[122].mxu0 }
 0xd62   : > { %v4781_v46 = vadd.f32 %v4780_v50, %v4661_v58  ;;  %v6532_v17 = vpop.f32.mrb[123].mxu0  ;;  %v4792_v27 = vpop.f32.mrb[152].mxu1 }
 0xd63   : > { %v6575_v2 = vpop.f32.mrb[153].mxu1 }
 0xd64   : > { %v4795_v34 = vpop.f32.mrb[154].mxu1 }
 0xd65   : > { %v6576_v21 = vpop.f32.mrb[155].mxu1 }
 0xd67   : > { %v4666_v35 = vpop.f32.mrb[124].mxu0 }
 0xd68   : > { %v6535_v43 = vpop.f32.mrb[125].mxu0 }
 0xd69   : > { %v4668_v38 = vpop.f32.mrb[126].mxu0 }
 0xd6a   : > { %v8227_v20 = vadd.f32 %v4787_v48, %v4668_v38  ;;  %v6536_v54 = vpop.f32.mrb[127].mxu0  ;;  %v4800_v62 = vpop.f32.mrb[156].mxu1 }
 0xd6b   : > { %v6579_v5 = vpop.f32.mrb[157].mxu1 }
 0xd6c   : > { %v4803_v0 = vpop.f32.mrb[158].mxu1 }
 0xd6d   : > { %v6580_v36 = vpop.f32.mrb[159].mxu1 }
 0xd6f   : > { %v4673_v61 = vpop.f32.mrb[128].mxu0 }
 0xd70   : > { %v4793_v60 = vadd.f32 %v4792_v27, %v4673_v61  ;;  %v6539_v13 = vpop.f32.mrb[129].mxu0 }
 0xd71   : > { %v4676_v12 = vpop.f32.mrb[130].mxu0 }
 0xd72   : > { %v4796_v63 = vadd.f32 %v4795_v34, %v4676_v12  ;;  %v6540_v22 = vpop.f32.mrb[131].mxu0  ;;  %v4947_v3 = vpop.f32.mrb[160].mxu1 }
 0xd73   : > { %v4966_v49 = vadd.f32 %v4947_v3, %v4793_v60  ;;  %v6611_v52 = vpop.f32.mrb[161].mxu1 }
 0xd74   : > { %v4950_v23 = vpop.f32.mrb[162].mxu1 }
 0xd75   : > { %v4982_v41 = vadd.f32 %v5391_v47, %v4966_v49  ;;  %v4967_v42 = vadd.f32 %v4950_v23, %v4796_v63  ;;  %v6612_v39 = vpop.f32.mrb[163].mxu1 }
 0xd77   : > { %5393 = vst [vmem:[%s8230_s20 + $0x28] sm:$0xff] %v4982_v41  ;;  %v4983_v10 = vadd.f32 %v5391_v47, %v4967_v42  ;;  %v4681_v32 = vpop.f32.mrb[132].mxu0 }
 0xd78   : > { %v4801_v33 = vadd.f32 %v4800_v62, %v4681_v32  ;;  %v6543_v40 = vpop.f32.mrb[133].mxu0 }
 0xd79   : > { %5394 = vst [vmem:[%s8230_s20 + $0x30] sm:$0xff] %v4983_v10  ;;  %v4684_v56 = vpop.f32.mrb[134].mxu0 }
 0xd7a   : > { %v6544_v16 = vpop.f32.mrb[135].mxu0  ;;  %v4955_v28 = vpop.f32.mrb[164].mxu1 }
 0xd7b   : > { %v4968_v14 = vadd.f32 %v4955_v28, %v4801_v33  ;;  %v6615_v59 = vpop.f32.mrb[165].mxu1 }
 0xd7c   : > { %v4958_v53 = vpop.f32.mrb[166].mxu1 }
 0xd7d   : > { %v4984_v30 = vadd.f32 %v5391_v47, %v4968_v14  ;;  %v6616_v25 = vpop.f32.mrb[167].mxu1 }
 0xd7f   : > { %5395 = vst [vmem:[%s8230_s20 + $0x38] sm:$0xff] %v4984_v30  ;;  %v4924_v11 = vpop.f32.mrb[136].mxu0 }
 0xd80   : > { %v4961_v31 = vadd.f32 %v4924_v11, %v4770_v24  ;;  %v6599_v8 = vpop.f32.mrb[137].mxu0 }
 0xd81   : > { %v4927_v55 = vpop.f32.mrb[138].mxu0 }
 0xd82   : > { %v4977_v29 = vadd.f32 %v5391_v47, %v4961_v31  ;;  %v4962_v37 = vadd.f32 %v4927_v55, %v4773_v57  ;;  %v6600_v19 = vpop.f32.mrb[139].mxu0 }
 0xd84   : > { %4985 = vst [vmem:[%s8230_s20] sm:$0xff] %v4977_v29  ;;  %v4978_v50 = vadd.f32 %v5391_v47, %v4962_v37 }
 0xd86   : > { %4986 = vst [vmem:[%s8230_s20 + $0x8] sm:$0xff] %v4978_v50 }
 0xd87   : > { %v4932_v1 = vpop.f32.mrb[140].mxu0 }
 0xd88   : > { %v4963_v18 = vadd.f32 %v4932_v1, %v4778_v15  ;;  %v6603_v26 = vpop.f32.mrb[141].mxu0 }
 0xd89   : > { %v4935_v51 = vpop.f32.mrb[142].mxu0 }
 0xd8a   : > { %v4979_v6 = vadd.f32 %v5391_v47, %v4963_v18  ;;  %v4964_v7 = vadd.f32 %v4935_v51, %v4781_v46  ;;  %v6604_v24 = vpop.f32.mrb[143].mxu0 }
 0xd8c   : > { %4987 = vst [vmem:[%s8230_s20 + $0x10] sm:$0xff] %v4979_v6  ;;  %v4980_v4 = vadd.f32 %v5391_v47, %v4964_v7 }
 0xd8e   : > { %4988 = vst [vmem:[%s8230_s20 + $0x18] sm:$0xff] %v4980_v4 }
 0xd8f   : > { %v4940_v57 = vpop.f32.mrb[144].mxu0 }
 0xd90   : > { %v6607_v48 = vpop.f32.mrb[145].mxu0 }
 0xd91   : > { %v4942_v44 = vpop.f32.mrb[146].mxu0 }
 0xd92   : > { %v4965_v9 = vadd.f32 %v4942_v44, %v8227_v20  ;;  %v6608_v15 = vpop.f32.mrb[147].mxu0 }
 0xd94   : > { %v4981_v45 = vadd.f32 %v5391_v47, %v4965_v9 }
 0xd96   : > { %5392 = vst [vmem:[%s8230_s20 + $0x20] sm:$0xff] %v4981_v45 }
 0xd97   : > { %7075 = shalt.err (!%p7072_p2)
}
 0xd98   : > { %s7076_s21 = scalar_lea.hbm %s8247_s8, 1024  ;;  %s7080_s4 = scalar_lea.hbm %s8295_s3, 2048 }
 0xd99   : > { %p7077_p13 = scmp.ne.s32.totalorder %s8247_s8, %s7076_s21  ;;  %p7081_p4 = scmp.lt.u32.totalorder %s8247_s8, %s8295_s3 }
 0xd9a   : > { %p7082_p7 = scmp.lt.u32.totalorder %s7080_s4, %s7076_s21  ;;  %p7084_p11 = scmp.lt.u32.totalorder %s7076_s21, %s8247_s8 }
 0xd9b   : > { %p7078_p6 = pnand %p7077_p13, %p8309_p0 }
 0xd9c   : > { %p7083_p8 = por %p7082_p7, %p7081_p4 }
 0xd9d   : > { %p7079_p10 = pneg %p7078_p6 }
 0xd9e   : > { %p7085_p1 = por %p7084_p11, %p7083_p8 }
 0xda0   : > { %p7086_p3 = pnand %p7085_p1, %p7079_p10 }
 0xda2   : > { %7089 = shalt.err (!%p7086_p3)
}
 0xda3   : > { %s7146_s18 = smov 128   ;;  %s7147_s20 = smov 8  }
 0xda4   : > { %6672 = dma.vmem_to_hbm [thread:$0]  (%p8309_p0), %s8241_s26, 1024, %s8247_s8, %s4995_s9, %s7146_s18, %s7146_s18, %s7147_s20  }
 0xda5 PF: > { %s5024_s28 = sand.u32 1, %s7120_s12   ;;  %p8310_p5 = scmp.ne.s32.totalorder %s8300_s19, 0 }
 0xda6   : > { %p8311_p9 = scmp.ge.s32.totalorder %s7132_s15, 2  ;;  %s5025_s22 = scalar_lea.sflag [#allocation6], %s5024_s28 }
 0xda8   : > { %p6686_p12 = pnand %p8311_p9, %p8310_p5 }
 0xdaa   : > { %7115 = dma.done.wait (!%p6686_p12), %s5025_s22, 1024  }
 0xdab   : > { %7117 = vsyncadd (!%p6686_p12), %s5025_s22, 4294966272  ;;  %p17_p2 = scmp.ge.s32.totalorder %s7279_s7, 4   ;;  %s8312_s12 = smov %s7124_s13 }
 0xdac   : > { %s8313_s13 = smov %s7128_s14  ;;  %s8314_s14 = smov %s7288_s10 }
 0xdad   : > { %s8315_s15 = smov %s7279_s7  ;;  %19 = sbr.rel (!%p17_p2) target bundleno = 6 (0x6), region = 141 }
 0xdb4   :  { %5030 = vsyncpa [#allocation5], 1 }
 0xdb5   :  { %5032 = vsyncpa [#allocation5 + $0x1], 1 }
 0xdb6   :  { %5033 = vsyncpa [#allocation8], 1 }
 0xdb7   :  { %5034 = vsyncpa [#allocation6], 1 }
 0xdb8   :  { %5036 = vsyncpa [#allocation6 + $0x1], 1 }

</bundles_post_ra>
